<compile_context>
chip_gen: v6e
topology: v6e:2x2x1
jax: 0.10.0
libtpu: 0.0.40
codegen_flags: <defaults>
</compile_context>

<pallas_src>
import functools

import jax
import jax.numpy as jnp
import numpy as np
from jax import lax
from jax.experimental import pallas as pl
from jax.experimental.pallas import tpu as pltpu

EPS = 1e-5


def _down_kernel(x_ref, w1_ref, b1_ref, g1_ref, be1_ref,
                 w2_ref, b2_ref, g2_ref, be2_ref,
                 o_ref,
                 pad1_ref, pad2_ref,
                 *, N, H, W, Cin, Cmid, Cout):
    """x_ref: (N, H, W, Cin) f32 NHWC.  o_ref: (N, H//2, W//2, Cout) f32 NHWC."""
    Hp, Wp = H // 2, W // 2
    M = N * Hp * Wp
    f32 = jnp.float32
    bf16 = jnp.bfloat16

    # ---------- stage 1: 2x2 max-pool (pure VPU, no MXU) -------------------------
    # Horizontal (W) pairwise max via sublane-strided even/odd column loads.
    x_even = x_ref[:, :, pl.ds(0, Wp, stride=2), :]        # (N, H, Wp, Cin)
    x_odd = x_ref[:, :, pl.ds(1, Wp, stride=2), :]         # (N, H, Wp, Cin)
    colmax = jnp.maximum(x_even, x_odd)
    # Vertical (H) pairwise max: split the (major) H axis -- free regroup, then max.
    colmax = colmax.reshape(N, Hp, 2, Wp, Cin)
    pooled = jnp.maximum(colmax[:, :, 0], colmax[:, :, 1])  # (N, Hp, Wp, Cin)

    # Zero-padded conv1 input; single bulk interior store (no per-row masked writes).
    pad1_ref[...] = jnp.zeros(pad1_ref.shape, f32)
    pad1_ref[:, 1:1 + Hp, 1:1 + Wp, :] = pooled

    # ---------- stage 2: conv1 (3x3, pad=1) as 9 batched bf16 MXU matmuls --------
    acc1 = jnp.zeros((M, Cmid), f32)
    for dy in range(3):
        for dx in range(3):
            win = pad1_ref[:, dy:dy + Hp, dx:dx + Wp, :]    # (N, Hp, Wp, Cin)
            lhs = win.reshape(M, Cin).astype(bf16)          # Wp==8k => no-op retile
            acc1 = acc1 + jnp.dot(lhs, w1_ref[3 * dy + dx],
                                  preferred_element_type=f32)
    y1 = acc1 + b1_ref[...]                                 # (M, Cmid), bias loaded once

    # ---------- stage 3: BatchNorm (batch stats, biased var) + ReLU (f32) --------
    mu1 = jnp.mean(y1, axis=0, keepdims=True)
    var1 = jnp.mean((y1 - mu1) ** 2, axis=0, keepdims=True)
    h1 = jnp.maximum(
        (y1 - mu1) * lax.rsqrt(var1 + EPS) * g1_ref[...] + be1_ref[...], 0.0)

    # ---------- stage 4: conv2 padded input (no c1 scratch round-trip) -----------
    pad2_ref[...] = jnp.zeros(pad2_ref.shape, f32)
    pad2_ref[:, 1:1 + Hp, 1:1 + Wp, :] = h1.reshape(N, Hp, Wp, Cmid)

    # ---------- stage 5: conv2 (3x3, pad=1) --------------------------------------
    acc2 = jnp.zeros((M, Cout), f32)
    for dy in range(3):
        for dx in range(3):
            win = pad2_ref[:, dy:dy + Hp, dx:dx + Wp, :]    # (N, Hp, Wp, Cmid)
            lhs = win.reshape(M, Cmid).astype(bf16)
            acc2 = acc2 + jnp.dot(lhs, w2_ref[3 * dy + dx],
                                  preferred_element_type=f32)
    y2 = acc2 + b2_ref[...]

    # ---------- stage 6: BatchNorm + ReLU -> output ------------------------------
    mu2 = jnp.mean(y2, axis=0, keepdims=True)
    var2 = jnp.mean((y2 - mu2) ** 2, axis=0, keepdims=True)
    h2 = jnp.maximum(
        (y2 - mu2) * lax.rsqrt(var2 + EPS) * g2_ref[...] + be2_ref[...], 0.0)
    o_ref[...] = h2.reshape(N, Hp, Wp, Cout)


def down_forward(x_nchw, params):
    """DownDrop.forward.  x_nchw: (N, Cin, H, W) -> (N, Cout, H//2, W//2)."""
    w1, b1, g1, be1, w2, b2, g2, be2 = params     # PyTorch-convention shapes
    N, Cin, H, W = x_nchw.shape
    assert H % 2 == 0 and W % 2 == 0, "MaxPool2d(2) assumes even H, W"
    Cmid, Cout = w1.shape[0], w2.shape[0]
    Hp, Wp = H // 2, W // 2

    x_nhwc = jnp.transpose(x_nchw, (0, 2, 3, 1)).astype(jnp.float32)
    # conv weights: (O, I, 3, 3) -> (3, 3, I, O) -> (9, I, O), cast to bf16 for the MXU.
    w1_k = jnp.transpose(w1, (2, 3, 1, 0)).reshape(9, Cin, Cmid).astype(jnp.bfloat16)
    w2_k = jnp.transpose(w2, (2, 3, 1, 0)).reshape(9, Cmid, Cout).astype(jnp.bfloat16)
    b1_k = b1.reshape(1, Cmid).astype(jnp.float32)
    g1_k = g1.reshape(1, Cmid).astype(jnp.float32)
    be1_k = be1.reshape(1, Cmid).astype(jnp.float32)
    b2_k = b2.reshape(1, Cout).astype(jnp.float32)
    g2_k = g2.reshape(1, Cout).astype(jnp.float32)
    be2_k = be2.reshape(1, Cout).astype(jnp.float32)

    kernel = functools.partial(_down_kernel, N=N, H=H, W=W,
                               Cin=Cin, Cmid=Cmid, Cout=Cout)
    vmem = pl.BlockSpec(memory_space=pltpu.MemorySpace.VMEM)  # whole array in VMEM

    def nbytes(shape, dtype):
        return int(np.prod(shape)) * jnp.dtype(dtype).itemsize

    working = (nbytes((N, H, W, Cin), jnp.float32)
               + nbytes((9, Cin, Cmid), jnp.bfloat16)
               + nbytes((9, Cmid, Cout), jnp.bfloat16)
               + nbytes((N, Hp, Wp, Cout), jnp.float32)
               + nbytes((N, Hp + 2, Wp + 2, Cin), jnp.float32)
               + nbytes((N, Hp + 2, Wp + 2, Cmid), jnp.float32))
    # Explicit scoped-VMEM budget: generous multiple of the working set (covers lane
    # padding + live values), floored at the 32 MiB default, capped under v7x physical.
    vmem_limit = min(max(6 * working + (8 << 20), 32 << 20), 64 << 20)

    out_nhwc = pl.pallas_call(
        kernel,
        out_shape=jax.ShapeDtypeStruct((N, Hp, Wp, Cout), jnp.float32),
        in_specs=[vmem] * 9,
        out_specs=vmem,
        scratch_shapes=[
            pltpu.VMEM((N, Hp + 2, Wp + 2, Cin), jnp.float32),   # padded pool output
            pltpu.VMEM((N, Hp + 2, Wp + 2, Cmid), jnp.float32),  # padded conv2 input
        ],
        compiler_params=pltpu.CompilerParams(vmem_limit_bytes=int(vmem_limit)),
    )(x_nhwc, w1_k, b1_k, g1_k, be1_k, w2_k, b2_k, g2_k, be2_k)

    return jnp.transpose(out_nhwc, (0, 3, 1, 2))                 # back to NCHW


def down_reference(x_nchw, params):
    """Pure-JAX reference for DownDrop.forward (training-mode BN), with the same
    numerics as the kernel: bf16 conv operands, f32 accumulation, f32 pool/BN/ReLU."""
    w1, b1, g1, be1, w2, b2, g2, be2 = params
    x = jnp.transpose(x_nchw, (0, 2, 3, 1)).astype(jnp.float32)
    N, H, W, Cin = x.shape
    xp = jnp.max(x.reshape(N, H // 2, 2, W // 2, 2, Cin), axis=(2, 4))

    def conv_bn_relu(h, w, b, g, be):
        wf = jnp.transpose(w, (2, 3, 1, 0)).astype(jnp.bfloat16)   # HWIO
        y = lax.conv_general_dilated(h.astype(jnp.bfloat16), wf, (1, 1), "SAME",
                                     dimension_numbers=("NHWC", "HWIO", "NHWC"),
                                     preferred_element_type=jnp.float32)
        y = y + b.reshape(1, 1, 1, -1)
        mu = jnp.mean(y, axis=(0, 1, 2), keepdims=True)
        var = jnp.mean((y - mu) ** 2, axis=(0, 1, 2), keepdims=True)
        return jnp.maximum((y - mu) * lax.rsqrt(var + EPS) * g.reshape(1, 1, 1, -1)
                           + be.reshape(1, 1, 1, -1), 0.0)

    h1 = conv_bn_relu(xp, w1, b1, g1, be1)
    h2 = conv_bn_relu(h1, w2, b2, g2, be2)
    return jnp.transpose(h2, (0, 3, 1, 2))


if __name__ == "__main__":
    key = jax.random.PRNGKey(0)
    N, Cin, H, W = 2, 4, 16, 16
    Cout = 8
    Cmid = Cout   # DoubleConv: mid_channels defaults to out_channels

    ks = jax.random.split(key, 9)
    x = jax.random.normal(ks[0], (N, Cin, H, W), jnp.float32)
    w1 = 0.2 * jax.random.normal(ks[1], (Cmid, Cin, 3, 3), jnp.float32)
    b1 = 0.1 * jax.random.normal(ks[2], (Cmid,), jnp.float32)
    g1 = 1.0 + 0.1 * jax.random.normal(ks[3], (Cmid,), jnp.float32)
    be1 = 0.1 * jax.random.normal(ks[4], (Cmid,), jnp.float32)
    w2 = 0.2 * jax.random.normal(ks[5], (Cout, Cmid, 3, 3), jnp.float32)
    b2 = 0.1 * jax.random.normal(ks[6], (Cout,), jnp.float32)
    g2 = 1.0 + 0.1 * jax.random.normal(ks[7], (Cout,), jnp.float32)
    be2 = 0.1 * jax.random.normal(ks[8], (Cout,), jnp.float32)
    params = (w1, b1, g1, be1, w2, b2, g2, be2)

    out = jax.block_until_ready(down_forward(x, params))
    ref = jax.block_until_ready(down_reference(x, params))

    assert out.shape == (N, Cout, H // 2, W // 2), out.shape
    np.testing.assert_allclose(np.asarray(out), np.asarray(ref), rtol=2e-3, atol=2e-3)
    print("KERNEL_OK")
</pallas_src>

<mosaic_0001>
module attributes {stable_mosaic.version = 11 : i64} {
  func.func @_down_kernel(%arg0: memref<2x16x16x4xf32, #tpu.memory_space<vmem>>, %arg1: memref<9x4x8xbf16, #tpu.memory_space<vmem>>, %arg2: memref<1x8xf32, #tpu.memory_space<vmem>>, %arg3: memref<1x8xf32, #tpu.memory_space<vmem>>, %arg4: memref<1x8xf32, #tpu.memory_space<vmem>>, %arg5: memref<9x8x8xbf16, #tpu.memory_space<vmem>>, %arg6: memref<1x8xf32, #tpu.memory_space<vmem>>, %arg7: memref<1x8xf32, #tpu.memory_space<vmem>>, %arg8: memref<1x8xf32, #tpu.memory_space<vmem>>, %arg9: memref<2x8x8x8xf32, #tpu.memory_space<vmem>>, %arg10: memref<2x10x10x4xf32, #tpu.memory_space<vmem>>, %arg11: memref<2x10x10x8xf32, #tpu.memory_space<vmem>>) attributes {dimension_semantics = [], scalar_prefetch = 0 : i64, scratch_operands = 2 : i64, tpu.core_type = #tpu.core_type<tc>} {
    %c0 = arith.constant 0 : index
    %c0_0 = arith.constant 0 : index
    %c0_1 = arith.constant 0 : index
    %c0_2 = arith.constant 0 : index
    %0 = tpu.strided_load %arg0[%c0, %c0_0, %c0_1, %c0_2] {strides = array<i32: 1, 1, 2, 1>} : memref<2x16x16x4xf32, #tpu.memory_space<vmem>>, vector<2x16x8x4xf32>
    %c0_3 = arith.constant 0 : index
    %c0_4 = arith.constant 0 : index
    %c1 = arith.constant 1 : index
    %c0_5 = arith.constant 0 : index
    %1 = tpu.strided_load %arg0[%c0_3, %c0_4, %c1, %c0_5] {strides = array<i32: 1, 1, 2, 1>} : memref<2x16x16x4xf32, #tpu.memory_space<vmem>>, vector<2x16x8x4xf32>
    %2 = arith.maximumf %0, %1 : vector<2x16x8x4xf32>
    %3 = vector.shape_cast %2 : vector<2x16x8x4xf32> to vector<2x8x2x8x4xf32>
    %4 = vector.extract_strided_slice %3 {offsets = [0, 0, 0, 0, 0], sizes = [2, 8, 1, 8, 4], strides = [1, 1, 1, 1, 1]} : vector<2x8x2x8x4xf32> to vector<2x8x1x8x4xf32>
    %5 = vector.shape_cast %4 : vector<2x8x1x8x4xf32> to vector<2x8x8x4xf32>
    %6 = vector.extract_strided_slice %3 {offsets = [0, 0, 1, 0, 0], sizes = [2, 8, 1, 8, 4], strides = [1, 1, 1, 1, 1]} : vector<2x8x2x8x4xf32> to vector<2x8x1x8x4xf32>
    %7 = vector.shape_cast %6 : vector<2x8x1x8x4xf32> to vector<2x8x8x4xf32>
    %8 = arith.maximumf %5, %7 : vector<2x8x8x4xf32>
    %cst = arith.constant 0.000000e+00 : f32
    %9 = vector.broadcast %cst : f32 to vector<2x10x10x4xf32>
    %c0_6 = arith.constant 0 : index
    %c0_7 = arith.constant 0 : index
    %c0_8 = arith.constant 0 : index
    %c0_9 = arith.constant 0 : index
    %10 = vector.load %arg10[%c0_6, %c0_7, %c0_8, %c0_9] : memref<2x10x10x4xf32, #tpu.memory_space<vmem>>, vector<2x10x10x4xf32>
    tpu.vector_store %arg10[%c0_6, %c0_7, %c0_8, %c0_9], %9 {strides = array<i32>} : memref<2x10x10x4xf32, #tpu.memory_space<vmem>>, vector<2x10x10x4xf32>,
    %c0_10 = arith.constant 0 : index
    %c1_11 = arith.constant 1 : index
    %c1_12 = arith.constant 1 : index
    %c0_13 = arith.constant 0 : index
    %11 = vector.load %arg10[%c0_10, %c1_11, %c1_12, %c0_13] : memref<2x10x10x4xf32, #tpu.memory_space<vmem>>, vector<2x8x8x4xf32>
    tpu.vector_store %arg10[%c0_10, %c1_11, %c1_12, %c0_13], %8 {strides = array<i32>} : memref<2x10x10x4xf32, #tpu.memory_space<vmem>>, vector<2x8x8x4xf32>,
    %cst_14 = arith.constant 0.000000e+00 : f32
    %12 = vector.broadcast %cst_14 : f32 to vector<128x8xf32>
    %c0_15 = arith.constant 0 : index
    %c0_16 = arith.constant 0 : index
    %c0_17 = arith.constant 0 : index
    %c0_18 = arith.constant 0 : index
    %13 = vector.load %arg10[%c0_15, %c0_16, %c0_17, %c0_18] : memref<2x10x10x4xf32, #tpu.memory_space<vmem>>, vector<2x8x8x4xf32>
    %14 = vector.shape_cast %13 : vector<2x8x8x4xf32> to vector<128x4xf32>
    %15 = arith.truncf %14 : vector<128x4xf32> to vector<128x4xbf16>
    %c0_19 = arith.constant 0 : index
    %c0_20 = arith.constant 0 : index
    %c0_21 = arith.constant 0 : index
    %16 = vector.load %arg1[%c0_19, %c0_20, %c0_21] : memref<9x4x8xbf16, #tpu.memory_space<vmem>>, vector<1x4x8xbf16>
    %17 = vector.shape_cast %16 : vector<1x4x8xbf16> to vector<4x8xbf16>
    %cst_22 = arith.constant dense<0.000000e+00> : vector<128x8xf32>
    %18 = tpu.matmul %15, %17, %cst_22 {dimension_numbers = #tpu.dot_dimension_numbers<[1], [0], [0], [1], [0, 0, 1, 1], [], []>} : vector<128x4xbf16>, vector<4x8xbf16>, vector<128x8xf32> -> vector<128x8xf32>
    %19 = arith.addf %12, %18 : vector<128x8xf32>
    %c0_23 = arith.constant 0 : index
    %c0_24 = arith.constant 0 : index
    %c1_25 = arith.constant 1 : index
    %c0_26 = arith.constant 0 : index
    %20 = vector.load %arg10[%c0_23, %c0_24, %c1_25, %c0_26] : memref<2x10x10x4xf32, #tpu.memory_space<vmem>>, vector<2x8x8x4xf32>
    %21 = vector.shape_cast %20 : vector<2x8x8x4xf32> to vector<128x4xf32>
    %22 = arith.truncf %21 : vector<128x4xf32> to vector<128x4xbf16>
    %c1_27 = arith.constant 1 : index
    %c0_28 = arith.constant 0 : index
    %c0_29 = arith.constant 0 : index
    %23 = vector.load %arg1[%c1_27, %c0_28, %c0_29] : memref<9x4x8xbf16, #tpu.memory_space<vmem>>, vector<1x4x8xbf16>
    %24 = vector.shape_cast %23 : vector<1x4x8xbf16> to vector<4x8xbf16>
    %cst_30 = arith.constant dense<0.000000e+00> : vector<128x8xf32>
    %25 = tpu.matmul %22, %24, %cst_30 {dimension_numbers = #tpu.dot_dimension_numbers<[1], [0], [0], [1], [0, 0, 1, 1], [], []>} : vector<128x4xbf16>, vector<4x8xbf16>, vector<128x8xf32> -> vector<128x8xf32>
    %26 = arith.addf %19, %25 : vector<128x8xf32>
    %c0_31 = arith.constant 0 : index
    %c0_32 = arith.constant 0 : index
    %c2 = arith.constant 2 : index
    %c0_33 = arith.constant 0 : index
    %27 = vector.load %arg10[%c0_31, %c0_32, %c2, %c0_33] : memref<2x10x10x4xf32, #tpu.memory_space<vmem>>, vector<2x8x8x4xf32>
    %28 = vector.shape_cast %27 : vector<2x8x8x4xf32> to vector<128x4xf32>
    %29 = arith.truncf %28 : vector<128x4xf32> to vector<128x4xbf16>
    %c2_34 = arith.constant 2 : index
    %c0_35 = arith.constant 0 : index
    %c0_36 = arith.constant 0 : index
    %30 = vector.load %arg1[%c2_34, %c0_35, %c0_36] : memref<9x4x8xbf16, #tpu.memory_space<vmem>>, vector<1x4x8xbf16>
    %31 = vector.shape_cast %30 : vector<1x4x8xbf16> to vector<4x8xbf16>
    %cst_37 = arith.constant dense<0.000000e+00> : vector<128x8xf32>
    %32 = tpu.matmul %29, %31, %cst_37 {dimension_numbers = #tpu.dot_dimension_numbers<[1], [0], [0], [1], [0, 0, 1, 1], [], []>} : vector<128x4xbf16>, vector<4x8xbf16>, vector<128x8xf32> -> vector<128x8xf32>
    %33 = arith.addf %26, %32 : vector<128x8xf32>
    %c0_38 = arith.constant 0 : index
    %c1_39 = arith.constant 1 : index
    %c0_40 = arith.constant 0 : index
    %c0_41 = arith.constant 0 : index
    %34 = vector.load %arg10[%c0_38, %c1_39, %c0_40, %c0_41] : memref<2x10x10x4xf32, #tpu.memory_space<vmem>>, vector<2x8x8x4xf32>
    %35 = vector.shape_cast %34 : vector<2x8x8x4xf32> to vector<128x4xf32>
    %36 = arith.truncf %35 : vector<128x4xf32> to vector<128x4xbf16>
    %c3 = arith.constant 3 : index
    %c0_42 = arith.constant 0 : index
    %c0_43 = arith.constant 0 : index
    %37 = vector.load %arg1[%c3, %c0_42, %c0_43] : memref<9x4x8xbf16, #tpu.memory_space<vmem>>, vector<1x4x8xbf16>
    %38 = vector.shape_cast %37 : vector<1x4x8xbf16> to vector<4x8xbf16>
    %cst_44 = arith.constant dense<0.000000e+00> : vector<128x8xf32>
    %39 = tpu.matmul %36, %38, %cst_44 {dimension_numbers = #tpu.dot_dimension_numbers<[1], [0], [0], [1], [0, 0, 1, 1], [], []>} : vector<128x4xbf16>, vector<4x8xbf16>, vector<128x8xf32> -> vector<128x8xf32>
    %40 = arith.addf %33, %39 : vector<128x8xf32>
    %c0_45 = arith.constant 0 : index
    %c1_46 = arith.constant 1 : index
    %c1_47 = arith.constant 1 : index
    %c0_48 = arith.constant 0 : index
    %41 = vector.load %arg10[%c0_45, %c1_46, %c1_47, %c0_48] : memref<2x10x10x4xf32, #tpu.memory_space<vmem>>, vector<2x8x8x4xf32>
    %42 = vector.shape_cast %41 : vector<2x8x8x4xf32> to vector<128x4xf32>
    %43 = arith.truncf %42 : vector<128x4xf32> to vector<128x4xbf16>
    %c4 = arith.constant 4 : index
    %c0_49 = arith.constant 0 : index
    %c0_50 = arith.constant 0 : index
    %44 = vector.load %arg1[%c4, %c0_49, %c0_50] : memref<9x4x8xbf16, #tpu.memory_space<vmem>>, vector<1x4x8xbf16>
    %45 = vector.shape_cast %44 : vector<1x4x8xbf16> to vector<4x8xbf16>
    %cst_51 = arith.constant dense<0.000000e+00> : vector<128x8xf32>
    %46 = tpu.matmul %43, %45, %cst_51 {dimension_numbers = #tpu.dot_dimension_numbers<[1], [0], [0], [1], [0, 0, 1, 1], [], []>} : vector<128x4xbf16>, vector<4x8xbf16>, vector<128x8xf32> -> vector<128x8xf32>
    %47 = arith.addf %40, %46 : vector<128x8xf32>
    %c0_52 = arith.constant 0 : index
    %c1_53 = arith.constant 1 : index
    %c2_54 = arith.constant 2 : index
    %c0_55 = arith.constant 0 : index
    %48 = vector.load %arg10[%c0_52, %c1_53, %c2_54, %c0_55] : memref<2x10x10x4xf32, #tpu.memory_space<vmem>>, vector<2x8x8x4xf32>
    %49 = vector.shape_cast %48 : vector<2x8x8x4xf32> to vector<128x4xf32>
    %50 = arith.truncf %49 : vector<128x4xf32> to vector<128x4xbf16>
    %c5 = arith.constant 5 : index
    %c0_56 = arith.constant 0 : index
    %c0_57 = arith.constant 0 : index
    %51 = vector.load %arg1[%c5, %c0_56, %c0_57] : memref<9x4x8xbf16, #tpu.memory_space<vmem>>, vector<1x4x8xbf16>
    %52 = vector.shape_cast %51 : vector<1x4x8xbf16> to vector<4x8xbf16>
    %cst_58 = arith.constant dense<0.000000e+00> : vector<128x8xf32>
    %53 = tpu.matmul %50, %52, %cst_58 {dimension_numbers = #tpu.dot_dimension_numbers<[1], [0], [0], [1], [0, 0, 1, 1], [], []>} : vector<128x4xbf16>, vector<4x8xbf16>, vector<128x8xf32> -> vector<128x8xf32>
    %54 = arith.addf %47, %53 : vector<128x8xf32>
    %c0_59 = arith.constant 0 : index
    %c2_60 = arith.constant 2 : index
    %c0_61 = arith.constant 0 : index
    %c0_62 = arith.constant 0 : index
    %55 = vector.load %arg10[%c0_59, %c2_60, %c0_61, %c0_62] : memref<2x10x10x4xf32, #tpu.memory_space<vmem>>, vector<2x8x8x4xf32>
    %56 = vector.shape_cast %55 : vector<2x8x8x4xf32> to vector<128x4xf32>
    %57 = arith.truncf %56 : vector<128x4xf32> to vector<128x4xbf16>
    %c6 = arith.constant 6 : index
    %c0_63 = arith.constant 0 : index
    %c0_64 = arith.constant 0 : index
    %58 = vector.load %arg1[%c6, %c0_63, %c0_64] : memref<9x4x8xbf16, #tpu.memory_space<vmem>>, vector<1x4x8xbf16>
    %59 = vector.shape_cast %58 : vector<1x4x8xbf16> to vector<4x8xbf16>
    %cst_65 = arith.constant dense<0.000000e+00> : vector<128x8xf32>
    %60 = tpu.matmul %57, %59, %cst_65 {dimension_numbers = #tpu.dot_dimension_numbers<[1], [0], [0], [1], [0, 0, 1, 1], [], []>} : vector<128x4xbf16>, vector<4x8xbf16>, vector<128x8xf32> -> vector<128x8xf32>
    %61 = arith.addf %54, %60 : vector<128x8xf32>
    %c0_66 = arith.constant 0 : index
    %c2_67 = arith.constant 2 : index
    %c1_68 = arith.constant 1 : index
    %c0_69 = arith.constant 0 : index
    %62 = vector.load %arg10[%c0_66, %c2_67, %c1_68, %c0_69] : memref<2x10x10x4xf32, #tpu.memory_space<vmem>>, vector<2x8x8x4xf32>
    %63 = vector.shape_cast %62 : vector<2x8x8x4xf32> to vector<128x4xf32>
    %64 = arith.truncf %63 : vector<128x4xf32> to vector<128x4xbf16>
    %c7 = arith.constant 7 : index
    %c0_70 = arith.constant 0 : index
    %c0_71 = arith.constant 0 : index
    %65 = vector.load %arg1[%c7, %c0_70, %c0_71] : memref<9x4x8xbf16, #tpu.memory_space<vmem>>, vector<1x4x8xbf16>
    %66 = vector.shape_cast %65 : vector<1x4x8xbf16> to vector<4x8xbf16>
    %cst_72 = arith.constant dense<0.000000e+00> : vector<128x8xf32>
    %67 = tpu.matmul %64, %66, %cst_72 {dimension_numbers = #tpu.dot_dimension_numbers<[1], [0], [0], [1], [0, 0, 1, 1], [], []>} : vector<128x4xbf16>, vector<4x8xbf16>, vector<128x8xf32> -> vector<128x8xf32>
    %68 = arith.addf %61, %67 : vector<128x8xf32>
    %c0_73 = arith.constant 0 : index
    %c2_74 = arith.constant 2 : index
    %c2_75 = arith.constant 2 : index
    %c0_76 = arith.constant 0 : index
    %69 = vector.load %arg10[%c0_73, %c2_74, %c2_75, %c0_76] : memref<2x10x10x4xf32, #tpu.memory_space<vmem>>, vector<2x8x8x4xf32>
    %70 = vector.shape_cast %69 : vector<2x8x8x4xf32> to vector<128x4xf32>
    %71 = arith.truncf %70 : vector<128x4xf32> to vector<128x4xbf16>
    %c8 = arith.constant 8 : index
    %c0_77 = arith.constant 0 : index
    %c0_78 = arith.constant 0 : index
    %72 = vector.load %arg1[%c8, %c0_77, %c0_78] : memref<9x4x8xbf16, #tpu.memory_space<vmem>>, vector<1x4x8xbf16>
    %73 = vector.shape_cast %72 : vector<1x4x8xbf16> to vector<4x8xbf16>
    %cst_79 = arith.constant dense<0.000000e+00> : vector<128x8xf32>
    %74 = tpu.matmul %71, %73, %cst_79 {dimension_numbers = #tpu.dot_dimension_numbers<[1], [0], [0], [1], [0, 0, 1, 1], [], []>} : vector<128x4xbf16>, vector<4x8xbf16>, vector<128x8xf32> -> vector<128x8xf32>
    %75 = arith.addf %68, %74 : vector<128x8xf32>
    %c0_80 = arith.constant 0 : index
    %c0_81 = arith.constant 0 : index
    %76 = vector.load %arg2[%c0_80, %c0_81] : memref<1x8xf32, #tpu.memory_space<vmem>>, vector<1x8xf32>
    %77 = vector.broadcast %76 : vector<1x8xf32> to vector<128x8xf32>
    %78 = arith.addf %75, %77 : vector<128x8xf32>
    %cst_82 = arith.constant dense<0.000000e+00> : vector<8xf32>
    %79 = vector.multi_reduction <add>, %78, %cst_82 [0] : vector<128x8xf32> to vector<8xf32>
    %80 = vector.shape_cast %79 : vector<8xf32> to vector<1x8xf32>
    %cst_83 = arith.constant 1.280000e+02 : f32
    %81 = vector.broadcast %cst_83 : f32 to vector<1x8xf32>
    %82 = arith.divf %80, %81 : vector<1x8xf32>
    %83 = vector.broadcast %82 : vector<1x8xf32> to vector<128x8xf32>
    %84 = arith.subf %78, %83 : vector<128x8xf32>
    %85 = arith.mulf %84, %84 : vector<128x8xf32>
    %cst_84 = arith.constant dense<0.000000e+00> : vector<8xf32>
    %86 = vector.multi_reduction <add>, %85, %cst_84 [0] : vector<128x8xf32> to vector<8xf32>
    %87 = vector.shape_cast %86 : vector<8xf32> to vector<1x8xf32>
    %cst_85 = arith.constant 1.280000e+02 : f32
    %88 = vector.broadcast %cst_85 : f32 to vector<1x8xf32>
    %89 = arith.divf %87, %88 : vector<1x8xf32>
    %90 = vector.broadcast %82 : vector<1x8xf32> to vector<128x8xf32>
    %91 = arith.subf %78, %90 : vector<128x8xf32>
    %cst_86 = arith.constant 9.99999974E-6 : f32
    %92 = vector.broadcast %cst_86 : f32 to vector<1x8xf32>
    %93 = arith.addf %89, %92 : vector<1x8xf32>
    %94 = math.rsqrt %93 : vector<1x8xf32>
    %95 = vector.broadcast %94 : vector<1x8xf32> to vector<128x8xf32>
    %96 = arith.mulf %91, %95 : vector<128x8xf32>
    %c0_87 = arith.constant 0 : index
    %c0_88 = arith.constant 0 : index
    %97 = vector.load %arg3[%c0_87, %c0_88] : memref<1x8xf32, #tpu.memory_space<vmem>>, vector<1x8xf32>
    %98 = vector.broadcast %97 : vector<1x8xf32> to vector<128x8xf32>
    %99 = arith.mulf %96, %98 : vector<128x8xf32>
    %c0_89 = arith.constant 0 : index
    %c0_90 = arith.constant 0 : index
    %100 = vector.load %arg4[%c0_89, %c0_90] : memref<1x8xf32, #tpu.memory_space<vmem>>, vector<1x8xf32>
    %101 = vector.broadcast %100 : vector<1x8xf32> to vector<128x8xf32>
    %102 = arith.addf %99, %101 : vector<128x8xf32>
    %cst_91 = arith.constant 0.000000e+00 : f32
    %103 = vector.broadcast %cst_91 : f32 to vector<128x8xf32>
    %104 = arith.maximumf %102, %103 : vector<128x8xf32>
    %cst_92 = arith.constant 0.000000e+00 : f32
    %105 = vector.broadcast %cst_92 : f32 to vector<2x10x10x8xf32>
    %c0_93 = arith.constant 0 : index
    %c0_94 = arith.constant 0 : index
    %c0_95 = arith.constant 0 : index
    %c0_96 = arith.constant 0 : index
    %106 = vector.load %arg11[%c0_93, %c0_94, %c0_95, %c0_96] : memref<2x10x10x8xf32, #tpu.memory_space<vmem>>, vector<2x10x10x8xf32>
    tpu.vector_store %arg11[%c0_93, %c0_94, %c0_95, %c0_96], %105 {strides = array<i32>} : memref<2x10x10x8xf32, #tpu.memory_space<vmem>>, vector<2x10x10x8xf32>,
    %107 = vector.shape_cast %104 : vector<128x8xf32> to vector<2x8x8x8xf32>
    %c0_97 = arith.constant 0 : index
    %c1_98 = arith.constant 1 : index
    %c1_99 = arith.constant 1 : index
    %c0_100 = arith.constant 0 : index
    %108 = vector.load %arg11[%c0_97, %c1_98, %c1_99, %c0_100] : memref<2x10x10x8xf32, #tpu.memory_space<vmem>>, vector<2x8x8x8xf32>
    tpu.vector_store %arg11[%c0_97, %c1_98, %c1_99, %c0_100], %107 {strides = array<i32>} : memref<2x10x10x8xf32, #tpu.memory_space<vmem>>, vector<2x8x8x8xf32>,
    %cst_101 = arith.constant 0.000000e+00 : f32
    %109 = vector.broadcast %cst_101 : f32 to vector<128x8xf32>
    %c0_102 = arith.constant 0 : index
    %c0_103 = arith.constant 0 : index
    %c0_104 = arith.constant 0 : index
    %c0_105 = arith.constant 0 : index
    %110 = vector.load %arg11[%c0_102, %c0_103, %c0_104, %c0_105] : memref<2x10x10x8xf32, #tpu.memory_space<vmem>>, vector<2x8x8x8xf32>
    %111 = vector.shape_cast %110 : vector<2x8x8x8xf32> to vector<128x8xf32>
    %112 = arith.truncf %111 : vector<128x8xf32> to vector<128x8xbf16>
    %c0_106 = arith.constant 0 : index
    %c0_107 = arith.constant 0 : index
    %c0_108 = arith.constant 0 : index
    %113 = vector.load %arg5[%c0_106, %c0_107, %c0_108] : memref<9x8x8xbf16, #tpu.memory_space<vmem>>, vector<1x8x8xbf16>
    %114 = vector.shape_cast %113 : vector<1x8x8xbf16> to vector<8x8xbf16>
    %cst_109 = arith.constant dense<0.000000e+00> : vector<128x8xf32>
    %115 = tpu.matmul %112, %114, %cst_109 {dimension_numbers = #tpu.dot_dimension_numbers<[1], [0], [0], [1], [0, 0, 1, 1], [], []>} : vector<128x8xbf16>, vector<8x8xbf16>, vector<128x8xf32> -> vector<128x8xf32>
    %116 = arith.addf %109, %115 : vector<128x8xf32>
    %c0_110 = arith.constant 0 : index
    %c0_111 = arith.constant 0 : index
    %c1_112 = arith.constant 1 : index
    %c0_113 = arith.constant 0 : index
    %117 = vector.load %arg11[%c0_110, %c0_111, %c1_112, %c0_113] : memref<2x10x10x8xf32, #tpu.memory_space<vmem>>, vector<2x8x8x8xf32>
    %118 = vector.shape_cast %117 : vector<2x8x8x8xf32> to vector<128x8xf32>
    %119 = arith.truncf %118 : vector<128x8xf32> to vector<128x8xbf16>
    %c1_114 = arith.constant 1 : index
    %c0_115 = arith.constant 0 : index
    %c0_116 = arith.constant 0 : index
    %120 = vector.load %arg5[%c1_114, %c0_115, %c0_116] : memref<9x8x8xbf16, #tpu.memory_space<vmem>>, vector<1x8x8xbf16>
    %121 = vector.shape_cast %120 : vector<1x8x8xbf16> to vector<8x8xbf16>
    %cst_117 = arith.constant dense<0.000000e+00> : vector<128x8xf32>
    %122 = tpu.matmul %119, %121, %cst_117 {dimension_numbers = #tpu.dot_dimension_numbers<[1], [0], [0], [1], [0, 0, 1, 1], [], []>} : vector<128x8xbf16>, vector<8x8xbf16>, vector<128x8xf32> -> vector<128x8xf32>
    %123 = arith.addf %116, %122 : vector<128x8xf32>
    %c0_118 = arith.constant 0 : index
    %c0_119 = arith.constant 0 : index
    %c2_120 = arith.constant 2 : index
    %c0_121 = arith.constant 0 : index
    %124 = vector.load %arg11[%c0_118, %c0_119, %c2_120, %c0_121] : memref<2x10x10x8xf32, #tpu.memory_space<vmem>>, vector<2x8x8x8xf32>
    %125 = vector.shape_cast %124 : vector<2x8x8x8xf32> to vector<128x8xf32>
    %126 = arith.truncf %125 : vector<128x8xf32> to vector<128x8xbf16>
    %c2_122 = arith.constant 2 : index
    %c0_123 = arith.constant 0 : index
    %c0_124 = arith.constant 0 : index
    %127 = vector.load %arg5[%c2_122, %c0_123, %c0_124] : memref<9x8x8xbf16, #tpu.memory_space<vmem>>, vector<1x8x8xbf16>
    %128 = vector.shape_cast %127 : vector<1x8x8xbf16> to vector<8x8xbf16>
    %cst_125 = arith.constant dense<0.000000e+00> : vector<128x8xf32>
    %129 = tpu.matmul %126, %128, %cst_125 {dimension_numbers = #tpu.dot_dimension_numbers<[1], [0], [0], [1], [0, 0, 1, 1], [], []>} : vector<128x8xbf16>, vector<8x8xbf16>, vector<128x8xf32> -> vector<128x8xf32>
    %130 = arith.addf %123, %129 : vector<128x8xf32>
    %c0_126 = arith.constant 0 : index
    %c1_127 = arith.constant 1 : index
    %c0_128 = arith.constant 0 : index
    %c0_129 = arith.constant 0 : index
    %131 = vector.load %arg11[%c0_126, %c1_127, %c0_128, %c0_129] : memref<2x10x10x8xf32, #tpu.memory_space<vmem>>, vector<2x8x8x8xf32>
    %132 = vector.shape_cast %131 : vector<2x8x8x8xf32> to vector<128x8xf32>
    %133 = arith.truncf %132 : vector<128x8xf32> to vector<128x8xbf16>
    %c3_130 = arith.constant 3 : index
    %c0_131 = arith.constant 0 : index
    %c0_132 = arith.constant 0 : index
    %134 = vector.load %arg5[%c3_130, %c0_131, %c0_132] : memref<9x8x8xbf16, #tpu.memory_space<vmem>>, vector<1x8x8xbf16>
    %135 = vector.shape_cast %134 : vector<1x8x8xbf16> to vector<8x8xbf16>
    %cst_133 = arith.constant dense<0.000000e+00> : vector<128x8xf32>
    %136 = tpu.matmul %133, %135, %cst_133 {dimension_numbers = #tpu.dot_dimension_numbers<[1], [0], [0], [1], [0, 0, 1, 1], [], []>} : vector<128x8xbf16>, vector<8x8xbf16>, vector<128x8xf32> -> vector<128x8xf32>
    %137 = arith.addf %130, %136 : vector<128x8xf32>
    %c0_134 = arith.constant 0 : index
    %c1_135 = arith.constant 1 : index
    %c1_136 = arith.constant 1 : index
    %c0_137 = arith.constant 0 : index
    %138 = vector.load %arg11[%c0_134, %c1_135, %c1_136, %c0_137] : memref<2x10x10x8xf32, #tpu.memory_space<vmem>>, vector<2x8x8x8xf32>
    %139 = vector.shape_cast %138 : vector<2x8x8x8xf32> to vector<128x8xf32>
    %140 = arith.truncf %139 : vector<128x8xf32> to vector<128x8xbf16>
    %c4_138 = arith.constant 4 : index
    %c0_139 = arith.constant 0 : index
    %c0_140 = arith.constant 0 : index
    %141 = vector.load %arg5[%c4_138, %c0_139, %c0_140] : memref<9x8x8xbf16, #tpu.memory_space<vmem>>, vector<1x8x8xbf16>
    %142 = vector.shape_cast %141 : vector<1x8x8xbf16> to vector<8x8xbf16>
    %cst_141 = arith.constant dense<0.000000e+00> : vector<128x8xf32>
    %143 = tpu.matmul %140, %142, %cst_141 {dimension_numbers = #tpu.dot_dimension_numbers<[1], [0], [0], [1], [0, 0, 1, 1], [], []>} : vector<128x8xbf16>, vector<8x8xbf16>, vector<128x8xf32> -> vector<128x8xf32>
    %144 = arith.addf %137, %143 : vector<128x8xf32>
    %c0_142 = arith.constant 0 : index
    %c1_143 = arith.constant 1 : index
    %c2_144 = arith.constant 2 : index
    %c0_145 = arith.constant 0 : index
    %145 = vector.load %arg11[%c0_142, %c1_143, %c2_144, %c0_145] : memref<2x10x10x8xf32, #tpu.memory_space<vmem>>, vector<2x8x8x8xf32>
    %146 = vector.shape_cast %145 : vector<2x8x8x8xf32> to vector<128x8xf32>
    %147 = arith.truncf %146 : vector<128x8xf32> to vector<128x8xbf16>
    %c5_146 = arith.constant 5 : index
    %c0_147 = arith.constant 0 : index
    %c0_148 = arith.constant 0 : index
    %148 = vector.load %arg5[%c5_146, %c0_147, %c0_148] : memref<9x8x8xbf16, #tpu.memory_space<vmem>>, vector<1x8x8xbf16>
    %149 = vector.shape_cast %148 : vector<1x8x8xbf16> to vector<8x8xbf16>
    %cst_149 = arith.constant dense<0.000000e+00> : vector<128x8xf32>
    %150 = tpu.matmul %147, %149, %cst_149 {dimension_numbers = #tpu.dot_dimension_numbers<[1], [0], [0], [1], [0, 0, 1, 1], [], []>} : vector<128x8xbf16>, vector<8x8xbf16>, vector<128x8xf32> -> vector<128x8xf32>
    %151 = arith.addf %144, %150 : vector<128x8xf32>
    %c0_150 = arith.constant 0 : index
    %c2_151 = arith.constant 2 : index
    %c0_152 = arith.constant 0 : index
    %c0_153 = arith.constant 0 : index
    %152 = vector.load %arg11[%c0_150, %c2_151, %c0_152, %c0_153] : memref<2x10x10x8xf32, #tpu.memory_space<vmem>>, vector<2x8x8x8xf32>
    %153 = vector.shape_cast %152 : vector<2x8x8x8xf32> to vector<128x8xf32>
    %154 = arith.truncf %153 : vector<128x8xf32> to vector<128x8xbf16>
    %c6_154 = arith.constant 6 : index
    %c0_155 = arith.constant 0 : index
    %c0_156 = arith.constant 0 : index
    %155 = vector.load %arg5[%c6_154, %c0_155, %c0_156] : memref<9x8x8xbf16, #tpu.memory_space<vmem>>, vector<1x8x8xbf16>
    %156 = vector.shape_cast %155 : vector<1x8x8xbf16> to vector<8x8xbf16>
    %cst_157 = arith.constant dense<0.000000e+00> : vector<128x8xf32>
    %157 = tpu.matmul %154, %156, %cst_157 {dimension_numbers = #tpu.dot_dimension_numbers<[1], [0], [0], [1], [0, 0, 1, 1], [], []>} : vector<128x8xbf16>, vector<8x8xbf16>, vector<128x8xf32> -> vector<128x8xf32>
    %158 = arith.addf %151, %157 : vector<128x8xf32>
    %c0_158 = arith.constant 0 : index
    %c2_159 = arith.constant 2 : index
    %c1_160 = arith.constant 1 : index
    %c0_161 = arith.constant 0 : index
    %159 = vector.load %arg11[%c0_158, %c2_159, %c1_160, %c0_161] : memref<2x10x10x8xf32, #tpu.memory_space<vmem>>, vector<2x8x8x8xf32>
    %160 = vector.shape_cast %159 : vector<2x8x8x8xf32> to vector<128x8xf32>
    %161 = arith.truncf %160 : vector<128x8xf32> to vector<128x8xbf16>
    %c7_162 = arith.constant 7 : index
    %c0_163 = arith.constant 0 : index
    %c0_164 = arith.constant 0 : index
    %162 = vector.load %arg5[%c7_162, %c0_163, %c0_164] : memref<9x8x8xbf16, #tpu.memory_space<vmem>>, vector<1x8x8xbf16>
    %163 = vector.shape_cast %162 : vector<1x8x8xbf16> to vector<8x8xbf16>
    %cst_165 = arith.constant dense<0.000000e+00> : vector<128x8xf32>
    %164 = tpu.matmul %161, %163, %cst_165 {dimension_numbers = #tpu.dot_dimension_numbers<[1], [0], [0], [1], [0, 0, 1, 1], [], []>} : vector<128x8xbf16>, vector<8x8xbf16>, vector<128x8xf32> -> vector<128x8xf32>
    %165 = arith.addf %158, %164 : vector<128x8xf32>
    %c0_166 = arith.constant 0 : index
    %c2_167 = arith.constant 2 : index
    %c2_168 = arith.constant 2 : index
    %c0_169 = arith.constant 0 : index
    %166 = vector.load %arg11[%c0_166, %c2_167, %c2_168, %c0_169] : memref<2x10x10x8xf32, #tpu.memory_space<vmem>>, vector<2x8x8x8xf32>
    %167 = vector.shape_cast %166 : vector<2x8x8x8xf32> to vector<128x8xf32>
    %168 = arith.truncf %167 : vector<128x8xf32> to vector<128x8xbf16>
    %c8_170 = arith.constant 8 : index
    %c0_171 = arith.constant 0 : index
    %c0_172 = arith.constant 0 : index
    %169 = vector.load %arg5[%c8_170, %c0_171, %c0_172] : memref<9x8x8xbf16, #tpu.memory_space<vmem>>, vector<1x8x8xbf16>
    %170 = vector.shape_cast %169 : vector<1x8x8xbf16> to vector<8x8xbf16>
    %cst_173 = arith.constant dense<0.000000e+00> : vector<128x8xf32>
    %171 = tpu.matmul %168, %170, %cst_173 {dimension_numbers = #tpu.dot_dimension_numbers<[1], [0], [0], [1], [0, 0, 1, 1], [], []>} : vector<128x8xbf16>, vector<8x8xbf16>, vector<128x8xf32> -> vector<128x8xf32>
    %172 = arith.addf %165, %171 : vector<128x8xf32>
    %c0_174 = arith.constant 0 : index
    %c0_175 = arith.constant 0 : index
    %173 = vector.load %arg6[%c0_174, %c0_175] : memref<1x8xf32, #tpu.memory_space<vmem>>, vector<1x8xf32>
    %174 = vector.broadcast %173 : vector<1x8xf32> to vector<128x8xf32>
    %175 = arith.addf %172, %174 : vector<128x8xf32>
    %cst_176 = arith.constant dense<0.000000e+00> : vector<8xf32>
    %176 = vector.multi_reduction <add>, %175, %cst_176 [0] : vector<128x8xf32> to vector<8xf32>
    %177 = vector.shape_cast %176 : vector<8xf32> to vector<1x8xf32>
    %cst_177 = arith.constant 1.280000e+02 : f32
    %178 = vector.broadcast %cst_177 : f32 to vector<1x8xf32>
    %179 = arith.divf %177, %178 : vector<1x8xf32>
    %180 = vector.broadcast %179 : vector<1x8xf32> to vector<128x8xf32>
    %181 = arith.subf %175, %180 : vector<128x8xf32>
    %182 = arith.mulf %181, %181 : vector<128x8xf32>
    %cst_178 = arith.constant dense<0.000000e+00> : vector<8xf32>
    %183 = vector.multi_reduction <add>, %182, %cst_178 [0] : vector<128x8xf32> to vector<8xf32>
    %184 = vector.shape_cast %183 : vector<8xf32> to vector<1x8xf32>
    %cst_179 = arith.constant 1.280000e+02 : f32
    %185 = vector.broadcast %cst_179 : f32 to vector<1x8xf32>
    %186 = arith.divf %184, %185 : vector<1x8xf32>
    %187 = vector.broadcast %179 : vector<1x8xf32> to vector<128x8xf32>
    %188 = arith.subf %175, %187 : vector<128x8xf32>
    %cst_180 = arith.constant 9.99999974E-6 : f32
    %189 = vector.broadcast %cst_180 : f32 to vector<1x8xf32>
    %190 = arith.addf %186, %189 : vector<1x8xf32>
    %191 = math.rsqrt %190 : vector<1x8xf32>
    %192 = vector.broadcast %191 : vector<1x8xf32> to vector<128x8xf32>
    %193 = arith.mulf %188, %192 : vector<128x8xf32>
    %c0_181 = arith.constant 0 : index
    %c0_182 = arith.constant 0 : index
    %194 = vector.load %arg7[%c0_181, %c0_182] : memref<1x8xf32, #tpu.memory_space<vmem>>, vector<1x8xf32>
    %195 = vector.broadcast %194 : vector<1x8xf32> to vector<128x8xf32>
    %196 = arith.mulf %193, %195 : vector<128x8xf32>
    %c0_183 = arith.constant 0 : index
    %c0_184 = arith.constant 0 : index
    %197 = vector.load %arg8[%c0_183, %c0_184] : memref<1x8xf32, #tpu.memory_space<vmem>>, vector<1x8xf32>
    %198 = vector.broadcast %197 : vector<1x8xf32> to vector<128x8xf32>
    %199 = arith.addf %196, %198 : vector<128x8xf32>
    %cst_185 = arith.constant 0.000000e+00 : f32
    %200 = vector.broadcast %cst_185 : f32 to vector<128x8xf32>
    %201 = arith.maximumf %199, %200 : vector<128x8xf32>
    %202 = vector.shape_cast %201 : vector<128x8xf32> to vector<2x8x8x8xf32>
    %c0_186 = arith.constant 0 : index
    %c0_187 = arith.constant 0 : index
    %c0_188 = arith.constant 0 : index
    %c0_189 = arith.constant 0 : index
    %203 = vector.load %arg9[%c0_186, %c0_187, %c0_188, %c0_189] : memref<2x8x8x8xf32, #tpu.memory_space<vmem>>, vector<2x8x8x8xf32>
    tpu.vector_store %arg9[%c0_186, %c0_187, %c0_188, %c0_189], %202 {strides = array<i32>} : memref<2x8x8x8xf32, #tpu.memory_space<vmem>>, vector<2x8x8x8xf32>,
    return
  }
}

</mosaic_0001>

<bundles_post_ra>
// kernel: tpu_custom_call.1
= control target key start
LH: loop header
LB: loop body
LE: loop exit
PB: predicated region body
PF: predicated region fallthrough
CT: control target
= control target key end

     0   :  { %vm343_vm0 = vcmask 1041408   ;;  %vm209_vm1 = vcmask 31744   ;;  %vm211_vm2 = vcmask 25600   ;;  %v6370_v10 = vmov 0.0   ;;  %s6360_s0 = inlined_call_operand.vmem [shape: f32[2,16,16,4], index: 0, kind: input, shape index: {}]   ;;  %s6361_s1 = inlined_call_operand.vmem [shape: bf16[9,4,8], index: 1, kind: input, shape index: {}]   ;;  %s6362_s2 = inlined_call_operand.vmem [shape: f32[1,8], index: 2, kind: input, shape index: {}]   ;;  %s6363_s3 = inlined_call_operand.vmem [shape: f32[1,8], index: 3, kind: input, shape index: {}]   ;;  %s6364_s4 = inlined_call_operand.vmem [shape: f32[1,8], index: 4, kind: input, shape index: {}]   ;;  %s6365_s5 = inlined_call_operand.vmem [shape: bf16[9,8,8], index: 5, kind: input, shape index: {}]   ;;  %s6366_s6 = inlined_call_operand.vmem [shape: f32[1,8], index: 6, kind: input, shape index: {}]   ;;  %s6367_s7 = inlined_call_operand.vmem [shape: f32[1,8], index: 7, kind: input, shape index: {}]   ;;  %s6368_s8 = inlined_call_operand.vmem [shape: f32[1,8], index: 8, kind: input, shape index: {}]   ;;  %s6369_s9 = inlined_call_operand.hbm [shape: f32[2,8,8,8], index: 9, kind: output, shape index: {}]  }
   0x1   :  { %v3771_v0 = vld [vmem:[%s6361_s1 + $0x2] sm:$0x3]  ;;  %v292_v1 = vld [vmem:[%s6361_s1] sm:$0x3]  ;;  %v3708_v5 = vld [vmem:[%s6360_s0 + $0x10] ss:$2 sm:$0xff] }
   0x2   :  { %4423 = vmatprep.subr.msk.bf16.mxu0 %vm343_vm0, %v3771_v0  ;;  %v345_v2 = vsel %vm343_vm0, %v3771_v0, 0  ;;  %4424 = vmatprep.subr.msk.bf16.mxu1 %vm343_vm0, %v292_v1  ;;  %v469_v3 = vsel %vm343_vm0, %v292_v1, 0  ;;  %v34_v4 = vld [vmem:[%s6360_s0] ss:$2 sm:$0xff]  ;;  %v3739_v6 = vld [vmem:[%s6360_s0 + $0x1] ss:$2 sm:$0xff] }
   0x3   :  { %4100 = vmatpush3.bf16.msra.mxu0 %v345_v2  ;;  %4118 = vmatpush3.bf16.msra.mxu1 %v469_v3  ;;  %v3740_v7 = vld [vmem:[%s6360_s0 + $0x11] ss:$2 sm:$0xff]  ;;  %v161_v8 = vmax.f32 %v34_v4, %v3739_v6  ;;  %210 = vst.msk [vmem:[#allocation2] sm:$0xff] %vm209_vm1, %v6370_v10  ;;  %213 = vst.msk [vmem:[#allocation2 + $0x10] sm:$0xff] %vm209_vm1, %v6370_v10  ;;  %v4630_v11 = vld [vmem:[%s6361_s1 + $0x4] sm:$0x3] }
   0x4   :  { %v162_v9 = vmax.f32 %v3708_v5, %v3740_v7  ;;  %212 = vst.msk [vmem:[#allocation2 + $0x8] sm:$0x3] %vm211_vm2, %v6370_v10  ;;  %214 = vst.msk [vmem:[#allocation2 + $0x18] sm:$0x3] %vm211_vm2, %v6370_v10  ;;  %v3709_v12 = vld [vmem:[%s6360_s0 + $0x20] ss:$2 sm:$0xff]  ;;  %4425 = vmatprep.subr.msk.bf16.mxu0 %vm343_vm0, %v4630_v11 }
   0x5   :  { %215 = vst.msk [vmem:[#allocation2 + $0x20] sm:$0xff] %vm209_vm1, %v6370_v10  ;;  %217 = vst.msk [vmem:[#allocation2 + $0x30] sm:$0xff] %vm209_vm1, %v6370_v10  ;;  %v3710_v13 = vld [vmem:[%s6360_s0 + $0x30] ss:$2 sm:$0xff]  ;;  %v3711_v14 = vld [vmem:[%s6360_s0 + $0x40] ss:$2 sm:$0xff] }
   0x6   :  { %216 = vst.msk [vmem:[#allocation2 + $0x28] sm:$0x3] %vm211_vm2, %v6370_v10  ;;  %218 = vst.msk [vmem:[#allocation2 + $0x38] sm:$0x3] %vm211_vm2, %v6370_v10  ;;  %v3712_v15 = vld [vmem:[%s6360_s0 + $0x50] ss:$2 sm:$0xff]  ;;  %v193_v17 = vmax.f32 %v161_v8, %v162_v9 }
   0x7   :  { %219 = vst.msk [vmem:[#allocation2 + $0x40] sm:$0xff] %vm209_vm1, %v6370_v10  ;;  %221 = vst.msk [vmem:[#allocation2 + $0x50] sm:$0xff] %vm209_vm1, %v6370_v10  ;;  %v3741_v16 = vld [vmem:[%s6360_s0 + $0x21] ss:$2 sm:$0xff]  ;;  %v3742_v18 = vld [vmem:[%s6360_s0 + $0x31] ss:$2 sm:$0xff] }
   0x8   :  { %220 = vst.msk [vmem:[#allocation2 + $0x48] sm:$0x3] %vm211_vm2, %v6370_v10  ;;  %222 = vst.msk [vmem:[#allocation2 + $0x58] sm:$0x3] %vm211_vm2, %v6370_v10  ;;  %v3743_v19 = vld [vmem:[%s6360_s0 + $0x41] ss:$2 sm:$0xff]  ;;  %v163_v21 = vmax.f32 %v3709_v12, %v3741_v16  ;;  %v164_v22 = vmax.f32 %v3710_v13, %v3742_v18 }
   0x9   :  { %223 = vst.msk [vmem:[#allocation2 + $0x60] sm:$0xff] %vm209_vm1, %v6370_v10  ;;  %225 = vst.msk [vmem:[#allocation2 + $0x70] sm:$0xff] %vm209_vm1, %v6370_v10  ;;  %v3744_v20 = vld [vmem:[%s6360_s0 + $0x51] ss:$2 sm:$0xff]  ;;  %v165_v23 = vmax.f32 %v3711_v14, %v3743_v19  ;;  %v3713_v25 = vld [vmem:[%s6360_s0 + $0x60] ss:$2 sm:$0xff] }
   0xa   :  { %224 = vst.msk [vmem:[#allocation2 + $0x68] sm:$0x3] %vm211_vm2, %v6370_v10  ;;  %226 = vst.msk [vmem:[#allocation2 + $0x78] sm:$0x3] %vm211_vm2, %v6370_v10  ;;  %v166_v24 = vmax.f32 %v3712_v15, %v3744_v20  ;;  %v3714_v26 = vld [vmem:[%s6360_s0 + $0x70] ss:$2 sm:$0xff]  ;;  %v194_v30 = vmax.f32 %v163_v21, %v164_v22 }
   0xb   :  { %227 = vst.msk [vmem:[#allocation2 + $0x80] sm:$0xff] %vm209_vm1, %v6370_v10  ;;  %229 = vst.msk [vmem:[#allocation2 + $0x90] sm:$0xff] %vm209_vm1, %v6370_v10  ;;  %v3715_v27 = vld [vmem:[%s6360_s0 + $0x80] ss:$2 sm:$0xff]  ;;  %v3716_v28 = vld [vmem:[%s6360_s0 + $0x90] ss:$2 sm:$0xff] }
   0xc   :  { %228 = vst.msk [vmem:[#allocation2 + $0x88] sm:$0x3] %vm211_vm2, %v6370_v10  ;;  %230 = vst.msk [vmem:[#allocation2 + $0x98] sm:$0x3] %vm211_vm2, %v6370_v10  ;;  %v3745_v29 = vld [vmem:[%s6360_s0 + $0x61] ss:$2 sm:$0xff]  ;;  %v195_v31 = vmax.f32 %v165_v23, %v166_v24 }
   0xd   :  { %231 = vst.msk [vmem:[#allocation2 + $0xa0] sm:$0xff] %vm209_vm1, %v6370_v10  ;;  %233 = vst.msk [vmem:[#allocation2 + $0xb0] sm:$0xff] %vm209_vm1, %v6370_v10  ;;  %v3746_v32 = vld [vmem:[%s6360_s0 + $0x71] ss:$2 sm:$0xff]  ;;  %v3747_v33 = vld [vmem:[%s6360_s0 + $0x81] ss:$2 sm:$0xff]  ;;  %v167_v35 = vmax.f32 %v3713_v25, %v3745_v29 }
   0xe   :  { %232 = vst.msk [vmem:[#allocation2 + $0xa8] sm:$0x3] %vm211_vm2, %v6370_v10  ;;  %234 = vst.msk [vmem:[#allocation2 + $0xb8] sm:$0x3] %vm211_vm2, %v6370_v10  ;;  %v3748_v34 = vld [vmem:[%s6360_s0 + $0x91] ss:$2 sm:$0xff]  ;;  %v168_v36 = vmax.f32 %v3714_v26, %v3746_v32  ;;  %v169_v37 = vmax.f32 %v3715_v27, %v3747_v33 }
   0xf   :  { %235 = vst.msk [vmem:[#allocation2 + $0xc0] sm:$0xff] %vm209_vm1, %v6370_v10  ;;  %237 = vst.msk [vmem:[#allocation2 + $0xd0] sm:$0xff] %vm209_vm1, %v6370_v10  ;;  %v170_v38 = vmax.f32 %v3716_v28, %v3748_v34  ;;  %v3717_v39 = vld [vmem:[%s6360_s0 + $0xa0] ss:$2 sm:$0xff]  ;;  %v3718_v40 = vld [vmem:[%s6360_s0 + $0xb0] ss:$2 sm:$0xff] }
  0x10   :  { %236 = vst.msk [vmem:[#allocation2 + $0xc8] sm:$0x3] %vm211_vm2, %v6370_v10  ;;  %238 = vst.msk [vmem:[#allocation2 + $0xd8] sm:$0x3] %vm211_vm2, %v6370_v10  ;;  %v3719_v41 = vld [vmem:[%s6360_s0 + $0xc0] ss:$2 sm:$0xff]  ;;  %v196_v45 = vmax.f32 %v167_v35, %v168_v36 }
  0x11   :  { %239 = vst.msk [vmem:[#allocation2 + $0xe0] sm:$0xff] %vm209_vm1, %v6370_v10  ;;  %241 = vst.msk [vmem:[#allocation2 + $0xf0] sm:$0xff] %vm209_vm1, %v6370_v10  ;;  %v293_v42 = vld [vmem:[#allocation2 + $0x1] sm:$0xff]  ;;  %v3720_v44 = vld [vmem:[%s6360_s0 + $0xd0] ss:$2 sm:$0xff]  ;;  %v197_v46 = vmax.f32 %v169_v37, %v170_v38  ;;  %v619_v19 = vsel %vm343_vm0, %v4630_v11, 0 }
  0x12   :  { %240 = vst.msk [vmem:[#allocation2 + $0xe8] sm:$0x3] %vm211_vm2, %v6370_v10  ;;  %242 = vst.msk [vmem:[#allocation2 + $0xf8] sm:$0x3] %vm211_vm2, %v6370_v10  ;;  %v268_v43 = vld [vmem:[#allocation2] sm:$0xff] }
  0x13   :  { %243 = vst.msk [vmem:[#allocation2 + $0x100] sm:$0xff] %vm209_vm1, %v6370_v10  ;;  %245 = vst.msk [vmem:[#allocation2 + $0x110] sm:$0xff] %vm209_vm1, %v6370_v10  ;;  %v3749_v47 = vld [vmem:[%s6360_s0 + $0xa1] ss:$2 sm:$0xff]  ;;  %v3750_v48 = vld [vmem:[%s6360_s0 + $0xb1] ss:$2 sm:$0xff] }
  0x14   :  { %244 = vst.msk [vmem:[#allocation2 + $0x108] sm:$0x3] %vm211_vm2, %v6370_v10  ;;  %246 = vst.msk [vmem:[#allocation2 + $0x118] sm:$0x3] %vm211_vm2, %v6370_v10  ;;  %v3751_v49 = vld [vmem:[%s6360_s0 + $0xc1] ss:$2 sm:$0xff]  ;;  %v171_v51 = vmax.f32 %v3717_v39, %v3749_v47  ;;  %v172_v52 = vmax.f32 %v3718_v40, %v3750_v48 }
  0x15   :  { %247 = vst.msk [vmem:[#allocation2 + $0x120] sm:$0xff] %vm209_vm1, %v6370_v10  ;;  %249 = vst.msk [vmem:[#allocation2 + $0x130] sm:$0xff] %vm209_vm1, %v6370_v10  ;;  %v3752_v50 = vld [vmem:[%s6360_s0 + $0xd1] ss:$2 sm:$0xff]  ;;  %v173_v53 = vmax.f32 %v3719_v41, %v3751_v49  ;;  %v3723_v54 = vld [vmem:[%s6360_s0 + $0x100] ss:$2 sm:$0xff] }
  0x16   :  { %248 = vst.msk [vmem:[#allocation2 + $0x128] sm:$0x3] %vm211_vm2, %v6370_v10  ;;  %250 = vst.msk [vmem:[#allocation2 + $0x138] sm:$0x3] %vm211_vm2, %v6370_v10  ;;  %v3724_v55 = vld [vmem:[%s6360_s0 + $0x110] ss:$2 sm:$0xff]  ;;  %v174_v56 = vmax.f32 %v3720_v44, %v3752_v50  ;;  %v198_v61 = vmax.f32 %v171_v51, %v172_v52 }
  0x17   :  { %252 = vst.msk [vmem:[#allocation2 + $0x11] sm:$0xff] %vm209_vm1, %v193_v17  ;;  %253 = vst.msk [vmem:[#allocation2 + $0x21] sm:$0xff] %vm209_vm1, %v194_v30  ;;  %v3755_v57 = vld [vmem:[%s6360_s0 + $0x101] ss:$2 sm:$0xff]  ;;  %v3756_v58 = vld [vmem:[%s6360_s0 + $0x111] ss:$2 sm:$0xff] }
  0x18   :  { %254 = vst.msk [vmem:[#allocation2 + $0x31] sm:$0xff] %vm209_vm1, %v195_v31  ;;  %255 = vst.msk [vmem:[#allocation2 + $0x41] sm:$0xff] %vm209_vm1, %v196_v45  ;;  %v177_v62 = vmax.f32 %v3723_v54, %v3755_v57  ;;  %v178_v63 = vmax.f32 %v3724_v55, %v3756_v58  ;;  %v199_v2 = vmax.f32 %v173_v53, %v174_v56  ;;  %v3725_v3 = vld [vmem:[%s6360_s0 + $0x120] ss:$2 sm:$0xff]  ;;  %v3726_v4 = vld [vmem:[%s6360_s0 + $0x130] ss:$2 sm:$0xff] }
  0x19   :  { %256 = vst.msk [vmem:[#allocation2 + $0x51] sm:$0xff] %vm209_vm1, %v197_v46  ;;  %v3727_v5 = vld [vmem:[%s6360_s0 + $0x140] ss:$2 sm:$0xff]  ;;  %257 = vst.msk [vmem:[#allocation2 + $0x61] sm:$0xff] %vm209_vm1, %v198_v61  ;;  %v3728_v7 = vld [vmem:[%s6360_s0 + $0x150] ss:$2 sm:$0xff] }
  0x1a   :  { %v201_v6 = vmax.f32 %v177_v62, %v178_v63  ;;  %v3757_v8 = vld [vmem:[%s6360_s0 + $0x121] ss:$2 sm:$0xff]  ;;  %v3758_v9 = vld [vmem:[%s6360_s0 + $0x131] ss:$2 sm:$0xff]  ;;  %258 = vst.msk [vmem:[#allocation2 + $0x71] sm:$0xff] %vm209_vm1, %v199_v2 }
  0x1b   :  { %v179_v15 = vmax.f32 %v3725_v3, %v3757_v8  ;;  %v180_v16 = vmax.f32 %v3726_v4, %v3758_v9  ;;  %v3759_v20 = vld [vmem:[%s6360_s0 + $0x141] ss:$2 sm:$0xff]  ;;  %v3760_v21 = vld [vmem:[%s6360_s0 + $0x151] ss:$2 sm:$0xff]  ;;  %v3729_v11 = vld [vmem:[%s6360_s0 + $0x160] ss:$2 sm:$0xff] }
  0x1c   :  { %260 = vst.msk [vmem:[#allocation2 + $0xb1] sm:$0xff] %vm209_vm1, %v201_v6  ;;  %v181_v23 = vmax.f32 %v3727_v5, %v3759_v20  ;;  %v182_v24 = vmax.f32 %v3728_v7, %v3760_v21  ;;  %v3730_v26 = vld [vmem:[%s6360_s0 + $0x170] ss:$2 sm:$0xff]  ;;  %v3731_v27 = vld [vmem:[%s6360_s0 + $0x180] ss:$2 sm:$0xff] }
  0x1d   :  { %v202_v25 = vmax.f32 %v179_v15, %v180_v16  ;;  %v301_v33 = vld [vmem:[#allocation2 + $0xa1] sm:$0xff]  ;;  %v3732_v36 = vld [vmem:[%s6360_s0 + $0x190] ss:$2 sm:$0xff]  ;;  %v3762_v39 = vld [vmem:[%s6360_s0 + $0x171] ss:$2 sm:$0xff] }
  0x1e   :  { %v4723_v59 = vld [vmem:[#allocation2 + $0x11] sm:$0xff]  ;;  %v4750_v12 = vld [vmem:[#allocation2 + $0x21] sm:$0xff]  ;;  %v203_v35 = vmax.f32 %v181_v23, %v182_v24  ;;  %v184_v45 = vmax.f32 %v3730_v26, %v3762_v39 }
  0x1f   :  { %v4725_v60 = vld [vmem:[#allocation2 + $0x10] sm:$0xff]  ;;  %v309_v0 = vpack.c.bf16 %v4723_v59, %v293_v42  ;;  %v4754_v14 = vld [vmem:[#allocation2 + $0x20] sm:$0xff]  ;;  %261 = vst.msk [vmem:[#allocation2 + $0xc1] sm:$0xff] %vm209_vm1, %v202_v25 }
  0x20   :  { %v284_v1 = vpack.c.bf16 %v4725_v60, %v268_v43  ;;  %v4752_v13 = vld [vmem:[#allocation2 + $0x31] sm:$0xff]  ;;  %v4787_v28 = vld [vmem:[#allocation2 + $0x41] sm:$0xff]  ;;  %262 = vst.msk [vmem:[#allocation2 + $0xd1] sm:$0xff] %vm209_vm1, %v203_v35 }
  0x21   :  { %4101 = vmatprep.mubr.msk.bf16.mxu0 %vm209_vm1, %v309_v0  ;;  %v4759_v17 = vpack.c.bf16 %v4752_v13, %v4750_v12  ;;  %v4761_v18 = vld [vmem:[#allocation2 + $0x30] sm:$0xff]  ;;  %v4791_v30 = vld [vmem:[#allocation2 + $0x40] sm:$0xff] }
  0x22   :  { %4119 = vmatprep.mubr.msk.bf16.mxu1 %vm209_vm1, %v284_v1  ;;  %v4774_v22 = vpack.c.bf16 %v4761_v18, %v4754_v14  ;;  %v4789_v29 = vld [vmem:[#allocation2 + $0x51] sm:$0xff]  ;;  %v276_v34 = vld [vmem:[#allocation2 + $0xa0] sm:$0xff] }
  0x23   :  { %4102 = vmatmul.mubr.msk.bf16.vlgmr.msra.gmra.mxu0 %vm209_vm1, %v4759_v17  ;;  %v4797_v31 = vpack.c.bf16 %v4789_v29, %v4787_v28  ;;  %v4799_v32 = vld [vmem:[#allocation2 + $0x50] sm:$0xff]  ;;  %v3761_v37 = vld [vmem:[%s6360_s0 + $0x161] ss:$2 sm:$0xff]  ;;  %v3733_v48 = vld [vmem:[%s6360_s0 + $0x1a0] ss:$2 sm:$0xff] }
  0x24   :  { %4120 = vmatmul.mubr.msk.bf16.vlgmr.msra.gmra.mxu1 %vm209_vm1, %v4774_v22  ;;  %4136 = vmatpush3.bf16.msra.mxu0 %v619_v19  ;;  %v4810_v38 = vpack.c.bf16 %v4799_v32, %v4791_v30  ;;  %v3763_v40 = vld [vmem:[%s6360_s0 + $0x181] ss:$2 sm:$0xff]  ;;  %v3764_v41 = vld [vmem:[%s6360_s0 + $0x191] ss:$2 sm:$0xff]  ;;  %v183_v42 = vmax.f32 %v3729_v11, %v3761_v37  ;;  %v3734_v51 = vld [vmem:[%s6360_s0 + $0x1b0] ss:$2 sm:$0xff] }
  0x25   :  { %4105 = vmatprep.mubr.msk.bf16.mxu0 %vm209_vm1, %v4797_v31  ;;  %v4823_v43 = vld [vmem:[#allocation2 + $0x61] sm:$0xff]  ;;  %v185_v46 = vmax.f32 %v3731_v27, %v3763_v40  ;;  %v186_v47 = vmax.f32 %v3732_v36, %v3764_v41  ;;  %v4833_v49 = vld [vmem:[#allocation2 + $0x71] sm:$0xff] }
  0x26   :  { %v4825_v44 = vld [vmem:[#allocation2 + $0x60] sm:$0xff]  ;;  %4123 = vmatprep.mubr.msk.bf16.mxu1 %vm209_vm1, %v4810_v38  ;;  %v4835_v50 = vld [vmem:[#allocation2 + $0x70] sm:$0xff]  ;;  %v4842_v52 = vpack.c.bf16 %v4833_v49, %v4823_v43  ;;  %v204_v56 = vmax.f32 %v183_v42, %v184_v45  ;;  %v3806_v19 = vld [vmem:[%s6361_s1 + $0x8] sm:$0x3] }
  0x27   :  { %v4846_v53 = vpack.c.bf16 %v4835_v50, %v4825_v44  ;;  %v4848_v54 = vld [vmem:[#allocation2 + $0xb1] sm:$0xff]  ;;  %v205_v57 = vmax.f32 %v185_v46, %v186_v47  ;;  %v3735_v58 = vld [vmem:[%s6360_s0 + $0x1c0] ss:$2 sm:$0xff]  ;;  %v3765_v0 = vld [vmem:[%s6360_s0 + $0x1a1] ss:$2 sm:$0xff]  ;;  %4427 = vmatprep.subr.msk.bf16.mxu0 %vm343_vm0, %v3806_v19 }
  0x28   :  { %v4850_v55 = vld [vmem:[#allocation2 + $0xb0] sm:$0xff]  ;;  %v313_v61 = vpack.c.bf16 %v4848_v54, %v301_v33  ;;  %263 = vst.msk [vmem:[#allocation2 + $0xe1] sm:$0xff] %vm209_vm1, %v204_v56  ;;  %v3767_v2 = vld [vmem:[%s6360_s0 + $0x1c1] ss:$2 sm:$0xff]  ;;  %v187_v4 = vmax.f32 %v3733_v48, %v3765_v0  ;;  %v3721_v11 = vld [vmem:[%s6360_s0 + $0xe0] ss:$2 sm:$0xff] }
  0x29   :  { %v288_v62 = vpack.c.bf16 %v4850_v55, %v276_v34  ;;  %v3736_v63 = vld [vmem:[%s6360_s0 + $0x1d0] ss:$2 sm:$0xff]  ;;  %v3766_v1 = vld [vmem:[%s6360_s0 + $0x1b1] ss:$2 sm:$0xff]  ;;  %264 = vst.msk [vmem:[#allocation2 + $0xf1] sm:$0xff] %vm209_vm1, %v205_v57  ;;  %v189_v7 = vmax.f32 %v3735_v58, %v3767_v2  ;;  %v4884_v15 = vld [vmem:[#allocation2 + $0xc1] sm:$0xff] }
  0x2a   :  { %v3768_v3 = vld [vmem:[%s6360_s0 + $0x1d1] ss:$2 sm:$0xff]  ;;  %v188_v5 = vmax.f32 %v3734_v51, %v3766_v1  ;;  %v3797_v6 = vld [vmem:[%s6361_s1 + $0x6] sm:$0x3]  ;;  %v3722_v26 = vld [vmem:[%s6360_s0 + $0xf0] ss:$2 sm:$0xff] }
  0x2b   :  { %4106 = vmatmul.mubr.msk.bf16.gmra.mxu0 %vm209_vm1, %v4842_v52  ;;  %v190_v8 = vmax.f32 %v3736_v63, %v3768_v3  ;;  %4426 = vmatprep.subr.msk.bf16.mxu1 %vm343_vm0, %v3797_v6  ;;  %v785_v9 = vsel %vm343_vm0, %v3797_v6, 0  ;;  %v4890_v20 = vld [vmem:[#allocation2 + $0xd1] sm:$0xff]  ;;  %v4892_v21 = vld [vmem:[#allocation2 + $0xc0] sm:$0xff]  ;;  %v3815_v3 = vld [vmem:[%s6361_s1 + $0xa] sm:$0x3] }
  0x2c   :  { %4124 = vmatmul.mubr.msk.bf16.gmra.mxu1 %vm209_vm1, %v4846_v53  ;;  %4109 = vmatprep.mubr.msk.bf16.mxu0 %vm209_vm1, %v313_v61  ;;  %v206_v16 = vmax.f32 %v187_v4, %v188_v5  ;;  %v4894_v23 = vld [vmem:[#allocation2 + $0xd0] sm:$0xff]  ;;  %v4900_v25 = vpack.c.bf16 %v4890_v20, %v4884_v15  ;;  %v3753_v33 = vld [vmem:[%s6360_s0 + $0xe1] ss:$2 sm:$0xff]  ;;  %v3737_v51 = vld [vmem:[%s6360_s0 + $0x1e0] ss:$2 sm:$0xff] }
  0x2d   :  { %4127 = vmatprep.mubr.msk.bf16.mxu1 %vm209_vm1, %v288_v62  ;;  %v207_v24 = vmax.f32 %v189_v7, %v190_v8  ;;  %4154 = vmatpush3.bf16.msra.mxu1 %v785_v9  ;;  %v4911_v27 = vpack.c.bf16 %v4894_v23, %v4892_v21  ;;  %v3754_v34 = vld [vmem:[%s6360_s0 + $0xf1] ss:$2 sm:$0xff]  ;;  %v175_v39 = vmax.f32 %v3721_v11, %v3753_v33  ;;  %v568_v46 = vld [vmem:[#allocation2 + $0x2] sm:$0xff]  ;;  %v3738_v61 = vld [vmem:[%s6360_s0 + $0x1f0] ss:$2 sm:$0xff] }
  0x2e   :  { %265 = vst.msk [vmem:[#allocation2 + $0x101] sm:$0xff] %vm209_vm1, %v206_v16  ;;  %v176_v40 = vmax.f32 %v3722_v26, %v3754_v34  ;;  %v4941_v48 = vld [vmem:[#allocation2 + $0x12] sm:$0xff]  ;;  %v3769_v56 = vld [vmem:[%s6360_s0 + $0x1e1] ss:$2 sm:$0xff]  ;;  %4428 = vmatprep.subr.msk.bf16.mxu1 %vm343_vm0, %v3815_v3  ;;  %v750_v7 = vpack.c.bf16 %v4754_v14, %v4725_v60 }
  0x2f   :  { %266 = vst.msk [vmem:[#allocation2 + $0x111] sm:$0xff] %vm209_vm1, %v207_v24  ;;  %v4919_v35 = vld [vmem:[#allocation2 + $0xe1] sm:$0xff]  ;;  %v191_v0 = vmax.f32 %v3737_v51, %v3769_v56  ;;  %v3770_v2 = vld [vmem:[%s6360_s0 + $0x1f1] ss:$2 sm:$0xff]  ;;  %v584_v5 = vpack.c.bf16 %v4941_v48, %v568_v46 }
  0x30   :  { %v4921_v36 = vld [vmem:[#allocation2 + $0xf1] sm:$0xff]  ;;  %v4923_v37 = vld [vmem:[#allocation2 + $0xe0] sm:$0xff]  ;;  %v200_v47 = vmax.f32 %v175_v39, %v176_v40  ;;  %v192_v6 = vmax.f32 %v3738_v61, %v3770_v2 }
  0x31   :  { %v4927_v41 = vpack.c.bf16 %v4921_v36, %v4919_v35  ;;  %v4929_v42 = vld [vmem:[#allocation2 + $0xf0] sm:$0xff] }
  0x32   :  { %v4935_v45 = vpack.c.bf16 %v4929_v42, %v4923_v37  ;;  %259 = vst.msk [vmem:[#allocation2 + $0x81] sm:$0xff] %vm209_vm1, %v200_v47  ;;  %v208_v8 = vmax.f32 %v191_v0, %v192_v6 }
  0x33   :  { %4110 = vmatmul.mubr.msk.bf16.gmra.mxu0 %vm209_vm1, %v4900_v25 }
  0x34   :  { %4128 = vmatmul.mubr.msk.bf16.gmra.mxu1 %vm209_vm1, %v4911_v27  ;;  %4113 = vmatprep.mubr.msk.bf16.mxu0 %vm209_vm1, %v4927_v41 }
  0x35   :  { %4131 = vmatprep.mubr.msk.bf16.mxu1 %vm209_vm1, %v4935_v45  ;;  %v4951_v57 = vld [vmem:[#allocation2 + $0x101] sm:$0xff] }
  0x36   :  { %v4953_v58 = vld [vmem:[#allocation2 + $0x100] sm:$0xff]  ;;  %v4959_v62 = vld [vmem:[#allocation2 + $0x111] sm:$0xff] }
  0x37   :  { %v4961_v63 = vld [vmem:[#allocation2 + $0x110] sm:$0xff]  ;;  %v4965_v1 = vpack.c.bf16 %v4959_v62, %v4951_v57 }
  0x38   :  { %v4975_v4 = vpack.c.bf16 %v4961_v63, %v4953_v58 }
  0x3b   :  { %4114 = vmatmul.mubr.msk.bf16.gmra.mxu0 %vm209_vm1, %v4965_v1 }
  0x3c   :  { %14 = vsyncpa [#allocation5], 0  ;;  %4132 = vmatmul.mubr.msk.bf16.gmra.mxu1 %vm209_vm1, %v4975_v4  ;;  %4137 = vmatprep.mubr.msk.bf16.mxu0 %vm209_vm1, %v584_v5  ;;  %v570_v9 = vld [vmem:[#allocation2 + $0x22] sm:$0xff]  ;;  %v4986_v16 = vld [vmem:[#allocation2 + $0x32] sm:$0xff]  ;;  %267 = vst.msk [vmem:[#allocation2 + $0x121] sm:$0xff] %vm209_vm1, %v208_v8  ;;  %v751_v11 = vpack.c.bf16 %v4791_v30, %v4761_v18  ;;  %v951_v26 = vsel %vm343_vm0, %v3806_v19, 0  ;;  %v752_v34 = vpack.c.bf16 %v4825_v44, %v4799_v32 }
  0x3d   :  { %4155 = vmatprep.mubr.msk.bf16.mxu1 %vm209_vm1, %v750_v7  ;;  %v4990_v24 = vld [vmem:[#allocation2 + $0x42] sm:$0xff]  ;;  %v4992_v60 = vld [vmem:[#allocation2 + $0x52] sm:$0xff]  ;;  %v4995_v14 = vpack.c.bf16 %v4986_v16, %v570_v9  ;;  %v1117_v39 = vsel %vm343_vm0, %v3815_v3, 0  ;;  %v3824_v40 = vld [vmem:[%s6361_s1 + $0xc] sm:$0x3]  ;;  %v754_v61 = vpack.c.bf16 %v4892_v21, %v4850_v55  ;;  %v756_v55 = vpack.c.bf16 %v4953_v58, %v4929_v42 }
  0x3e   :  { %v5002_v33 = vpack.c.bf16 %v4992_v60, %v4990_v24  ;;  %v574_v18 = vld [vmem:[#allocation2 + $0x62] sm:$0xff]  ;;  %v5013_v30 = vld [vmem:[#allocation2 + $0x72] sm:$0xff]  ;;  %v3833_v19 = vld [vmem:[%s6361_s1 + $0xe] sm:$0x3]  ;;  %v916_v42 = vpack.c.bf16 %v4750_v12, %v4723_v59  ;;  %v1082_v58 = vpack.c.bf16 %v570_v9, %v4941_v48  ;;  %v918_v59 = vpack.c.bf16 %v4823_v43, %v4789_v29 }
  0x3f   :  { %v5021_v32 = vld [vmem:[#allocation2 + $0x80] sm:$0xff]  ;;  %v577_v46 = vld [vmem:[#allocation2 + $0xb2] sm:$0xff]  ;;  %v5025_v47 = vpack.c.bf16 %v5013_v30, %v574_v18  ;;  %v1084_v12 = vpack.c.bf16 %v574_v18, %v4992_v60  ;;  %v1450_v48 = vsel %vm343_vm0, %v3833_v19, 0  ;;  %v3842_v9 = vld [vmem:[%s6361_s1 + $0x10] sm:$0x3]  ;;  %v921_v60 = vpack.c.bf16 %v4919_v35, %v4890_v20 }
  0x40   :  { %v576_v44 = vld [vmem:[#allocation2 + $0xa2] sm:$0xff]  ;;  %v753_v51 = vpack.c.bf16 %v5021_v32, %v4835_v50  ;;  %v579_v2 = vld [vmem:[#allocation2 + $0xd2] sm:$0xff]  ;;  %v755_v50 = vpack.c.bf16 %v4923_v37, %v4894_v23  ;;  %v1616_v20 = vsel %vm343_vm0, %v3842_v9, 0  ;;  %vm1754_vm3 = vcmask 64512  }
  0x41   :  { %v588_v56 = vpack.c.bf16 %v577_v46, %v576_v44  ;;  %v578_v0 = vld [vmem:[#allocation2 + $0xc2] sm:$0xff]  ;;  %v581_v5 = vld [vmem:[#allocation2 + $0xf2] sm:$0xff]  ;;  %1944 = vst.msk [vmem:[#allocation3] sm:$0xff] %vm1754_vm3, %v6370_v10  ;;  %1947 = vst.msk [vmem:[#allocation3 + $0x10] sm:$0xff] %vm1754_vm3, %v6370_v10  ;;  %vm1945_vm4 = vcmask 58368   ;;  %vm2077_vm5 = vcmask 1043456  }
  0x42   :  { %v580_v3 = vld [vmem:[#allocation2 + $0xe2] sm:$0xff]  ;;  %v5037_v6 = vpack.c.bf16 %v579_v2, %v578_v0  ;;  %v583_v8 = vld [vmem:[#allocation2 + $0x112] sm:$0xff]  ;;  %1949 = vst.msk [vmem:[#allocation3 + $0x20] sm:$0xff] %vm1754_vm3, %v6370_v10  ;;  %1951 = vst.msk [vmem:[#allocation3 + $0x30] sm:$0xff] %vm1754_vm3, %v6370_v10 }
  0x43   :  { %4138 = vmatmul.mubr.msk.bf16.vlgmr.msra.gmra.mxu0 %vm209_vm1, %v4995_v14  ;;  %v5041_v7 = vpack.c.bf16 %v581_v5, %v580_v3  ;;  %v582_v21 = vld [vmem:[#allocation2 + $0x102] sm:$0xff]  ;;  %v1240_v35 = vld [vmem:[#allocation2 + $0x90] sm:$0xff]  ;;  %1953 = vst.msk [vmem:[#allocation3 + $0x40] sm:$0xff] %vm1754_vm3, %v6370_v10  ;;  %1955 = vst.msk [vmem:[#allocation3 + $0x50] sm:$0xff] %vm1754_vm3, %v6370_v10 }
  0x44   :  { %4172 = vmatpush3.bf16.msra.mxu0 %v951_v26  ;;  %4156 = vmatmul.mubr.msk.bf16.vlgmr.msra.gmra.mxu1 %vm209_vm1, %v751_v11  ;;  %v5051_v11 = vld [vmem:[#allocation2 + $0x120] sm:$0xff]  ;;  %v5053_v23 = vpack.c.bf16 %v583_v8, %v582_v21  ;;  %v917_v26 = vpack.c.bf16 %v4787_v28, %v4752_v13  ;;  %1957 = vst.msk [vmem:[#allocation3 + $0x60] sm:$0xff] %vm1754_vm3, %v6370_v10  ;;  %1959 = vst.msk [vmem:[#allocation3 + $0x70] sm:$0xff] %vm1754_vm3, %v6370_v10 }
  0x45   :  { %4141 = vmatprep.mubr.msk.bf16.mxu0 %vm209_vm1, %v5002_v33  ;;  %4159 = vmatprep.mubr.msk.bf16.mxu1 %vm209_vm1, %v752_v34  ;;  %v757_v37 = vpack.c.bf16 %v5051_v11, %v4961_v63  ;;  %v1083_v63 = vpack.c.bf16 %v4990_v24, %v4986_v16  ;;  %v1284_v34 = vsel %vm343_vm0, %v3824_v40, 0  ;;  %v907_v13 = vld [vmem:[#allocation2 + $0x81] sm:$0xff]  ;;  %v920_v16 = vpack.c.bf16 %v4884_v15, %v4848_v54 }
  0x46   :  { %4190 = vmatpush3.bf16.msra.mxu1 %v1117_v39  ;;  %4429 = vmatprep.subr.msk.bf16.mxu0 %vm343_vm0, %v3824_v40  ;;  %v1073_v28 = vld [vmem:[#allocation2 + $0x82] sm:$0xff]  ;;  %v919_v29 = vpack.c.bf16 %v907_v13, %v4833_v49  ;;  %v1086_v24 = vpack.c.bf16 %v578_v0, %v577_v46  ;;  %v1087_v39 = vpack.c.bf16 %v580_v3, %v579_v2 }
  0x47   :  { %4430 = vmatprep.subr.msk.bf16.mxu1 %vm343_vm0, %v3833_v19  ;;  %v1085_v43 = vpack.c.bf16 %v1073_v28, %v5013_v30  ;;  %v922_v49 = vpack.c.bf16 %v4951_v57, %v4921_v36  ;;  %v1088_v40 = vpack.c.bf16 %v582_v21, %v581_v5  ;;  %v915_v54 = vld [vmem:[#allocation2 + $0x121] sm:$0xff]  ;;  %v1252_v36 = vpack.c.bf16 %v1240_v35, %v5021_v32 }
  0x48   :  { %v1081_v15 = vld [vmem:[#allocation2 + $0x122] sm:$0xff]  ;;  %v923_v18 = vpack.c.bf16 %v915_v54, %v4959_v62  ;;  %1961 = vst.msk [vmem:[#allocation3 + $0x80] sm:$0xff] %vm1754_vm3, %v6370_v10  ;;  %1963 = vst.msk [vmem:[#allocation3 + $0x90] sm:$0xff] %vm1754_vm3, %v6370_v10 }
  0x49   :  { %v1089_v30 = vpack.c.bf16 %v1081_v15, %v583_v8  ;;  %1965 = vst.msk [vmem:[#allocation3 + $0xa0] sm:$0xff] %vm1754_vm3, %v6370_v10  ;;  %1967 = vst.msk [vmem:[#allocation3 + $0xb0] sm:$0xff] %vm1754_vm3, %v6370_v10 }
  0x4a   :  { %1969 = vst.msk [vmem:[#allocation3 + $0xc0] sm:$0xff] %vm1754_vm3, %v6370_v10  ;;  %1971 = vst.msk [vmem:[#allocation3 + $0xd0] sm:$0xff] %vm1754_vm3, %v6370_v10 }
  0x4b   :  { %4142 = vmatmul.mubr.msk.bf16.gmra.mxu0 %vm209_vm1, %v5025_v47  ;;  %1973 = vst.msk [vmem:[#allocation3 + $0xe0] sm:$0xff] %vm1754_vm3, %v6370_v10  ;;  %1975 = vst.msk [vmem:[#allocation3 + $0xf0] sm:$0xff] %vm1754_vm3, %v6370_v10 }
  0x4c   :  { %4160 = vmatmul.mubr.msk.bf16.gmra.mxu1 %vm209_vm1, %v753_v51  ;;  %4145 = vmatprep.mubr.msk.bf16.mxu0 %vm209_vm1, %v588_v56  ;;  %1977 = vst.msk [vmem:[#allocation3 + $0x100] sm:$0xff] %vm1754_vm3, %v6370_v10  ;;  %1979 = vst.msk [vmem:[#allocation3 + $0x110] sm:$0xff] %vm1754_vm3, %v6370_v10 }
  0x4d   :  { %4163 = vmatprep.mubr.msk.bf16.mxu1 %vm209_vm1, %v754_v61  ;;  %1981 = vst.msk [vmem:[#allocation3 + $0x120] sm:$0xff] %vm1754_vm3, %v6370_v10  ;;  %1983 = vst.msk [vmem:[#allocation3 + $0x130] sm:$0xff] %vm1754_vm3, %v6370_v10 }
  0x53   :  { %4146 = vmatmul.mubr.msk.bf16.gmra.mxu0 %vm209_vm1, %v5037_v6 }
  0x54   :  { %4164 = vmatmul.mubr.msk.bf16.gmra.mxu1 %vm209_vm1, %v755_v50  ;;  %4149 = vmatprep.mubr.msk.bf16.mxu0 %vm209_vm1, %v5041_v7 }
  0x55   :  { %4167 = vmatprep.mubr.msk.bf16.mxu1 %vm209_vm1, %v756_v55 }
  0x5b   :  { %4150 = vmatmul.mubr.msk.bf16.gmra.mxu0 %vm209_vm1, %v5053_v23 }
  0x5c   :  { %4168 = vmatmul.mubr.msk.bf16.gmra.mxu1 %vm209_vm1, %v757_v37  ;;  %4173 = vmatprep.mubr.msk.bf16.mxu0 %vm209_vm1, %v916_v42 }
  0x5d   :  { %4191 = vmatprep.mubr.msk.bf16.mxu1 %vm209_vm1, %v1082_v58 }
  0x63   :  { %4174 = vmatmul.mubr.msk.bf16.vlgmr.msra.gmra.mxu0 %vm209_vm1, %v917_v26 }
  0x64   :  { %4208 = vmatpush3.bf16.msra.mxu0 %v1284_v34  ;;  %4192 = vmatmul.mubr.msk.bf16.vlgmr.msra.gmra.mxu1 %vm209_vm1, %v1083_v63 }
  0x65   :  { %4177 = vmatprep.mubr.msk.bf16.mxu0 %vm209_vm1, %v918_v59  ;;  %4195 = vmatprep.mubr.msk.bf16.mxu1 %vm209_vm1, %v1084_v12 }
  0x66   :  { %4226 = vmatpush3.bf16.msra.mxu1 %v1450_v48  ;;  %4431 = vmatprep.subr.msk.bf16.mxu0 %vm343_vm0, %v3842_v9 }
  0x6b   :  { %4178 = vmatmul.mubr.msk.bf16.gmra.mxu0 %vm209_vm1, %v919_v29 }
  0x6c   :  { %4196 = vmatmul.mubr.msk.bf16.gmra.mxu1 %vm209_vm1, %v1085_v43  ;;  %4181 = vmatprep.mubr.msk.bf16.mxu0 %vm209_vm1, %v920_v16 }
  0x6d   :  { %4199 = vmatprep.mubr.msk.bf16.mxu1 %vm209_vm1, %v1086_v24 }
  0x73   :  { %4182 = vmatmul.mubr.msk.bf16.gmra.mxu0 %vm209_vm1, %v921_v60 }
  0x74   :  { %4200 = vmatmul.mubr.msk.bf16.gmra.mxu1 %vm209_vm1, %v1087_v39  ;;  %4185 = vmatprep.mubr.msk.bf16.mxu0 %vm209_vm1, %v922_v49 }
  0x75   :  { %4203 = vmatprep.mubr.msk.bf16.mxu1 %vm209_vm1, %v1088_v40 }
  0x7b   :  { %4186 = vmatmul.mubr.msk.bf16.gmra.mxu0 %vm209_vm1, %v923_v18 }
  0x7c   :  { %4204 = vmatmul.mubr.msk.bf16.gmra.mxu1 %vm209_vm1, %v1089_v30  ;;  %4209 = vmatprep.mubr.msk.bf16.mxu0 %vm209_vm1, %v4774_v22  ;;  %v1406_v22 = vld [vmem:[#allocation2 + $0x91] sm:$0xff] }
  0x7d   :  { %4227 = vmatprep.mubr.msk.bf16.mxu1 %vm209_vm1, %v4759_v17  ;;  %v1418_v17 = vpack.c.bf16 %v1406_v22, %v907_v13 }
  0x83   :  { %4210 = vmatmul.mubr.msk.bf16.vlgmr.msra.gmra.mxu0 %vm209_vm1, %v4810_v38  ;;  %v1414_v38 = vld [vmem:[#allocation2 + $0x131] sm:$0xff] }
  0x84   :  { %4244 = vmatpush3.bf16.msra.mxu0 %v1616_v20  ;;  %4228 = vmatmul.mubr.msk.bf16.vlgmr.msra.gmra.mxu1 %vm209_vm1, %v4797_v31  ;;  %v1248_v31 = vld [vmem:[#allocation2 + $0x130] sm:$0xff] }
  0x85   :  { %4213 = vmatprep.mubr.msk.bf16.mxu0 %vm209_vm1, %v4846_v53  ;;  %4231 = vmatprep.mubr.msk.bf16.mxu1 %vm209_vm1, %v4842_v52  ;;  %v1256_v52 = vpack.c.bf16 %v1248_v31, %v5051_v11  ;;  %v1422_v53 = vpack.c.bf16 %v1414_v38, %v915_v54 }
  0x8b   :  { %4214 = vmatmul.mubr.msk.bf16.gmra.mxu0 %vm209_vm1, %v1252_v36 }
  0x8c   :  { %4232 = vmatmul.mubr.msk.bf16.gmra.mxu1 %vm209_vm1, %v1418_v17  ;;  %4217 = vmatprep.mubr.msk.bf16.mxu0 %vm209_vm1, %v4911_v27 }
  0x8d   :  { %4235 = vmatprep.mubr.msk.bf16.mxu1 %vm209_vm1, %v4900_v25  ;;  %v1572_v25 = vld [vmem:[#allocation2 + $0x92] sm:$0xff] }
  0x8e   :  { %v1584_v27 = vpack.c.bf16 %v1572_v25, %v1073_v28 }
  0x93   :  { %4218 = vmatmul.mubr.msk.bf16.gmra.mxu0 %vm209_vm1, %v4935_v45 }
  0x94   :  { %4236 = vmatmul.mubr.msk.bf16.gmra.mxu1 %vm209_vm1, %v4927_v41  ;;  %4221 = vmatprep.mubr.msk.bf16.mxu0 %vm209_vm1, %v4975_v4  ;;  %v1580_v41 = vld [vmem:[#allocation2 + $0x132] sm:$0xff] }
  0x95   :  { %4239 = vmatprep.mubr.msk.bf16.mxu1 %vm209_vm1, %v4965_v1  ;;  %v1588_v45 = vpack.c.bf16 %v1580_v41, %v1081_v15 }
  0x9b   :  { %4222 = vmatmul.mubr.msk.bf16.gmra.mxu0 %vm209_vm1, %v1256_v52 }
  0x9c   :  { %4240 = vmatmul.mubr.msk.bf16.gmra.mxu1 %vm209_vm1, %v1422_v53  ;;  %4245 = vmatprep.mubr.msk.bf16.mxu0 %vm209_vm1, %v4995_v14 }
  0xa3   :  { %4246 = vmatmul.mubr.msk.bf16.vlgmr.msra.gmra.mxu0 %vm209_vm1, %v5002_v33 }
  0xa4   :  { %4249 = vmatprep.mubr.msk.bf16.mxu0 %vm209_vm1, %v5025_v47 }
  0xab   :  { %4250 = vmatmul.mubr.msk.bf16.gmra.mxu0 %vm209_vm1, %v1584_v27 }
  0xac   :  { %4253 = vmatprep.mubr.msk.bf16.mxu0 %vm209_vm1, %v5037_v6 }
  0xb3   :  { %4254 = vmatmul.mubr.msk.bf16.gmra.mxu0 %vm209_vm1, %v5041_v7 }
  0xb4   :  { %4257 = vmatprep.mubr.msk.bf16.mxu0 %vm209_vm1, %v5053_v23 }
  0xbb   :  { %4258 = vmatmul.mubr.msk.bf16.gmra.mxu0 %vm209_vm1, %v1588_v45 }
  0xe3   :  { %v4103_v57 = vpop.f32.mrf.mxu0 }
  0xe4   :  { %v4121_v62 = vpop.f32.mrf.mxu1 }
  0xe5   :  { %v5146_v1 = vadd.f32 %v4121_v62, %v4103_v57  ;;  %v381_v4 = vpop.f32.mrf.mxu0 }
  0xe6   :  { %v505_v14 = vpop.f32.mrf.mxu1 }
  0xe7   :  { %v5148_v33 = vadd.f32 %v505_v14, %v381_v4  ;;  %v4104_v19 = vpop.f32.mrf.mxu0 }
  0xe8   :  { %v4122_v32 = vpop.f32.mrf.mxu1 }
  0xe9   :  { %v517_v44 = vadd.f32 %v4122_v32, %v4104_v19  ;;  %v5190_v46 = vpop.f32.mrf.mxu0 }
  0xea   :  { %v5192_v47 = vpop.f32.mrf.mxu1 }
  0xeb   :  { %v4107_v51 = vpop.f32.mrf.mxu0 }
  0xec   :  { %v4125_v56 = vpop.f32.mrf.mxu1 }
  0xed   :  { %v530_v61 = vadd.f32 %v4125_v56, %v4107_v51  ;;  %v397_v0 = vpop.f32.mrf.mxu0 }
  0xee   :  { %v521_v2 = vpop.f32.mrf.mxu1 }
  0xef   :  { %v522_v3 = vadd.f32 %v521_v2, %v397_v0  ;;  %v4108_v5 = vpop.f32.mrf.mxu0 }
  0xf0   :  { %v4126_v6 = vpop.f32.mrf.mxu1 }
  0xf1   :  { %v533_v50 = vadd.f32 %v4126_v6, %v4108_v5  ;;  %v5194_v7 = vpop.f32.mrf.mxu0 }
  0xf2   :  { %v5196_v55 = vpop.f32.mrf.mxu1 }
  0xf3   :  { %v4111_v21 = vpop.f32.mrf.mxu0 }
  0xf4   :  { %v4129_v8 = vpop.f32.mrf.mxu1 }
  0xf5   :  { %v546_v11 = vadd.f32 %v4129_v8, %v4111_v21  ;;  %v413_v23 = vpop.f32.mrf.mxu0 }
  0xf6   :  { %v537_v37 = vpop.f32.mrf.mxu1 }
  0xf7   :  { %v538_v42 = vadd.f32 %v537_v37, %v413_v23  ;;  %v4112_v58 = vpop.f32.mrf.mxu0 }
  0xf8   :  { %v4130_v26 = vpop.f32.mrf.mxu1 }
  0xf9   :  { %v549_v63 = vadd.f32 %v4130_v26, %v4112_v58  ;;  %v5198_v34 = vpop.f32.mrf.mxu0 }
  0xfa   :  { %v5200_v59 = vpop.f32.mrf.mxu1 }
  0xfb   :  { %v4115_v12 = vpop.f32.mrf.mxu0 }
  0xfc   :  { %v4133_v48 = vpop.f32.mrf.mxu1 }
  0xfd   :  { %v562_v9 = vadd.f32 %v4133_v48, %v4115_v12  ;;  %v429_v13 = vpop.f32.mrf.mxu0 }
  0xfe   :  { %v553_v28 = vpop.f32.mrf.mxu1 }
  0xff   :  { %v554_v29 = vadd.f32 %v553_v28, %v429_v13  ;;  %v4116_v43 = vpop.f32.mrf.mxu0 }
 0x100   :  { %v4134_v16 = vpop.f32.mrf.mxu1 }
 0x101   :  { %v565_v24 = vadd.f32 %v4134_v16, %v4116_v43  ;;  %v5202_v60 = vpop.f32.mrf.mxu0 }
 0x102   :  { %v5204_v39 = vpop.f32.mrf.mxu1 }
 0x103   :  { %v4139_v49 = vpop.f32.mrf.mxu0 }
 0x104   :  { %v720_v40 = vadd.f32 %v4139_v49, %v5146_v1  ;;  %v4157_v54 = vpop.f32.mrf.mxu1 }
 0x105   :  { %v655_v15 = vpop.f32.mrf.mxu0 }
 0x106   :  { %v5208_v18 = vadd.f32 %v655_v15, %v5148_v33  ;;  %v886_v30 = vadd.f32 %v4157_v54, %v720_v40  ;;  %v5210_v20 = vpop.f32.mrf.mxu1 }
 0x107   :  { %v4140_v35 = vpop.f32.mrf.mxu0 }
 0x108   :  { %v5212_v22 = vadd.f32 %v4140_v35, %v517_v44  ;;  %v5214_v36 = vpop.f32.mrf.mxu1 }
 0x109   :  { %v5216_v17 = vpop.f32.mrf.mxu0 }
 0x10a   :  { %v5218_v31 = vpop.f32.mrf.mxu1 }
 0x10b   :  { %v4143_v38 = vpop.f32.mrf.mxu0 }
 0x10c   :  { %v724_v52 = vadd.f32 %v4143_v38, %v530_v61  ;;  %v4161_v53 = vpop.f32.mrf.mxu1 }
 0x10d   :  { %v671_v25 = vpop.f32.mrf.mxu0 }
 0x10e   :  { %v5220_v27 = vadd.f32 %v671_v25, %v522_v3  ;;  %v890_v41 = vadd.f32 %v4161_v53, %v724_v52  ;;  %v5222_v45 = vpop.f32.mrf.mxu1 }
 0x10f   :  { %v4144_v57 = vpop.f32.mrf.mxu0 }
 0x110   :  { %v5224_v62 = vadd.f32 %v4144_v57, %v533_v50  ;;  %v5226_v1 = vpop.f32.mrf.mxu1 }
 0x111   :  { %v5228_v4 = vpop.f32.mrf.mxu0 }
 0x112   :  { %v5230_v14 = vpop.f32.mrf.mxu1 }
 0x113   :  { %v4147_v33 = vpop.f32.mrf.mxu0 }
 0x114   :  { %v728_v19 = vadd.f32 %v4147_v33, %v546_v11  ;;  %v4165_v32 = vpop.f32.mrf.mxu1 }
 0x115   :  { %v687_v44 = vpop.f32.mrf.mxu0 }
 0x116   :  { %v5232_v51 = vadd.f32 %v687_v44, %v538_v42  ;;  %v894_v56 = vadd.f32 %v4165_v32, %v728_v19  ;;  %v5234_v61 = vpop.f32.mrf.mxu1 }
 0x117   :  { %v4148_v0 = vpop.f32.mrf.mxu0 }
 0x118   :  { %v5236_v2 = vadd.f32 %v4148_v0, %v549_v63  ;;  %v5238_v3 = vpop.f32.mrf.mxu1 }
 0x119   :  { %v5240_v5 = vpop.f32.mrf.mxu0 }
 0x11a   :  { %v5242_v6 = vpop.f32.mrf.mxu1 }
 0x11b   :  { %v4151_v50 = vpop.f32.mrf.mxu0 }
 0x11c   :  { %v732_v21 = vadd.f32 %v4151_v50, %v562_v9  ;;  %v4169_v8 = vpop.f32.mrf.mxu1 }
 0x11d   :  { %v703_v11 = vpop.f32.mrf.mxu0 }
 0x11e   :  { %v5244_v23 = vadd.f32 %v703_v11, %v554_v29  ;;  %v898_v37 = vadd.f32 %v4169_v8, %v732_v21  ;;  %v5246_v42 = vpop.f32.mrf.mxu1 }
 0x11f   :  { %v4152_v58 = vpop.f32.mrf.mxu0 }
 0x120   :  { %v5248_v26 = vadd.f32 %v4152_v58, %v565_v24  ;;  %v5250_v63 = vpop.f32.mrf.mxu1 }
 0x121   :  { %6373 = vst [vmem:[#allocation8_spill] sm:$0xff] %v5250_v63  ;;  %v5252_v12 = vpop.f32.mrf.mxu0 }
 0x122   :  { %6372 = vst [vmem:[#allocation7_spill] sm:$0xff] %v5248_v26  ;;  %v5254_v48 = vpop.f32.mrf.mxu1 }
 0x123   :  { %6374 = vst [vmem:[#allocation9_spill] sm:$0xff] %v5254_v48  ;;  %v4175_v13 = vpop.f32.mrf.mxu0 }
 0x124   :  { %v5256_v28 = vadd.f32 %v4175_v13, %v886_v30  ;;  %v5258_v9 = vpop.f32.mrf.mxu1 }
 0x125   :  { %v987_v43 = vpop.f32.mrf.mxu0 }
 0x126   :  { %v1153_v29 = vpop.f32.mrf.mxu1 }
 0x127   :  { %v4176_v16 = vpop.f32.mrf.mxu0 }
 0x128   :  { %v5260_v49 = vpop.f32.mrf.mxu1 }
 0x129   :  { %v990_v40 = vpop.f32.mrf.mxu0 }
 0x12a   :  { %v5262_v54 = vpop.f32.mrf.mxu1 }
 0x12b   :  { %v4179_v24 = vpop.f32.mrf.mxu0 }
 0x12c   :  { %v5264_v15 = vadd.f32 %v4179_v24, %v890_v41  ;;  %v5266_v35 = vpop.f32.mrf.mxu1 }
 0x12d   :  { %v5268_v38 = vpop.f32.mrf.mxu0 }
 0x12e   :  { %v5270_v52 = vpop.f32.mrf.mxu1 }
 0x12f   :  { %v5272_v30 = vpop.f32.mrf.mxu0 }
 0x130   :  { %v5274_v53 = vpop.f32.mrf.mxu1 }
 0x131   :  { %v5276_v25 = vpop.f32.mrf.mxu0 }
 0x132   :  { %v5278_v57 = vpop.f32.mrf.mxu1 }
 0x133   :  { %6375 = vst [vmem:[#allocation10_spill] sm:$0xff] %v5278_v57  ;;  %v4183_v33 = vpop.f32.mrf.mxu0  ;;  %v509_v57 = vadd.f32 %v5192_v47, %v5190_v46 }
 0x134   :  { %v5280_v19 = vadd.f32 %v4183_v33, %v894_v56  ;;  %v5282_v32 = vpop.f32.mrf.mxu1 }
 0x135   :  { %6377 = vst [vmem:[#allocation12_spill] sm:$0xff] %v5282_v32  ;;  %v5284_v41 = vpop.f32.mrf.mxu0 }
 0x136   :  { %6376 = vst [vmem:[#allocation11_spill] sm:$0xff] %v5280_v19  ;;  %v5286_v44 = vpop.f32.mrf.mxu1 }
 0x137   :  { %6378 = vst [vmem:[#allocation13_spill] sm:$0xff] %v5286_v44  ;;  %v5288_v0 = vpop.f32.mrf.mxu0 }
 0x138   :  { %6379 = vst [vmem:[#allocation14_spill] sm:$0xff] %v5288_v0  ;;  %v5290_v50 = vpop.f32.mrf.mxu1 }
 0x139   :  { %6380 = vst [vmem:[#allocation15_spill] sm:$0xff] %v5290_v50  ;;  %v5292_v21 = vpop.f32.mrf.mxu0 }
 0x13a   :  { %6381 = vst [vmem:[#allocation16_spill] sm:$0xff] %v5292_v21  ;;  %v5294_v8 = vpop.f32.mrf.mxu1 }
 0x13b   :  { %6382 = vst [vmem:[#allocation17_spill] sm:$0xff] %v5294_v8  ;;  %v4187_v11 = vpop.f32.mrf.mxu0 }
 0x13c   :  { %v5296_v58 = vadd.f32 %v4187_v11, %v898_v37  ;;  %v5298_v13 = vpop.f32.mrf.mxu1 }
 0x13d   :  { %6384 = vst [vmem:[#allocation19_spill] sm:$0xff] %v5298_v13  ;;  %v5300_v56 = vpop.f32.mrf.mxu0 }
 0x13e   :  { %6383 = vst [vmem:[#allocation18_spill] sm:$0xff] %v5296_v58  ;;  %6385 = vst [vmem:[#allocation20_spill] sm:$0xff] %v5300_v56  ;;  %v5302_v24 = vpop.f32.mrf.mxu1 }
 0x13f   :  { %6386 = vst [vmem:[#allocation21_spill] sm:$0xff] %v5302_v24  ;;  %v5304_v33 = vpop.f32.mrf.mxu0 }
 0x140   :  { %6387 = vst [vmem:[#allocation22_spill] sm:$0xff] %v5304_v33  ;;  %v5306_v10 = vpop.f32.mrf.mxu1 }
 0x141   :  { %6388 = vst [vmem:[#allocation23_spill] sm:$0xff] %v5306_v10  ;;  %v5308_v44 = vpop.f32.mrf.mxu0 }
 0x142   :  { %6389 = vst [vmem:[#allocation24_spill] sm:$0xff] %v5308_v44  ;;  %v5310_v50 = vpop.f32.mrf.mxu1 }
 0x143   :  { %6390 = vst [vmem:[#allocation25_spill] sm:$0xff] %v5310_v50  ;;  %v4211_v32 = vpop.f32.mrf.mxu0 }
 0x144   :  { %v4229_v19 = vpop.f32.mrf.mxu1 }
 0x145   :  { %v1320_v8 = vpop.f32.mrf.mxu0 }
 0x146   :  { %v1486_v48 = vpop.f32.mrf.mxu1 }
 0x147   :  { %v4212_v37 = vpop.f32.mrf.mxu0 }
 0x148   :  { %v4230_v58 = vpop.f32.mrf.mxu1 }
 0x149   :  { %v1323_v11 = vpop.f32.mrf.mxu0 }
 0x14a   :  { %v1489_v56 = vpop.f32.mrf.mxu1 }
 0x14b   :  { %v5312_v13 = vpop.f32.mrf.mxu0 }
 0x14c   :  { %6391 = vst [vmem:[#allocation26_spill] sm:$0xff] %v5312_v13  ;;  %v5316_v33 = vpop.f32.mrf.mxu1  ;;  %v884_v13 = vadd.f32 %v5210_v20, %v5208_v18  ;;  %v525_v18 = vadd.f32 %v5196_v55, %v5194_v7  ;;  %v891_v7 = vadd.f32 %v5226_v1, %v5224_v62 }
 0x14d   :  { %v1336_v63 = vpop.f32.mrf.mxu0  ;;  %6393 = vst [vmem:[#allocation28_spill] sm:$0xff] %v5316_v33 }
 0x14e   :  { %v5322_v50 = vpop.f32.mrf.mxu1 }
 0x14f   :  { %v5314_v24 = vpop.f32.mrf.mxu0  ;;  %6396 = vst [vmem:[#allocation31_spill] sm:$0xff] %v5322_v50 }
 0x150   :  { %6392 = vst [vmem:[#allocation27_spill] sm:$0xff] %v5314_v24  ;;  %v719_v24 = vadd.f32 %v5216_v17, %v509_v57  ;;  %v5333_v0 = vpop.f32.mrf.mxu1 }
 0x151   :  { %v5318_v10 = vpop.f32.mrf.mxu0 }
 0x152   :  { %6394 = vst [vmem:[#allocation29_spill] sm:$0xff] %v5318_v10  ;;  %v1050_v10 = vadd.f32 %v987_v43, %v884_v13  ;;  %v885_v50 = vadd.f32 %v5218_v31, %v719_v24  ;;  %v5342_v46 = vpop.f32.mrf.mxu1  ;;  %v541_v43 = vadd.f32 %v5200_v59, %v5198_v34  ;;  %v1218_v31 = vadd.f32 %v5258_v9, %v5256_v28 }
 0x153   :  { %v5320_v44 = vpop.f32.mrf.mxu0 }
 0x154   :  { %6395 = vst [vmem:[#allocation30_spill] sm:$0xff] %v5320_v44  ;;  %v1216_v17 = vadd.f32 %v1153_v29, %v1050_v10  ;;  %v1051_v57 = vadd.f32 %v990_v40, %v885_v50  ;;  %v727_v10 = vadd.f32 %v5240_v5, %v541_v43  ;;  %v5360_v55 = vpop.f32.mrf.mxu1  ;;  %v557_v5 = vadd.f32 %v5204_v39, %v5202_v60 }
 0x155   :  { %v5324_v26 = vpop.f32.mrf.mxu0  ;;  %v5382_v60 = vadd.f32 %v5246_v42, %v5244_v23  ;;  %v6400_v23 = vld [vmem:[#allocation26_spill] sm:$0xff] }
 0x156   :  { %6397 = vst [vmem:[#allocation32_spill] sm:$0xff] %v5324_v26  ;;  %v887_v26 = vadd.f32 %v5214_v36, %v5212_v22  ;;  %v888_v22 = vadd.f32 %v5222_v45, %v5220_v27  ;;  %v723_v36 = vadd.f32 %v5228_v4, %v525_v18  ;;  %v1383_v24 = vadd.f32 %v1320_v8, %v1216_v17 }
 0x157   :  { %v5328_v21 = vpop.f32.mrf.mxu0  ;;  %v1217_v59 = vadd.f32 %v5262_v54, %v1051_v57  ;;  %v1385_v45 = vadd.f32 %v4211_v32, %v1218_v31  ;;  %v1057_v4 = vadd.f32 %v5272_v30, %v891_v7  ;;  %v893_v40 = vadd.f32 %v5242_v6, %v727_v10  ;;  %v5376_v54 = vpop.f32.mrf.mxu1  ;;  %v6404_v57 = vld [vmem:[#allocation9_spill] sm:$0xff] }
 0x158   :  { %v1053_v20 = vadd.f32 %v4176_v16, %v887_v26  ;;  %v1054_v27 = vadd.f32 %v5268_v38, %v888_v22  ;;  %v889_v9 = vadd.f32 %v5230_v14, %v723_v36  ;;  %v1549_v62 = vadd.f32 %v1486_v48, %v1383_v24  ;;  %v6405_v22 = vld [vmem:[#allocation11_spill] sm:$0xff]  ;;  %v6406_v36 = vld [vmem:[#allocation12_spill] sm:$0xff] }
 0x159   :  { %v5335_v33 = vpop.f32.mrf.mxu0  ;;  %v1384_v1 = vadd.f32 %v1323_v11, %v1217_v59  ;;  %v892_v16 = vadd.f32 %v5234_v61, %v5232_v51  ;;  %v1551_v48 = vadd.f32 %v4229_v19, %v1385_v45  ;;  %v731_v39 = vadd.f32 %v5252_v12, %v557_v5  ;;  %v6398_v19 = vld [vmem:[#allocation14_spill] sm:$0xff]  ;;  %v5392_v18 = vpop.f32.mrf.mxu1  ;;  %v5397_v12 = vld [vmem:[%s6362_s2] ss:$0 sm:$0xff]  ;;  %v6412_v5 = vld [vmem:[#allocation17_spill] sm:$0xff] }
 0x15a   :  { %v1219_v34 = vadd.f32 %v5260_v49, %v1053_v20  ;;  %v895_v49 = vadd.f32 %v5238_v3, %v5236_v2  ;;  %v1220_v30 = vadd.f32 %v5270_v52, %v1054_v27  ;;  %v1055_v14 = vadd.f32 %v5276_v25, %v889_v9  ;;  %v6403_v20 = vld [vmem:[#allocation8_spill] sm:$0xff]  ;;  %v6407_v24 = vld [vmem:[#allocation27_spill] sm:$0xff]  ;;  %v6409_v27 = vld [vmem:[#allocation29_spill] sm:$0xff] }
 0x15b   :  { %v5337_v44 = vpop.f32.mrf.mxu0  ;;  %v1222_v51 = vadd.f32 %v5266_v35, %v5264_v15  ;;  %v1223_v61 = vadd.f32 %v5274_v53, %v1057_v4  ;;  %v1550_v6 = vadd.f32 %v1489_v56, %v1384_v1  ;;  %v1058_v25 = vadd.f32 %v5284_v41, %v892_v16  ;;  %v6401_v35 = vld [vmem:[#allocation10_spill] sm:$0xff]  ;;  %v6402_v56 = vld [vmem:[#allocation7_spill] sm:$0xff]  ;;  %v6410_v9 = vld [vmem:[#allocation13_spill] sm:$0xff] }
 0x15c   :  { %v1386_v29 = vadd.f32 %v4212_v37, %v1219_v34  ;;  %v1387_v50 = vadd.f32 %v1336_v63, %v1220_v30  ;;  %v1061_v8 = vadd.f32 %v6398_v19, %v895_v49  ;;  %v6399_v37 = vld [vmem:[#allocation16_spill] sm:$0xff]  ;;  %v1221_v53 = vadd.f32 %v6401_v35, %v1055_v14  ;;  %v6408_v34 = vld [vmem:[#allocation31_spill] sm:$0xff] }
 0x15d   :  { %v5344_v47 = vpop.f32.mrf.mxu0  ;;  %v1059_v11 = vadd.f32 %v6399_v37, %v893_v40  ;;  %v1389_v42 = vadd.f32 %v6400_v23, %v1222_v51  ;;  %v5405_v17 = vadd.f32 %v6403_v20, %v6402_v56  ;;  %v5408_v43 = vadd.f32 %v6404_v57, %v731_v39  ;;  %v6413_v49 = vld [vmem:[#allocation28_spill] sm:$0xff]  ;;  %v6417_v37 = vld [vmem:[#allocation30_spill] sm:$0xff]  ;;  %v3854_v35 = vld [vmem:[%s6365_s5 + $0x4] sm:$0xf] }
 0x15e   :  { %v1552_v3 = vadd.f32 %v4230_v58, %v1386_v29  ;;  %v1226_v31 = vadd.f32 %v6406_v36, %v6405_v22  ;;  %v1390_v7 = vadd.f32 %v6407_v24, %v1223_v61  ;;  %v1553_v59 = vadd.f32 %v6408_v34, %v1387_v50  ;;  %v6414_v61 = vld [vmem:[#allocation32_spill] sm:$0xff]  ;;  %4432 = vmatprep.subr.msk.bf16.mxu1 %vm2077_vm5, %v3854_v35 }
 0x15f   :  { %v5350_v13 = vpop.f32.mrf.mxu0  ;;  %v1388_v45 = vadd.f32 %v6409_v27, %v1221_v53  ;;  %v1224_v29 = vadd.f32 %v6410_v9, %v1058_v25  ;;  %v1225_v16 = vadd.f32 %v6412_v5, %v1059_v11  ;;  %v1555_v40 = vadd.f32 %v6413_v49, %v1389_v42  ;;  %v2026_v53 = vld [vmem:[%s6365_s5] sm:$0xf] }
 0x160   :  { %v1556_v51 = vadd.f32 %v5333_v0, %v1390_v7  ;;  %v6416_v0 = vld [vmem:[#allocation20_spill] sm:$0xff]  ;;  %v1393_v11 = vadd.f32 %v6417_v37, %v1226_v31  ;;  %v2079_v56 = vsel %vm2077_vm5, %v3854_v35, 0  ;;  %4433 = vmatprep.subr.msk.bf16.mxu0 %vm2077_vm5, %v2026_v53  ;;  %v2203_v31 = vsel %vm2077_vm5, %v2026_v53, 0 }
 0x161   :  { %v5362_v26 = vpop.f32.mrf.mxu0  ;;  %v1554_v50 = vadd.f32 %v5342_v46, %v1388_v45  ;;  %v1062_v46 = vadd.f32 %v6416_v0, %v5382_v60  ;;  %4262 = vmatpush3.bf16.msra.mxu1 %v2079_v56  ;;  %v1392_v24 = vadd.f32 %v5335_v33, %v1225_v16  ;;  %4280 = vmatpush3.bf16.msra.mxu0 %v2203_v31  ;;  %v6420_v45 = vld [vmem:[#allocation24_spill] sm:$0xff] }
 0x162   :  { %v1063_v9 = vadd.f32 %v6420_v45, %v5408_v43 }
 0x163   :  { %v4247_v28 = vpop.f32.mrf.mxu0 }
 0x164   :  { %v1717_v52 = vadd.f32 %v4247_v28, %v1551_v48 }
 0x165   :  { %v1652_v38 = vpop.f32.mrf.mxu0 }
 0x166   :  { %v1715_v32 = vadd.f32 %v1652_v38, %v1549_v62  ;;  %v5416_v4 = vadd.f32 %v5397_v12, %v1717_v52  ;;  %v6411_v62 = vld [vmem:[#allocation15_spill] sm:$0xff]  ;;  %v5425_v38 = vpop.f32.mrf.mxu1 }
 0x167   :  { %v4248_v2 = vpop.f32.mrf.mxu0  ;;  %v1227_v1 = vadd.f32 %v6411_v62, %v1061_v8  ;;  %v6415_v8 = vmov 0.0  }
 0x168   :  { %v5401_v63 = vadd.f32 %v5397_v12, %v1715_v32  ;;  %v1718_v41 = vadd.f32 %v4248_v2, %v1552_v3  ;;  %v1391_v2 = vadd.f32 %v6414_v61, %v1224_v29  ;;  %v1758_v52 = vsel %vm1754_vm3, %v5416_v4, 0.0  ;;  %1968 = vst.msk [vmem:[#allocation3 + $0xb8] sm:$0x3] %vm1945_vm4, %v6415_v8  ;;  %1970 = vst.msk [vmem:[#allocation3 + $0xc8] sm:$0x3] %vm1945_vm4, %v6415_v8  ;;  %v5485_v23 = vpop.f32.mrf.mxu1 }
 0x169   :  { %v1655_v15 = vpop.f32.mrf.mxu0  ;;  %1972 = vst.msk [vmem:[#allocation3 + $0xd8] sm:$0x3] %vm1945_vm4, %v6415_v8  ;;  %1974 = vst.msk [vmem:[#allocation3 + $0xe8] sm:$0x3] %vm1945_vm4, %v6415_v8  ;;  %v1394_v20 = vadd.f32 %v5328_v21, %v1227_v1  ;;  %v6418_v21 = vld [vmem:[#allocation22_spill] sm:$0xff]  ;;  %v1559_v1 = vadd.f32 %v5360_v55, %v1393_v11 }
 0x16a   :  { %v1716_v58 = vadd.f32 %v1655_v15, %v1550_v6  ;;  %v1755_v14 = vsel %vm1754_vm3, %v5401_v63, 0.0  ;;  %v5430_v48 = vadd.f32 %v5397_v12, %v1718_v41  ;;  %1976 = vst.msk [vmem:[#allocation3 + $0xf8] sm:$0x3] %vm1945_vm4, %v6415_v8  ;;  %1978 = vst.msk [vmem:[#allocation3 + $0x108] sm:$0x3] %vm1945_vm4, %v6415_v8  ;;  %v1557_v57 = vadd.f32 %v5376_v54, %v1391_v2  ;;  %v1534_v29 = vpop.f32.mrf.mxu1 }
 0x16b   :  { %v4251_v10 = vpop.f32.mrf.mxu0  ;;  %1980 = vst.msk [vmem:[#allocation3 + $0x118] sm:$0x3] %vm1945_vm4, %v6415_v8  ;;  %1982 = vst.msk [vmem:[#allocation3 + $0x128] sm:$0x3] %vm1945_vm4, %v6415_v8  ;;  %v1065_v54 = vadd.f32 %v6418_v21, %v5405_v17 }
 0x16c   :  { %v5419_v28 = vadd.f32 %v5397_v12, %v1716_v58  ;;  %v1721_v25 = vadd.f32 %v4251_v10, %v1555_v40  ;;  %1946 = vst.msk [vmem:[#allocation3 + $0x8] sm:$0x3] %vm1945_vm4, %v6415_v8  ;;  %1948 = vst.msk [vmem:[#allocation3 + $0x18] sm:$0x3] %vm1945_vm4, %v6415_v8  ;;  %v1760_v41 = vsel %vm1754_vm3, %v5430_v48, 0.0  ;;  %v6421_v40 = vld [vmem:[#allocation18_spill] sm:$0xff] }
 0x16d   :  { %v1668_v30 = vpop.f32.mrf.mxu0  ;;  %1950 = vst.msk [vmem:[#allocation3 + $0x28] sm:$0x3] %vm1945_vm4, %v6415_v8  ;;  %1952 = vst.msk [vmem:[#allocation3 + $0x38] sm:$0x3] %vm1945_vm4, %v6415_v8 }
 0x16e   :  { %v1756_v32 = vsel %vm1754_vm3, %v5419_v28, 0.0  ;;  %v1719_v39 = vadd.f32 %v1668_v30, %v1553_v59  ;;  %1954 = vst.msk [vmem:[#allocation3 + $0x48] sm:$0x3] %vm1945_vm4, %v6415_v8  ;;  %1956 = vst.msk [vmem:[#allocation3 + $0x58] sm:$0x3] %vm1945_vm4, %v6415_v8  ;;  %v5503_v7 = vadd.f32 %v5397_v12, %v1721_v25  ;;  %v6419_v59 = vld [vmem:[#allocation21_spill] sm:$0xff] }
 0x16f   :  { %v1757_v3 = vadd.f32 %v1756_v32, %v1755_v14  ;;  %v4252_v6 = vpop.f32.mrf.mxu0  ;;  %1958 = vst.msk [vmem:[#allocation3 + $0x68] sm:$0x3] %vm1945_vm4, %v6415_v8  ;;  %1960 = vst.msk [vmem:[#allocation3 + $0x78] sm:$0x3] %vm1945_vm4, %v6415_v8  ;;  %v1228_v27 = vadd.f32 %v6419_v59, %v1062_v46  ;;  %v6422_v30 = vld [vmem:[#allocation19_spill] sm:$0xff]  ;;  %v1560_v14 = vadd.f32 %v5392_v18, %v1394_v20 }
 0x170   :  { %v5440_v19 = vadd.f32 %v5397_v12, %v1719_v39  ;;  %1962 = vst.msk [vmem:[#allocation3 + $0x88] sm:$0x3] %vm1945_vm4, %v6415_v8  ;;  %1964 = vst.msk [vmem:[#allocation3 + $0x98] sm:$0x3] %vm1945_vm4, %v6415_v8  ;;  %v1722_v58 = vadd.f32 %v4252_v6, %v1556_v51  ;;  %v1230_v17 = vadd.f32 %v6422_v30, %v6421_v40  ;;  %v1766_v55 = vsel %vm1754_vm3, %v5503_v7, 0.0  ;;  %v6423_v6 = vld [vmem:[#allocation23_spill] sm:$0xff] }
 0x171   :  { %1966 = vst.msk [vmem:[#allocation3 + $0xa8] sm:$0x3] %vm1945_vm4, %v6415_v8  ;;  %1984 = vst.msk [vmem:[#allocation3 + $0x138] sm:$0x3] %vm1945_vm4, %v6415_v8  ;;  %v1759_v42 = vadd.f32 %v1758_v52, %v1757_v3  ;;  %v1671_v15 = vpop.f32.mrf.mxu0  ;;  %v1395_v32 = vadd.f32 %v5344_v47, %v1228_v27  ;;  %v1558_v51 = vadd.f32 %v5425_v38, %v1392_v24  ;;  %v5534_v3 = vld [vmem:[%s6365_s5 + $0x8] sm:$0xf]  ;;  %v4242_v52 = vpop.f32.mrf.mxu1 }
 0x172   :  { %v1720_v60 = vadd.f32 %v1671_v15, %v1554_v50  ;;  %v1762_v10 = vsel %vm1754_vm3, %v5440_v19, 0.0  ;;  %v5517_v5 = vadd.f32 %v5397_v12, %v1722_v58  ;;  %v1231_v18 = vadd.f32 %v6423_v6, %v1065_v54  ;;  %v6424_v50 = vld [vmem:[#allocation25_spill] sm:$0xff]  ;;  %4434 = vmatprep.subr.msk.bf16.mxu1 %vm2077_vm5, %v5534_v3  ;;  %v5568_v6 = vld [vmem:[%s6365_s5 + $0xc] sm:$0xf] }
 0x173   :  { %v1761_v22 = vadd.f32 %v1760_v41, %v1759_v42  ;;  %v4255_v36 = vpop.f32.mrf.mxu0  ;;  %v1229_v47 = vadd.f32 %v6424_v50, %v1063_v9  ;;  %v1397_v38 = vadd.f32 %v5337_v44, %v1230_v17  ;;  %v1561_v42 = vadd.f32 %v1534_v29, %v1395_v32  ;;  %v1537_v44 = vpop.f32.mrf.mxu1  ;;  %4435 = vmatprep.subr.msk.bf16.mxu0 %vm2077_vm5, %v5568_v6 }
 0x174   :  { %v5508_v34 = vadd.f32 %v5397_v12, %v1720_v60  ;;  %v1725_v61 = vadd.f32 %v4255_v36, %v1559_v1  ;;  %v1768_v0 = vsel %vm1754_vm3, %v5517_v5, 0.0  ;;  %v1398_v11 = vadd.f32 %v5350_v13, %v1231_v18 }
 0x175   :  { %v1763_v33 = vadd.f32 %v1762_v10, %v1761_v22  ;;  %v1684_v62 = vpop.f32.mrf.mxu0  ;;  %v1396_v53 = vadd.f32 %v5362_v26, %v1229_v47 }
 0x176   :  { %v1764_v16 = vsel %vm1754_vm3, %v5508_v34, 0.0  ;;  %v1723_v49 = vadd.f32 %v1684_v62, %v1557_v57  ;;  %v1748_v41 = vadd.f32 %v5397_v12, %v1725_v61  ;;  %v1563_v57 = vadd.f32 %v5485_v23, %v1397_v38 }
 0x177   :  { %v1765_v43 = vadd.f32 %v1764_v16, %v1763_v33  ;;  %v4256_v39 = vpop.f32.mrf.mxu0  ;;  %v1564_v26 = vadd.f32 %v4242_v52, %v1398_v11  ;;  %v1562_v10 = vadd.f32 %v1537_v44, %v1396_v53 }
 0x178   :  { %v5529_v2 = vadd.f32 %v5397_v12, %v1723_v49  ;;  %v1726_v46 = vadd.f32 %v4256_v39, %v1560_v14  ;;  %v1774_v21 = vsel %vm1754_vm3, %v1748_v41, 0.0 }
 0x179   :  { %v1767_v25 = vadd.f32 %v1766_v55, %v1765_v43  ;;  %v1687_v8 = vpop.f32.mrf.mxu0 }
 0x17a   :  { %v1724_v37 = vadd.f32 %v1687_v8, %v1558_v51  ;;  %v1770_v58 = vsel %vm1754_vm3, %v5529_v2, 0.0  ;;  %v1749_v13 = vadd.f32 %v5397_v12, %v1726_v46 }
 0x17b   :  { %v1769_v15 = vadd.f32 %v1768_v0, %v1767_v25  ;;  %v4259_v35 = vpop.f32.mrf.mxu0 }
 0x17c   :  { %v5549_v60 = vadd.f32 %v5397_v12, %v1724_v37  ;;  %v1729_v54 = vadd.f32 %v4259_v35, %v1563_v57  ;;  %v1776_v9 = vsel %vm1754_vm3, %v1749_v13, 0.0 }
 0x17d   :  { %v1771_v56 = vadd.f32 %v1770_v58, %v1769_v15  ;;  %v1700_v20 = vpop.f32.mrf.mxu0 }
 0x17e   :  { %v1772_v22 = vsel %vm1754_vm3, %v5549_v60, 0.0  ;;  %v1727_v36 = vadd.f32 %v1700_v20, %v1561_v42  ;;  %v1752_v62 = vadd.f32 %v5397_v12, %v1729_v54 }
 0x17f   :  { %v1773_v31 = vadd.f32 %v1772_v22, %v1771_v56  ;;  %v4260_v24 = vpop.f32.mrf.mxu0 }
 0x180   :  { %v1750_v59 = vadd.f32 %v5397_v12, %v1727_v36  ;;  %v1730_v23 = vadd.f32 %v4260_v24, %v1564_v26  ;;  %v1782_v14 = vsel %vm1754_vm3, %v1752_v62, 0.0 }
 0x181   :  { %v1775_v27 = vadd.f32 %v1774_v21, %v1773_v31  ;;  %v1703_v45 = vpop.f32.mrf.mxu0 }
 0x182   :  { %v1728_v29 = vadd.f32 %v1703_v45, %v1562_v10  ;;  %v1778_v1 = vsel %vm1754_vm3, %v1750_v59, 0.0  ;;  %v1753_v40 = vadd.f32 %v5397_v12, %v1730_v23 }
 0x183   :  { %v1777_v33 = vadd.f32 %v1776_v9, %v1775_v27 }
 0x184   :  { %v1751_v16 = vadd.f32 %v5397_v12, %v1728_v29  ;;  %v1784_v43 = vsel %vm1754_vm3, %v1753_v40, 0.0 }
 0x185   :  { %v1779_v49 = vadd.f32 %v1778_v1, %v1777_v33 }
 0x186   :  { %v1780_v30 = vsel %vm1754_vm3, %v1751_v16, 0.0 }
 0x187   :  { %v1781_v17 = vadd.f32 %v1780_v30, %v1779_v49 }
 0x189   :  { %v1783_v32 = vadd.f32 %v1782_v14, %v1781_v17 }
 0x18b   :  { %v1785_v39 = vadd.f32 %v1784_v43, %v1783_v32 }
 0x18d   :  { %v1786_v51 = vrot.slane %v1785_v39, 4 }
 0x18f   :  { %v1787_v55 = vadd.f32 %v1786_v51, %v1785_v39 }
 0x191   :  { %v1788_v61 = vrot.slane %v1787_v55, 2 }
 0x193   :  { %v1789_v18 = vadd.f32 %v1788_v61, %v1787_v55 }
 0x195   :  { %v1790_v12 = vrot.slane %v1789_v18, 1 }
 0x197   :  { %v1791_v50 = vadd.f32 %v1790_v12, %v1789_v18 }
 0x199   :  { %v1793_v47 = vmul.f32 0.0078125, %v1791_v50 }
 0x19b   :  { %v5573_v52 = vsub.f32 %v5401_v63, %v1793_v47  ;;  %v5576_v25 = vsub.f32 %v5419_v28, %v1793_v47  ;;  %v5579_v8 = vsub.f32 %v5416_v4, %v1793_v47  ;;  %v5582_v38 = vsub.f32 %v5430_v48, %v1793_v47 }
 0x19c   :  { %v5585_v0 = vsub.f32 %v5440_v19, %v1793_v47  ;;  %v5588_v46 = vsub.f32 %v5503_v7, %v1793_v47  ;;  %v5591_v37 = vsub.f32 %v5517_v5, %v1793_v47  ;;  %v5594_v63 = vsub.f32 %v5529_v2, %v1793_v47 }
 0x19d   :  { %v5596_v28 = vsub.f32 %v1748_v41, %v1793_v47  ;;  %v5598_v11 = vsub.f32 %v1749_v13, %v1793_v47  ;;  %v5600_v4 = vsub.f32 %v1750_v59, %v1793_v47  ;;  %v5602_v48 = vsub.f32 %v1752_v62, %v1793_v47 }
 0x19e   :  { %v5604_v42 = vsub.f32 %v1753_v40, %v1793_v47  ;;  %v1810_v19 = vmul.f32 %v5573_v52, %v5573_v52  ;;  %v1811_v7 = vmul.f32 %v5576_v25, %v5576_v25  ;;  %v1812_v5 = vmul.f32 %v5579_v8, %v5579_v8 }
 0x19f   :  { %v1799_v2 = vsub.f32 %v5508_v34, %v1793_v47  ;;  %v1813_v15 = vmul.f32 %v5582_v38, %v5582_v38  ;;  %v1814_v58 = vmul.f32 %v5585_v0, %v5585_v0  ;;  %v1816_v34 = vmul.f32 %v5588_v46, %v5588_v46 }
 0x1a0   :  { %v1826_v35 = vsel %vm1754_vm3, %v1810_v19, 0.0  ;;  %v1827_v53 = vsel %vm1754_vm3, %v1811_v7, 0.0  ;;  %v1829_v44 = vsel %vm1754_vm3, %v1812_v5, 0.0  ;;  %v1803_v26 = vsub.f32 %v5549_v60, %v1793_v47 }
 0x1a1   :  { %v1828_v41 = vadd.f32 %v1827_v53, %v1826_v35  ;;  %v1815_v20 = vmul.f32 %v1799_v2, %v1799_v2  ;;  %v1831_v57 = vsel %vm1754_vm3, %v1813_v15, 0.0  ;;  %v1833_v22 = vsel %vm1754_vm3, %v1814_v58, 0.0 }
 0x1a2   :  { %v1817_v31 = vmul.f32 %v5591_v37, %v5591_v37  ;;  %v1818_v21 = vmul.f32 %v5594_v63, %v5594_v63  ;;  %v1837_v54 = vsel %vm1754_vm3, %v1816_v34, 0.0  ;;  %v1819_v27 = vmul.f32 %v1803_v26, %v1803_v26 }
 0x1a3   :  { %v1830_v56 = vadd.f32 %v1829_v44, %v1828_v41  ;;  %v1835_v24 = vsel %vm1754_vm3, %v1815_v20, 0.0  ;;  %v1820_v23 = vmul.f32 %v5596_v28, %v5596_v28  ;;  %v1807_v33 = vsub.f32 %v1751_v16, %v1793_v47 }
 0x1a4   :  { %v1839_v45 = vsel %vm1754_vm3, %v1817_v31, 0.0  ;;  %v1841_v60 = vsel %vm1754_vm3, %v1818_v21, 0.0  ;;  %v1821_v62 = vmul.f32 %v5598_v11, %v5598_v11  ;;  %v1843_v1 = vsel %vm1754_vm3, %v1819_v27, 0.0 }
 0x1a5   :  { %v1832_v13 = vadd.f32 %v1831_v57, %v1830_v56  ;;  %v1822_v40 = vmul.f32 %v5600_v4, %v5600_v4  ;;  %v1845_v30 = vsel %vm1754_vm3, %v1820_v23, 0.0  ;;  %v1823_v14 = vmul.f32 %v1807_v33, %v1807_v33 }
 0x1a6   :  { %v1847_v32 = vsel %vm1754_vm3, %v1821_v62, 0.0  ;;  %v1824_v39 = vmul.f32 %v5602_v48, %v5602_v48  ;;  %v1825_v55 = vmul.f32 %v5604_v42, %v5604_v42 }
 0x1a7   :  { %v1834_v36 = vadd.f32 %v1833_v22, %v1832_v13  ;;  %v1849_v16 = vsel %vm1754_vm3, %v1822_v40, 0.0  ;;  %v1851_v61 = vsel %vm1754_vm3, %v1823_v14, 0.0 }
 0x1a8   :  { %v1853_v12 = vsel %vm1754_vm3, %v1824_v39, 0.0  ;;  %v1855_v47 = vsel %vm1754_vm3, %v1825_v55, 0.0 }
 0x1a9   :  { %v1836_v10 = vadd.f32 %v1835_v24, %v1834_v36 }
 0x1ab   :  { %v1838_v59 = vadd.f32 %v1837_v54, %v1836_v10  ;;  %v3852_v10 = vld [vmem:[%s6363_s3] ss:$0 sm:$0xff] }
 0x1ad   :  { %v1840_v9 = vadd.f32 %v1839_v45, %v1838_v59 }
 0x1af   :  { %v1842_v29 = vadd.f32 %v1841_v60, %v1840_v9 }
 0x1b1   :  { %v1844_v49 = vadd.f32 %v1843_v1, %v1842_v29 }
 0x1b3   :  { %v1846_v17 = vadd.f32 %v1845_v30, %v1844_v49 }
 0x1b5   :  { %v1848_v43 = vadd.f32 %v1847_v32, %v1846_v17 }
 0x1b7   :  { %v1850_v51 = vadd.f32 %v1849_v16, %v1848_v43 }
 0x1b9   :  { %v1852_v18 = vadd.f32 %v1851_v61, %v1850_v51 }
 0x1bb   :  { %v1854_v50 = vadd.f32 %v1853_v12, %v1852_v18 }
 0x1bd   :  { %v1856_v19 = vadd.f32 %v1855_v47, %v1854_v50 }
 0x1bf   :  { %v1857_v7 = vrot.slane %v1856_v19, 4 }
 0x1c1   :  { %v1858_v5 = vadd.f32 %v1857_v7, %v1856_v19 }
 0x1c3   :  { %v1859_v15 = vrot.slane %v1858_v5, 2 }
 0x1c5   :  { %v1860_v35 = vadd.f32 %v1859_v15, %v1858_v5 }
 0x1c7   :  { %v1861_v53 = vrot.slane %v1860_v35, 1 }
 0x1c9   :  { %v1862_v41 = vadd.f32 %v1861_v53, %v1860_v35 }
 0x1cb   :  { %v1863_v58 = vmul.f32 0.0078125, %v1862_v41 }
 0x1cd   :  { %v1864_v44 = vadd.f32 1e-05, %v1863_v58 }
 0x1cf   :  { %4445 = vrsqrt.f32 %v1864_v44 }
 0x1dc   :  { %v4446_v56 = vpop.eup %4445 }
 0x1dd   :  { %v1866_v20 = vmul.f32 %v4446_v56, %v5573_v52  ;;  %v1867_v57 = vmul.f32 %v4446_v56, %v5576_v25  ;;  %v1868_v13 = vmul.f32 %v4446_v56, %v5579_v8  ;;  %v1869_v34 = vmul.f32 %v4446_v56, %v5582_v38 }
 0x1de   :  { %v1870_v22 = vmul.f32 %v4446_v56, %v5585_v0  ;;  %v1871_v36 = vmul.f32 %v4446_v56, %v1799_v2  ;;  %v1872_v31 = vmul.f32 %v4446_v56, %v5588_v46  ;;  %v1873_v24 = vmul.f32 %v4446_v56, %v5591_v37 }
 0x1df   :  { %v1874_v21 = vmul.f32 %v4446_v56, %v5594_v63  ;;  %v1875_v52 = vmul.f32 %v4446_v56, %v1803_v26  ;;  %v1876_v25 = vmul.f32 %v4446_v56, %v5596_v28  ;;  %v1877_v8 = vmul.f32 %v4446_v56, %v5598_v11  ;;  %v3853_v28 = vld [vmem:[%s6364_s4] ss:$0 sm:$0xff] }
 0x1e0   :  { %v1878_v38 = vmul.f32 %v4446_v56, %v5600_v4  ;;  %v1879_v54 = vmul.f32 %v4446_v56, %v1807_v33  ;;  %v1880_v0 = vmul.f32 %v4446_v56, %v5602_v48  ;;  %v1881_v46 = vmul.f32 %v4446_v56, %v5604_v42 }
 0x1e1   :  { %v1889_v2 = vmul.f32 %v3852_v10, %v1866_v20  ;;  %v1890_v37 = vmul.f32 %v3852_v10, %v1867_v57  ;;  %v1891_v59 = vmul.f32 %v3852_v10, %v1868_v13  ;;  %v1892_v27 = vmul.f32 %v3852_v10, %v1869_v34 }
 0x1e2   :  { %v1893_v45 = vmul.f32 %v3852_v10, %v1870_v22  ;;  %v1894_v9 = vmul.f32 %v3852_v10, %v1871_v36  ;;  %v1895_v23 = vmul.f32 %v3852_v10, %v1872_v31  ;;  %v1896_v63 = vmul.f32 %v3852_v10, %v1873_v24  ;;  %v2027_v22 = vld [vmem:[#allocation3 + $0x1] sm:$0xff] }
 0x1e3   :  { %v1897_v11 = vmul.f32 %v3852_v10, %v1874_v21  ;;  %v1898_v26 = vmul.f32 %v3852_v10, %v1875_v52  ;;  %v1899_v4 = vmul.f32 %v3852_v10, %v1876_v25  ;;  %v1900_v60 = vmul.f32 %v3852_v10, %v1877_v8  ;;  %v2002_v36 = vld [vmem:[#allocation3] sm:$0xff] }
 0x1e4   :  { %v1901_v29 = vmul.f32 %v3852_v10, %v1878_v38  ;;  %v1902_v48 = vmul.f32 %v3852_v10, %v1879_v54  ;;  %v1903_v33 = vmul.f32 %v3852_v10, %v1880_v0  ;;  %v1904_v42 = vmul.f32 %v3852_v10, %v1881_v46 }
 0x1e5   :  { %v1912_v62 = vadd.f32 %v3853_v28, %v1889_v2  ;;  %v1913_v1 = vadd.f32 %v3853_v28, %v1890_v37  ;;  %v1914_v49 = vadd.f32 %v3853_v28, %v1891_v59  ;;  %v1915_v40 = vadd.f32 %v3853_v28, %v1892_v27 }
 0x1e6   :  { %v1916_v30 = vadd.f32 %v3853_v28, %v1893_v45  ;;  %v1917_v17 = vadd.f32 %v3853_v28, %v1894_v9  ;;  %v1918_v14 = vadd.f32 %v3853_v28, %v1895_v23  ;;  %v1919_v32 = vadd.f32 %v3853_v28, %v1896_v63  ;;  %v3889_v23 = vld [vmem:[%s6365_s5 + $0x10] sm:$0xf]  ;;  %v3898_v63 = vld [vmem:[%s6365_s5 + $0x14] sm:$0xf] }
 0x1e7   :  { %v1920_v43 = vadd.f32 %v3853_v28, %v1897_v11  ;;  %v1921_v39 = vadd.f32 %v3853_v28, %v1898_v26  ;;  %v1922_v16 = vadd.f32 %v3853_v28, %v1899_v4  ;;  %v1923_v51 = vadd.f32 %v3853_v28, %v1900_v60 }
 0x1e8   :  { %v1924_v55 = vadd.f32 %v3853_v28, %v1901_v29  ;;  %v1925_v61 = vadd.f32 %v3853_v28, %v1902_v48  ;;  %v1926_v18 = vadd.f32 %v3853_v28, %v1903_v33  ;;  %v1927_v12 = vadd.f32 %v3853_v28, %v1904_v42  ;;  %v2035_v28 = vld [vmem:[#allocation3 + $0xa1] sm:$0xff] }
 0x1e9   :  { %v1928_v50 = vmax.f32 %v1912_v62, 0.0  ;;  %v1929_v47 = vmax.f32 %v1913_v1, 0.0  ;;  %v1930_v19 = vmax.f32 %v1914_v49, 0.0  ;;  %v1931_v7 = vmax.f32 %v1915_v40, 0.0  ;;  %v2010_v29 = vld [vmem:[#allocation3 + $0xa0] sm:$0xff] }
 0x1ea   :  { %v1932_v5 = vmax.f32 %v1916_v30, 0.0  ;;  %v1933_v15 = vmax.f32 %v1917_v17, 0.0  ;;  %v1934_v35 = vmax.f32 %v1918_v14, 0.0  ;;  %v1935_v53 = vmax.f32 %v1919_v32, 0.0 }
 0x1eb   :  { %v1936_v41 = vmax.f32 %v1920_v43, 0.0  ;;  %v1937_v58 = vmax.f32 %v1921_v39, 0.0  ;;  %v1938_v44 = vmax.f32 %v1922_v16, 0.0  ;;  %v1939_v56 = vmax.f32 %v1923_v51, 0.0  ;;  %1986 = vst.msk [vmem:[#allocation3 + $0x11] sm:$0xff] %vm1754_vm3, %v1928_v50  ;;  %1987 = vst.msk [vmem:[#allocation3 + $0x21] sm:$0xff] %vm1754_vm3, %v1929_v47 }
 0x1ec   :  { %1988 = vst.msk [vmem:[#allocation3 + $0x31] sm:$0xff] %vm1754_vm3, %v1930_v19  ;;  %1989 = vst.msk [vmem:[#allocation3 + $0x41] sm:$0xff] %vm1754_vm3, %v1931_v7  ;;  %v1940_v20 = vmax.f32 %v1924_v55, 0.0  ;;  %v1941_v57 = vmax.f32 %v1925_v61, 0.0  ;;  %v1942_v13 = vmax.f32 %v1926_v18, 0.0  ;;  %v1943_v34 = vmax.f32 %v1927_v12, 0.0 }
 0x1ed   :  { %1990 = vst.msk [vmem:[#allocation3 + $0x51] sm:$0xff] %vm1754_vm3, %v1932_v5  ;;  %1991 = vst.msk [vmem:[#allocation3 + $0x61] sm:$0xff] %vm1754_vm3, %v1933_v15  ;;  %v2353_v46 = vsel %vm2077_vm5, %v5534_v3, 0  ;;  %v2519_v9 = vsel %vm2077_vm5, %v5568_v6, 0  ;;  %v2302_v19 = vld [vmem:[#allocation3 + $0x2] sm:$0xff] }
 0x1ee   :  { %1992 = vst.msk [vmem:[#allocation3 + $0x71] sm:$0xff] %vm1754_vm3, %v1934_v35  ;;  %1993 = vst.msk [vmem:[#allocation3 + $0x81] sm:$0xff] %vm1754_vm3, %v1935_v53 }
 0x1ef   :  { %1994 = vst.msk [vmem:[#allocation3 + $0xb1] sm:$0xff] %vm1754_vm3, %v1936_v41  ;;  %1995 = vst.msk [vmem:[#allocation3 + $0xc1] sm:$0xff] %vm1754_vm3, %v1937_v58 }
 0x1f0   :  { %1996 = vst.msk [vmem:[#allocation3 + $0xd1] sm:$0xff] %vm1754_vm3, %v1938_v44  ;;  %1997 = vst.msk [vmem:[#allocation3 + $0xe1] sm:$0xff] %vm1754_vm3, %v1939_v56 }
 0x1f1   :  { %1998 = vst.msk [vmem:[#allocation3 + $0xf1] sm:$0xff] %vm1754_vm3, %v1940_v20  ;;  %1999 = vst.msk [vmem:[#allocation3 + $0x101] sm:$0xff] %vm1754_vm3, %v1941_v57 }
 0x1f2   :  { %2000 = vst.msk [vmem:[#allocation3 + $0x111] sm:$0xff] %vm1754_vm3, %v1942_v13  ;;  %2001 = vst.msk [vmem:[#allocation3 + $0x121] sm:$0xff] %vm1754_vm3, %v1943_v34  ;;  %v5685_v31 = vld [vmem:[#allocation3 + $0x11] sm:$0xff]  ;;  %v5689_v10 = vld [vmem:[#allocation3 + $0x21] sm:$0xff]  ;;  %v2685_v13 = vsel %vm2077_vm5, %v3889_v23, 0 }
 0x1f3   :  { %v5687_v24 = vld [vmem:[#allocation3 + $0x10] sm:$0xff]  ;;  %v2043_v21 = vpack.c.bf16 %v5685_v31, %v2027_v22  ;;  %v5695_v8 = vld [vmem:[#allocation3 + $0x20] sm:$0xff]  ;;  %v2851_v22 = vsel %vm2077_vm5, %v3898_v63, 0 }
 0x1f4   :  { %v2018_v52 = vpack.c.bf16 %v5687_v24, %v2002_v36  ;;  %v5693_v25 = vld [vmem:[#allocation3 + $0x31] sm:$0xff]  ;;  %v5709_v2 = vld [vmem:[#allocation3 + $0x41] sm:$0xff]  ;;  %v2484_v53 = vpack.c.bf16 %v5695_v8, %v5687_v24 }
 0x1f5   :  { %v5697_v38 = vld [vmem:[#allocation3 + $0x30] sm:$0xff]  ;;  %v5701_v54 = vpack.c.bf16 %v5693_v25, %v5689_v10  ;;  %v5713_v59 = vld [vmem:[#allocation3 + $0x40] sm:$0xff]  ;;  %4263 = vmatprep.mubr.msk.bf16.mxu1 %vm1754_vm3, %v2043_v21  ;;  %v3907_v24 = vld [vmem:[%s6365_s5 + $0x18] sm:$0xf] }
 0x1f6   :  { %v5705_v0 = vpack.c.bf16 %v5697_v38, %v5695_v8  ;;  %v5711_v37 = vld [vmem:[#allocation3 + $0x51] sm:$0xff]  ;;  %4281 = vmatprep.mubr.msk.bf16.mxu0 %vm1754_vm3, %v2018_v52  ;;  %v5743_v6 = vld [vmem:[#allocation3 + $0x61] sm:$0xff]  ;;  %v2485_v57 = vpack.c.bf16 %v5713_v59, %v5697_v38  ;;  %v3916_v21 = vld [vmem:[%s6365_s5 + $0x1c] sm:$0xf] }
 0x1f7   :  { %v5719_v27 = vpack.c.bf16 %v5711_v37, %v5709_v2  ;;  %v5721_v45 = vld [vmem:[#allocation3 + $0x50] sm:$0xff]  ;;  %4264 = vmatmul.mubr.msk.bf16.vlgmr.msra.gmra.mxu1 %vm1754_vm3, %v5701_v54  ;;  %v2008_v26 = vld [vmem:[#allocation3 + $0x60] sm:$0xff] }
 0x1f8   :  { %4282 = vmatmul.mubr.msk.bf16.vlgmr.msra.gmra.mxu0 %vm1754_vm3, %v5705_v0  ;;  %v5731_v3 = vpack.c.bf16 %v5721_v45, %v5713_v59  ;;  %4298 = vmatpush3.bf16.msra.mxu1 %v2353_v46  ;;  %v5745_v11 = vld [vmem:[#allocation3 + $0x71] sm:$0xff]  ;;  %v5770_v49 = vld [vmem:[#allocation3 + $0xc1] sm:$0xff]  ;;  %v2486_v36 = vpack.c.bf16 %v2008_v26, %v5721_v45 }
 0x1f9   :  { %4267 = vmatprep.mubr.msk.bf16.mxu1 %vm1754_vm3, %v5719_v27  ;;  %4316 = vmatpush3.bf16.msra.mxu0 %v2519_v9  ;;  %v5747_v4 = vld [vmem:[#allocation3 + $0x70] sm:$0xff]  ;;  %v5757_v33 = vpack.c.bf16 %v5745_v11, %v5743_v6  ;;  %v2012_v30 = vld [vmem:[#allocation3 + $0xc0] sm:$0xff] }
 0x1fa   :  { %4285 = vmatprep.mubr.msk.bf16.mxu0 %vm1754_vm3, %v5731_v3  ;;  %4436 = vmatprep.subr.msk.bf16.mxu1 %vm2077_vm5, %v3889_v23  ;;  %v5751_v60 = vld [vmem:[#allocation3 + $0xb1] sm:$0xff]  ;;  %v5760_v42 = vpack.c.bf16 %v5747_v4, %v2008_v26  ;;  %v5776_v14 = vld [vmem:[#allocation3 + $0xe1] sm:$0xff] }
 0x1fb   :  { %4437 = vmatprep.subr.msk.bf16.mxu0 %vm2077_vm5, %v3898_v63  ;;  %v5753_v48 = vld [vmem:[#allocation3 + $0xb0] sm:$0xff]  ;;  %v2047_v62 = vpack.c.bf16 %v5751_v60, %v2035_v28  ;;  %v5780_v43 = vld [vmem:[#allocation3 + $0xe0] sm:$0xff] }
 0x1fc   :  { %v2022_v1 = vpack.c.bf16 %v5753_v48, %v2010_v29  ;;  %v5772_v40 = vld [vmem:[#allocation3 + $0xd1] sm:$0xff]  ;;  %v5807_v18 = vld [vmem:[#allocation3 + $0x101] sm:$0xff]  ;;  %v2488_v63 = vpack.c.bf16 %v2012_v30, %v5753_v48 }
 0x1fd   :  { %v5774_v17 = vld [vmem:[#allocation3 + $0xd0] sm:$0xff]  ;;  %v5786_v16 = vpack.c.bf16 %v5772_v40, %v5770_v49  ;;  %v2016_v50 = vld [vmem:[#allocation3 + $0x100] sm:$0xff] }
 0x1fe   :  { %v5778_v32 = vld [vmem:[#allocation3 + $0xf1] sm:$0xff]  ;;  %v5789_v51 = vpack.c.bf16 %v5774_v17, %v2012_v30  ;;  %v2304_v41 = vld [vmem:[#allocation3 + $0x22] sm:$0xff] }
 0x1ff   :  { %4268 = vmatmul.mubr.msk.bf16.gmra.mxu1 %vm1754_vm3, %v5757_v33  ;;  %v5782_v39 = vld [vmem:[#allocation3 + $0xf0] sm:$0xff]  ;;  %v5793_v55 = vpack.c.bf16 %v5778_v32, %v5776_v14  ;;  %v2306_v44 = vld [vmem:[#allocation3 + $0x42] sm:$0xff] }
 0x200   :  { %4286 = vmatmul.mubr.msk.bf16.gmra.mxu0 %vm1754_vm3, %v5760_v42  ;;  %4271 = vmatprep.mubr.msk.bf16.mxu1 %vm1754_vm3, %v2047_v62  ;;  %v5797_v61 = vpack.c.bf16 %v5782_v39, %v5780_v43  ;;  %v5809_v12 = vld [vmem:[#allocation3 + $0x111] sm:$0xff]  ;;  %v2308_v52 = vld [vmem:[#allocation3 + $0x62] sm:$0xff]  ;;  %v2490_v48 = vpack.c.bf16 %v2016_v50, %v5782_v39 }
 0x201   :  { %4289 = vmatprep.mubr.msk.bf16.mxu0 %vm1754_vm3, %v2022_v1  ;;  %v5811_v47 = vld [vmem:[#allocation3 + $0x110] sm:$0xff]  ;;  %v5817_v5 = vpack.c.bf16 %v5809_v12, %v5807_v18  ;;  %v5855_v38 = vld [vmem:[#allocation3 + $0x80] sm:$0xff] }
 0x202   :  { %v5813_v7 = vld [vmem:[#allocation3 + $0x12] sm:$0xff]  ;;  %v5820_v15 = vpack.c.bf16 %v5811_v47, %v2016_v50  ;;  %v2310_v46 = vld [vmem:[#allocation3 + $0xa2] sm:$0xff]  ;;  %v2487_v9 = vpack.c.bf16 %v5855_v38, %v5747_v4  ;;  %v2489_v4 = vpack.c.bf16 %v5780_v43, %v5774_v17  ;;  %v2650_v43 = vpack.c.bf16 %v5689_v10, %v5685_v31 }
 0x203   :  { %v2318_v35 = vpack.c.bf16 %v5813_v7, %v2302_v19  ;;  %v2305_v58 = vld [vmem:[#allocation3 + $0x32] sm:$0xff]  ;;  %v2312_v28 = vld [vmem:[#allocation3 + $0xc2] sm:$0xff]  ;;  %v2816_v39 = vpack.c.bf16 %v2304_v41, %v5813_v7  ;;  %v2651_v50 = vpack.c.bf16 %v5709_v2, %v5693_v25  ;;  %v2652_v31 = vpack.c.bf16 %v5743_v6, %v5711_v37 }
 0x204   :  { %v5831_v56 = vld [vmem:[#allocation3 + $0x52] sm:$0xff]  ;;  %v5833_v20 = vpack.c.bf16 %v2305_v58, %v2304_v41  ;;  %v2314_v29 = vld [vmem:[#allocation3 + $0xe2] sm:$0xff]  ;;  %v3184_v10 = vsel %vm2077_vm5, %v3916_v21, 0 }
 0x205   :  { %v5839_v34 = vpack.c.bf16 %v5831_v56, %v2306_v44  ;;  %v2309_v8 = vld [vmem:[#allocation3 + $0x72] sm:$0xff]  ;;  %v2316_v30 = vld [vmem:[#allocation3 + $0x102] sm:$0xff]  ;;  %v2818_v7 = vpack.c.bf16 %v2308_v52, %v5831_v56  ;;  %v2655_v56 = vpack.c.bf16 %v5776_v14, %v5772_v40 }
 0x206   :  { %v2311_v59 = vld [vmem:[#allocation3 + $0xb2] sm:$0xff]  ;;  %v5859_v45 = vpack.c.bf16 %v2309_v8, %v2308_v52  ;;  %v3925_v41 = vld [vmem:[%s6365_s5 + $0x20] sm:$0xf] }
 0x207   :  { %4272 = vmatmul.mubr.msk.bf16.gmra.mxu1 %vm1754_vm3, %v5786_v16  ;;  %v2322_v23 = vpack.c.bf16 %v2311_v59, %v2310_v46  ;;  %v2313_v26 = vld [vmem:[#allocation3 + $0xd2] sm:$0xff]  ;;  %v2641_v25 = vld [vmem:[#allocation3 + $0x81] sm:$0xff]  ;;  %v3350_v40 = vsel %vm2077_vm5, %v3925_v41, 0 }
 0x208   :  { %4290 = vmatmul.mubr.msk.bf16.gmra.mxu0 %vm1754_vm3, %v5789_v51  ;;  %4275 = vmatprep.mubr.msk.bf16.mxu1 %vm1754_vm3, %v5793_v55  ;;  %v2315_v62 = vld [vmem:[#allocation3 + $0xf2] sm:$0xff]  ;;  %v5869_v1 = vpack.c.bf16 %v2313_v26, %v2312_v28  ;;  %v2807_v2 = vld [vmem:[#allocation3 + $0x82] sm:$0xff]  ;;  %v2653_v37 = vpack.c.bf16 %v2641_v25, %v5745_v11  ;;  %v2656_v11 = vpack.c.bf16 %v5807_v18, %v5778_v32 }
 0x209   :  { %4293 = vmatprep.mubr.msk.bf16.mxu0 %vm1754_vm3, %v5797_v61  ;;  %v5873_v19 = vpack.c.bf16 %v2315_v62, %v2314_v29  ;;  %v2819_v6 = vpack.c.bf16 %v2807_v2, %v2309_v8  ;;  %v2974_v14 = vld [vmem:[#allocation3 + $0x90] sm:$0xff] }
 0x20a   :  { %v2986_v32 = vpack.c.bf16 %v2974_v14, %v5855_v38 }
 0x20f   :  { %4276 = vmatmul.mubr.msk.bf16.gmra.mxu1 %vm1754_vm3, %v5817_v5 }
 0x210   :  { %4294 = vmatmul.mubr.msk.bf16.gmra.mxu0 %vm1754_vm3, %v5820_v15  ;;  %4299 = vmatprep.mubr.msk.bf16.mxu1 %vm1754_vm3, %v2318_v35  ;;  %v2317_v35 = vld [vmem:[#allocation3 + $0x112] sm:$0xff] }
 0x211   :  { %4317 = vmatprep.mubr.msk.bf16.mxu0 %vm1754_vm3, %v2484_v53  ;;  %v5882_v53 = vld [vmem:[#allocation3 + $0x120] sm:$0xff] }
 0x212   :  { %v2491_v17 = vpack.c.bf16 %v5882_v53, %v5811_v47  ;;  %v3018_v47 = vsel %vm2077_vm5, %v3907_v24, 0 }
 0x217   :  { %4300 = vmatmul.mubr.msk.bf16.vlgmr.msra.gmra.mxu1 %vm1754_vm3, %v5833_v20 }
 0x218   :  { %4318 = vmatmul.mubr.msk.bf16.vlgmr.msra.gmra.mxu0 %vm1754_vm3, %v2485_v57  ;;  %4334 = vmatpush3.bf16.msra.mxu1 %v2685_v13  ;;  %v5884_v57 = vpack.c.bf16 %v2317_v35, %v2316_v30  ;;  %v2817_v13 = vpack.c.bf16 %v2306_v44, %v2305_v58  ;;  %v2654_v58 = vpack.c.bf16 %v5770_v49, %v5751_v60  ;;  %v2649_v60 = vld [vmem:[#allocation3 + $0x121] sm:$0xff] }
 0x219   :  { %4303 = vmatprep.mubr.msk.bf16.mxu1 %vm1754_vm3, %v5839_v34  ;;  %4321 = vmatprep.mubr.msk.bf16.mxu0 %vm1754_vm3, %v2486_v36  ;;  %v2820_v44 = vpack.c.bf16 %v2312_v28, %v2311_v59  ;;  %v2822_v36 = vpack.c.bf16 %v2316_v30, %v2315_v62  ;;  %v2815_v49 = vld [vmem:[#allocation3 + $0x122] sm:$0xff] }
 0x21a   :  { %4352 = vmatpush3.bf16.msra.mxu0 %v2851_v22  ;;  %4438 = vmatprep.subr.msk.bf16.mxu1 %vm2077_vm5, %v3907_v24  ;;  %v2821_v22 = vpack.c.bf16 %v2314_v29, %v2313_v26  ;;  %v2657_v24 = vpack.c.bf16 %v2649_v60, %v5809_v12 }
 0x21b   :  { %4439 = vmatprep.subr.msk.bf16.mxu0 %vm2077_vm5, %v3916_v21  ;;  %v2823_v21 = vpack.c.bf16 %v2815_v49, %v2317_v35 }
 0x21f   :  { %4304 = vmatmul.mubr.msk.bf16.gmra.mxu1 %vm1754_vm3, %v5859_v45 }
 0x220   :  { %4322 = vmatmul.mubr.msk.bf16.gmra.mxu0 %vm1754_vm3, %v2487_v9  ;;  %4307 = vmatprep.mubr.msk.bf16.mxu1 %vm1754_vm3, %v2322_v23 }
 0x221   :  { %4325 = vmatprep.mubr.msk.bf16.mxu0 %vm1754_vm3, %v2488_v63 }
 0x227   :  { %4308 = vmatmul.mubr.msk.bf16.gmra.mxu1 %vm1754_vm3, %v5869_v1 }
 0x228   :  { %4326 = vmatmul.mubr.msk.bf16.gmra.mxu0 %vm1754_vm3, %v2489_v4  ;;  %4311 = vmatprep.mubr.msk.bf16.mxu1 %vm1754_vm3, %v5873_v19 }
 0x229   :  { %4329 = vmatprep.mubr.msk.bf16.mxu0 %vm1754_vm3, %v2490_v48 }
 0x22f   :  { %4312 = vmatmul.mubr.msk.bf16.gmra.mxu1 %vm1754_vm3, %v5884_v57 }
 0x230   :  { %4330 = vmatmul.mubr.msk.bf16.gmra.mxu0 %vm1754_vm3, %v2491_v17  ;;  %4335 = vmatprep.mubr.msk.bf16.mxu1 %vm1754_vm3, %v2650_v43 }
 0x231   :  { %4353 = vmatprep.mubr.msk.bf16.mxu0 %vm1754_vm3, %v2816_v39 }
 0x237   :  { %4336 = vmatmul.mubr.msk.bf16.vlgmr.msra.gmra.mxu1 %vm1754_vm3, %v2651_v50 }
 0x238   :  { %4354 = vmatmul.mubr.msk.bf16.vlgmr.msra.gmra.mxu0 %vm1754_vm3, %v2817_v13  ;;  %4370 = vmatpush3.bf16.msra.mxu1 %v3018_v47 }
 0x239   :  { %4339 = vmatprep.mubr.msk.bf16.mxu1 %vm1754_vm3, %v2652_v31  ;;  %4357 = vmatprep.mubr.msk.bf16.mxu0 %vm1754_vm3, %v2818_v7 }
 0x23a   :  { %4388 = vmatpush3.bf16.msra.mxu0 %v3184_v10  ;;  %4440 = vmatprep.subr.msk.bf16.mxu1 %vm2077_vm5, %v3925_v41 }
 0x23f   :  { %4340 = vmatmul.mubr.msk.bf16.gmra.mxu1 %vm1754_vm3, %v2653_v37 }
 0x240   :  { %4358 = vmatmul.mubr.msk.bf16.gmra.mxu0 %vm1754_vm3, %v2819_v6  ;;  %4343 = vmatprep.mubr.msk.bf16.mxu1 %vm1754_vm3, %v2654_v58 }
 0x241   :  { %4361 = vmatprep.mubr.msk.bf16.mxu0 %vm1754_vm3, %v2820_v44 }
 0x247   :  { %4344 = vmatmul.mubr.msk.bf16.gmra.mxu1 %vm1754_vm3, %v2655_v56 }
 0x248   :  { %4362 = vmatmul.mubr.msk.bf16.gmra.mxu0 %vm1754_vm3, %v2821_v22  ;;  %4347 = vmatprep.mubr.msk.bf16.mxu1 %vm1754_vm3, %v2656_v11 }
 0x249   :  { %4365 = vmatprep.mubr.msk.bf16.mxu0 %vm1754_vm3, %v2822_v36 }
 0x24f   :  { %4348 = vmatmul.mubr.msk.bf16.gmra.mxu1 %vm1754_vm3, %v2657_v24 }
 0x250   :  { %4366 = vmatmul.mubr.msk.bf16.gmra.mxu0 %vm1754_vm3, %v2823_v21  ;;  %4371 = vmatprep.mubr.msk.bf16.mxu1 %vm1754_vm3, %v5705_v0  ;;  %v3140_v0 = vld [vmem:[#allocation3 + $0x91] sm:$0xff] }
 0x251   :  { %4389 = vmatprep.mubr.msk.bf16.mxu0 %vm1754_vm3, %v5701_v54  ;;  %v3152_v54 = vpack.c.bf16 %v3140_v0, %v2641_v25 }
 0x257   :  { %4372 = vmatmul.mubr.msk.bf16.vlgmr.msra.gmra.mxu1 %vm1754_vm3, %v5731_v3  ;;  %v3148_v3 = vld [vmem:[#allocation3 + $0x131] sm:$0xff] }
 0x258   :  { %4390 = vmatmul.mubr.msk.bf16.vlgmr.msra.gmra.mxu0 %vm1754_vm3, %v5719_v27  ;;  %4406 = vmatpush3.bf16.msra.mxu1 %v3350_v40  ;;  %v2982_v27 = vld [vmem:[#allocation3 + $0x130] sm:$0xff] }
 0x259   :  { %4375 = vmatprep.mubr.msk.bf16.mxu1 %vm1754_vm3, %v5760_v42  ;;  %4393 = vmatprep.mubr.msk.bf16.mxu0 %vm1754_vm3, %v5757_v33  ;;  %v2990_v33 = vpack.c.bf16 %v2982_v27, %v5882_v53  ;;  %v3156_v42 = vpack.c.bf16 %v3148_v3, %v2649_v60 }
 0x25f   :  { %4376 = vmatmul.mubr.msk.bf16.gmra.mxu1 %vm1754_vm3, %v2986_v32 }
 0x260   :  { %4394 = vmatmul.mubr.msk.bf16.gmra.mxu0 %vm1754_vm3, %v3152_v54  ;;  %4379 = vmatprep.mubr.msk.bf16.mxu1 %vm1754_vm3, %v5789_v51 }
 0x261   :  { %4397 = vmatprep.mubr.msk.bf16.mxu0 %vm1754_vm3, %v5786_v16  ;;  %v3306_v16 = vld [vmem:[#allocation3 + $0x92] sm:$0xff] }
 0x262   :  { %v3318_v51 = vpack.c.bf16 %v3306_v16, %v2807_v2 }
 0x267   :  { %4380 = vmatmul.mubr.msk.bf16.gmra.mxu1 %vm1754_vm3, %v5797_v61 }
 0x268   :  { %4398 = vmatmul.mubr.msk.bf16.gmra.mxu0 %vm1754_vm3, %v5793_v55  ;;  %4383 = vmatprep.mubr.msk.bf16.mxu1 %vm1754_vm3, %v5820_v15  ;;  %v3314_v55 = vld [vmem:[#allocation3 + $0x132] sm:$0xff] }
 0x269   :  { %4401 = vmatprep.mubr.msk.bf16.mxu0 %vm1754_vm3, %v5817_v5  ;;  %v3322_v61 = vpack.c.bf16 %v3314_v55, %v2815_v49 }
 0x26f   :  { %4384 = vmatmul.mubr.msk.bf16.gmra.mxu1 %vm1754_vm3, %v2990_v33 }
 0x270   :  { %4402 = vmatmul.mubr.msk.bf16.gmra.mxu0 %vm1754_vm3, %v3156_v42  ;;  %4407 = vmatprep.mubr.msk.bf16.mxu1 %vm1754_vm3, %v5833_v20 }
 0x277   :  { %4408 = vmatmul.mubr.msk.bf16.vlgmr.msra.gmra.mxu1 %vm1754_vm3, %v5839_v34 }
 0x278   :  { %4411 = vmatprep.mubr.msk.bf16.mxu1 %vm1754_vm3, %v5859_v45 }
 0x27f   :  { %4412 = vmatmul.mubr.msk.bf16.gmra.mxu1 %vm1754_vm3, %v3318_v51 }
 0x280   :  { %4415 = vmatprep.mubr.msk.bf16.mxu1 %vm1754_vm3, %v5869_v1 }
 0x287   :  { %4416 = vmatmul.mubr.msk.bf16.gmra.mxu1 %vm1754_vm3, %v5873_v19 }
 0x288   :  { %4419 = vmatprep.mubr.msk.bf16.mxu1 %vm1754_vm3, %v5884_v57 }
 0x28f   :  { %4420 = vmatmul.mubr.msk.bf16.gmra.mxu1 %vm1754_vm3, %v3322_v61 }
 0x2b7   :  { %v4265_v18 = vpop.f32.mrf.mxu1 }
 0x2b8   :  { %v4283_v12 = vpop.f32.mrf.mxu0 }
 0x2b9   :  { %v2248_v5 = vadd.f32 %v4283_v12, %v4265_v18  ;;  %v2115_v15 = vpop.f32.mrf.mxu1 }
 0x2ba   :  { %v2239_v20 = vpop.f32.mrf.mxu0 }
 0x2bb   :  { %v2240_v34 = vadd.f32 %v2239_v20, %v2115_v15  ;;  %v4266_v52 = vpop.f32.mrf.mxu1 }
 0x2bc   :  { %v4284_v8 = vpop.f32.mrf.mxu0 }
 0x2bd   :  { %v2251_v38 = vadd.f32 %v4284_v8, %v4266_v52  ;;  %v2118_v46 = vpop.f32.mrf.mxu1 }
 0x2be   :  { %v2242_v59 = vpop.f32.mrf.mxu0 }
 0x2bf   :  { %v2243_v45 = vadd.f32 %v2242_v59, %v2118_v46  ;;  %v4269_v9 = vpop.f32.mrf.mxu1 }
 0x2c0   :  { %v4287_v23 = vpop.f32.mrf.mxu0 }
 0x2c1   :  { %v2264_v63 = vadd.f32 %v4287_v23, %v4269_v9  ;;  %v2131_v28 = vpop.f32.mrf.mxu1 }
 0x2c2   :  { %v2255_v26 = vpop.f32.mrf.mxu0 }
 0x2c3   :  { %v2256_v29 = vadd.f32 %v2255_v26, %v2131_v28  ;;  %v4270_v62 = vpop.f32.mrf.mxu1 }
 0x2c4   :  { %v4288_v1 = vpop.f32.mrf.mxu0 }
 0x2c5   :  { %v2267_v4 = vadd.f32 %v4288_v1, %v4270_v62  ;;  %v2134_v19 = vpop.f32.mrf.mxu1 }
 0x2c6   :  { %v2258_v48 = vpop.f32.mrf.mxu0 }
 0x2c7   :  { %v2259_v30 = vadd.f32 %v2258_v48, %v2134_v19  ;;  %v4273_v35 = vpop.f32.mrf.mxu1 }
 0x2c8   :  { %v4291_v53 = vpop.f32.mrf.mxu0 }
 0x2c9   :  { %v2280_v57 = vadd.f32 %v4291_v53, %v4273_v35  ;;  %v2147_v17 = vpop.f32.mrf.mxu1 }
 0x2ca   :  { %v2271_v43 = vpop.f32.mrf.mxu0 }
 0x2cb   :  { %v2272_v39 = vadd.f32 %v2271_v43, %v2147_v17  ;;  %v4274_v50 = vpop.f32.mrf.mxu1 }
 0x2cc   :  { %v4292_v13 = vpop.f32.mrf.mxu0 }
 0x2cd   :  { %v2283_v47 = vadd.f32 %v4292_v13, %v4274_v50  ;;  %v2150_v31 = vpop.f32.mrf.mxu1 }
 0x2ce   :  { %v2274_v10 = vpop.f32.mrf.mxu0 }
 0x2cf   :  { %v2275_v7 = vadd.f32 %v2274_v10, %v2150_v31  ;;  %v4277_v41 = vpop.f32.mrf.mxu1 }
 0x2d0   :  { %v4295_v25 = vpop.f32.mrf.mxu0 }
 0x2d1   :  { %v2296_v2 = vadd.f32 %v4295_v25, %v4277_v41  ;;  %v2163_v37 = vpop.f32.mrf.mxu1 }
 0x2d2   :  { %v2287_v6 = vpop.f32.mrf.mxu0 }
 0x2d3   :  { %v2288_v58 = vadd.f32 %v2287_v6, %v2163_v37  ;;  %v4278_v44 = vpop.f32.mrf.mxu1 }
 0x2d4   :  { %v4296_v56 = vpop.f32.mrf.mxu0 }
 0x2d5   :  { %v2299_v22 = vadd.f32 %v4296_v56, %v4278_v44  ;;  %v2166_v11 = vpop.f32.mrf.mxu1 }
 0x2d6   :  { %v2290_v36 = vpop.f32.mrf.mxu0 }
 0x2d7   :  { %v2291_v60 = vadd.f32 %v2290_v36, %v2166_v11  ;;  %v4301_v49 = vpop.f32.mrf.mxu1 }
 0x2d8   :  { %v4319_v24 = vpop.f32.mrf.mxu0  ;;  %v2454_v21 = vadd.f32 %v4301_v49, %v2248_v5 }
 0x2d9   :  { %v2389_v40 = vpop.f32.mrf.mxu1 }
 0x2da   :  { %v5974_v14 = vpop.f32.mrf.mxu0  ;;  %v2620_v0 = vadd.f32 %v4319_v24, %v2454_v21  ;;  %v5976_v32 = vadd.f32 %v2389_v40, %v2240_v34 }
 0x2db   :  { %v4302_v54 = vpop.f32.mrf.mxu1 }
 0x2dc   :  { %v5978_v27 = vpop.f32.mrf.mxu0  ;;  %v5980_v3 = vadd.f32 %v4302_v54, %v2251_v38 }
 0x2dd   :  { %v2392_v33 = vpop.f32.mrf.mxu1 }
 0x2de   :  { %v5982_v42 = vpop.f32.mrf.mxu0  ;;  %v5984_v16 = vadd.f32 %v2392_v33, %v2243_v45 }
 0x2df   :  { %v4305_v51 = vpop.f32.mrf.mxu1 }
 0x2e0   :  { %v4323_v55 = vpop.f32.mrf.mxu0  ;;  %v2458_v61 = vadd.f32 %v4305_v51, %v2264_v63 }
 0x2e1   :  { %v2405_v18 = vpop.f32.mrf.mxu1 }
 0x2e2   :  { %v5986_v12 = vpop.f32.mrf.mxu0  ;;  %v2624_v5 = vadd.f32 %v4323_v55, %v2458_v61  ;;  %v5988_v15 = vadd.f32 %v2405_v18, %v2256_v29 }
 0x2e3   :  { %v4306_v20 = vpop.f32.mrf.mxu1 }
 0x2e4   :  { %v5990_v34 = vpop.f32.mrf.mxu0  ;;  %v5992_v52 = vadd.f32 %v4306_v20, %v2267_v4 }
 0x2e5   :  { %v2408_v8 = vpop.f32.mrf.mxu1 }
 0x2e6   :  { %v5994_v38 = vpop.f32.mrf.mxu0  ;;  %v5996_v46 = vadd.f32 %v2408_v8, %v2259_v30 }
 0x2e7   :  { %v4309_v59 = vpop.f32.mrf.mxu1 }
 0x2e8   :  { %v4327_v45 = vpop.f32.mrf.mxu0  ;;  %v2462_v9 = vadd.f32 %v4309_v59, %v2280_v57 }
 0x2e9   :  { %v2421_v23 = vpop.f32.mrf.mxu1 }
 0x2ea   :  { %v5998_v63 = vpop.f32.mrf.mxu0  ;;  %v2628_v28 = vadd.f32 %v4327_v45, %v2462_v9  ;;  %v6000_v26 = vadd.f32 %v2421_v23, %v2272_v39 }
 0x2eb   :  { %v4310_v29 = vpop.f32.mrf.mxu1 }
 0x2ec   :  { %v6002_v62 = vpop.f32.mrf.mxu0  ;;  %v6004_v1 = vadd.f32 %v4310_v29, %v2283_v47 }
 0x2ed   :  { %v2424_v4 = vpop.f32.mrf.mxu1 }
 0x2ee   :  { %v6006_v19 = vpop.f32.mrf.mxu0  ;;  %v6008_v48 = vadd.f32 %v2424_v4, %v2275_v7 }
 0x2ef   :  { %v4313_v30 = vpop.f32.mrf.mxu1 }
 0x2f0   :  { %v4331_v35 = vpop.f32.mrf.mxu0  ;;  %v2466_v53 = vadd.f32 %v4313_v30, %v2296_v2 }
 0x2f1   :  { %v2437_v57 = vpop.f32.mrf.mxu1 }
 0x2f2   :  { %v6010_v17 = vpop.f32.mrf.mxu0  ;;  %v2632_v43 = vadd.f32 %v4331_v35, %v2466_v53  ;;  %v6012_v50 = vadd.f32 %v2437_v57, %v2288_v58 }
 0x2f3   :  { %v4314_v39 = vpop.f32.mrf.mxu1 }
 0x2f4   :  { %v6014_v13 = vpop.f32.mrf.mxu0  ;;  %v6016_v31 = vadd.f32 %v4314_v39, %v2299_v22 }
 0x2f5   :  { %v2440_v47 = vpop.f32.mrf.mxu1 }
 0x2f6   :  { %v6018_v10 = vpop.f32.mrf.mxu0  ;;  %v6020_v41 = vadd.f32 %v2440_v47, %v2291_v60 }
 0x2f7   :  { %6425 = vst [vmem:[#allocation14_spill] sm:$0xff] %v6018_v10  ;;  %v4337_v7 = vpop.f32.mrf.mxu1 }
 0x2f8   :  { %6426 = vst [vmem:[#allocation16_spill] sm:$0xff] %v6020_v41  ;;  %v6022_v25 = vpop.f32.mrf.mxu0  ;;  %v6024_v2 = vadd.f32 %v4337_v7, %v2620_v0 }
 0x2f9   :  { %v2721_v37 = vpop.f32.mrf.mxu1 }
 0x2fa   :  { %v2887_v6 = vpop.f32.mrf.mxu0 }
 0x2fb   :  { %v4338_v44 = vpop.f32.mrf.mxu1 }
 0x2fc   :  { %v6026_v58 = vpop.f32.mrf.mxu0 }
 0x2fd   :  { %v2724_v56 = vpop.f32.mrf.mxu1 }
 0x2fe   :  { %v6028_v11 = vpop.f32.mrf.mxu0 }
 0x2ff   :  { %v4341_v22 = vpop.f32.mrf.mxu1 }
 0x300   :  { %v6030_v36 = vpop.f32.mrf.mxu0  ;;  %v6032_v49 = vadd.f32 %v4341_v22, %v2624_v5 }
 0x301   :  { %v2737_v60 = vpop.f32.mrf.mxu1 }
 0x302   :  { %v6034_v24 = vpop.f32.mrf.mxu0 }
 0x303   :  { %v6036_v21 = vpop.f32.mrf.mxu1 }
 0x304   :  { %v6038_v40 = vpop.f32.mrf.mxu0 }
 0x305   :  { %v6040_v0 = vpop.f32.mrf.mxu1 }
 0x306   :  { %v6042_v54 = vpop.f32.mrf.mxu0 }
 0x307   :  { %v4345_v33 = vpop.f32.mrf.mxu1 }
 0x308   :  { %v6044_v51 = vpop.f32.mrf.mxu0  ;;  %v6046_v55 = vadd.f32 %v4345_v33, %v2628_v28 }
 0x309   :  { %6427 = vst [vmem:[#allocation26_spill] sm:$0xff] %v6044_v51  ;;  %v6048_v61 = vpop.f32.mrf.mxu1 }
 0x30a   :  { %6428 = vst [vmem:[#allocation10_spill] sm:$0xff] %v6046_v55  ;;  %v6050_v18 = vpop.f32.mrf.mxu0 }
 0x30b   :  { %6429 = vst [vmem:[#allocation7_spill] sm:$0xff] %v6050_v18  ;;  %v6052_v5 = vpop.f32.mrf.mxu1 }
 0x30c   :  { %6430 = vst [vmem:[#allocation8_spill] sm:$0xff] %v6052_v5  ;;  %v6054_v20 = vpop.f32.mrf.mxu0 }
 0x30d   :  { %6431 = vst [vmem:[#allocation9_spill] sm:$0xff] %v6054_v20  ;;  %v6056_v8 = vpop.f32.mrf.mxu1 }
 0x30e   :  { %6432 = vst [vmem:[#allocation11_spill] sm:$0xff] %v6056_v8  ;;  %v6058_v59 = vpop.f32.mrf.mxu0 }
 0x30f   :  { %6433 = vst [vmem:[#allocation12_spill] sm:$0xff] %v6058_v59  ;;  %v4349_v45 = vpop.f32.mrf.mxu1 }
 0x310   :  { %v6060_v9 = vpop.f32.mrf.mxu0  ;;  %v6062_v23 = vadd.f32 %v4349_v45, %v2632_v43 }
 0x311   :  { %6434 = vst [vmem:[#allocation27_spill] sm:$0xff] %v6060_v9  ;;  %v6064_v29 = vpop.f32.mrf.mxu1 }
 0x312   :  { %6435 = vst [vmem:[#allocation31_spill] sm:$0xff] %v6062_v23  ;;  %6436 = vst [vmem:[#allocation29_spill] sm:$0xff] %v6064_v29  ;;  %v6066_v28 = vpop.f32.mrf.mxu0  ;;  %v2618_v29 = vadd.f32 %v5974_v14, %v5976_v32  ;;  %v2622_v32 = vadd.f32 %v5986_v12, %v5988_v15  ;;  %v2623_v12 = vadd.f32 %v5994_v38, %v5996_v46 }
 0x313   :  { %6437 = vst [vmem:[#allocation13_spill] sm:$0xff] %v6066_v28  ;;  %v6068_v4 = vpop.f32.mrf.mxu1 }
 0x314   :  { %6438 = vst [vmem:[#allocation15_spill] sm:$0xff] %v6068_v4  ;;  %v6070_v30 = vpop.f32.mrf.mxu0  ;;  %v2784_v20 = vadd.f32 %v2721_v37, %v2618_v29  ;;  %v2952_v37 = vadd.f32 %v6022_v25, %v6024_v2 }
 0x315   :  { %6439 = vst [vmem:[#allocation17_spill] sm:$0xff] %v6070_v30  ;;  %v6072_v35 = vpop.f32.mrf.mxu1 }
 0x316   :  { %6440 = vst [vmem:[#allocation28_spill] sm:$0xff] %v6072_v35  ;;  %v6074_v53 = vpop.f32.mrf.mxu0  ;;  %v2950_v8 = vadd.f32 %v2887_v6, %v2784_v20 }
 0x317   :  { %6441 = vst [vmem:[#allocation32_spill] sm:$0xff] %v6074_v53  ;;  %v4373_v57 = vpop.f32.mrf.mxu1 }
 0x318   :  { %v4391_v39 = vpop.f32.mrf.mxu0  ;;  %v3119_v6 = vadd.f32 %v4373_v57, %v2952_v37 }
 0x319   :  { %v3054_v47 = vpop.f32.mrf.mxu1 }
 0x31a   :  { %v3220_v7 = vpop.f32.mrf.mxu0  ;;  %v3117_v29 = vadd.f32 %v3054_v47, %v2950_v8 }
 0x31b   :  { %v4374_v22 = vpop.f32.mrf.mxu1 }
 0x31c   :  { %v4392_v43 = vpop.f32.mrf.mxu0  ;;  %v3283_v15 = vadd.f32 %v3220_v7, %v3117_v29 }
 0x31d   :  { %v3057_v33 = vpop.f32.mrf.mxu1 }
 0x31e   :  { %v3223_v23 = vpop.f32.mrf.mxu0 }
 0x31f   :  { %v4377_v45 = vpop.f32.mrf.mxu1 }
 0x320   :  { %v6078_v4 = vpop.f32.mrf.mxu0 }
 0x321   :  { %v3070_v9 = vpop.f32.mrf.mxu1  ;;  %6442 = vst [vmem:[#allocation20_spill] sm:$0xff] %v6078_v4  ;;  %v2621_v4 = vadd.f32 %v5978_v27, %v5980_v3 }
 0x322   :  { %v3236_v53 = vpop.f32.mrf.mxu0 }
 0x323   :  { %v4378_v10 = vpop.f32.mrf.mxu1 }
 0x324   :  { %v6090_v51 = vpop.f32.mrf.mxu0 }
 0x325   :  { %v6076_v28 = vpop.f32.mrf.mxu1 }
 0x326   :  { %v6100_v18 = vpop.f32.mrf.mxu0 }
 0x327   :  { %v6080_v30 = vpop.f32.mrf.mxu1 }
 0x328   :  { %6443 = vst [vmem:[#allocation30_spill] sm:$0xff] %v6080_v30  ;;  %v2619_v30 = vadd.f32 %v5982_v42, %v5984_v16  ;;  %v2788_v16 = vadd.f32 %v2737_v60, %v2622_v32  ;;  %v6446_v32 = vld [vmem:[#allocation7_spill] sm:$0xff]  ;;  %v6449_v29 = vld [vmem:[#allocation20_spill] sm:$0xff] }
 0x329   :  { %v6082_v35 = vpop.f32.mrf.mxu1 }
 0x32a   :  { %6444 = vst [vmem:[#allocation22_spill] sm:$0xff] %v6082_v35  ;;  %v2785_v5 = vadd.f32 %v2724_v56, %v2619_v30  ;;  %v6114_v56 = vpop.f32.mrf.mxu0 }
 0x32b   :  { %v6084_v41 = vpop.f32.mrf.mxu1 }
 0x32c   :  { %6445 = vst [vmem:[#allocation21_spill] sm:$0xff] %v6084_v41  ;;  %v2787_v41 = vadd.f32 %v4338_v44, %v2621_v4  ;;  %v2951_v42 = vadd.f32 %v6028_v11, %v2785_v5  ;;  %v2625_v44 = vadd.f32 %v5990_v34, %v5992_v52  ;;  %v3285_v11 = vadd.f32 %v4391_v39, %v3119_v6  ;;  %v3252_v5 = vpop.f32.mrf.mxu0 }
 0x32d   :  { %v6088_v59 = vpop.f32.mrf.mxu1  ;;  %v2626_v34 = vadd.f32 %v5998_v63, %v6000_v26  ;;  %v2956_v52 = vadd.f32 %v6030_v36, %v6032_v49  ;;  %v6132_v63 = vld [vmem:[%s6366_s6] ss:$0 sm:$0xff] }
 0x32e   :  { %v2953_v3 = vadd.f32 %v6026_v58, %v2787_v41  ;;  %v3118_v2 = vadd.f32 %v3057_v33, %v2951_v42  ;;  %v2791_v8 = vadd.f32 %v6036_v21, %v2625_v44  ;;  %v2954_v41 = vadd.f32 %v6034_v24, %v2788_v16  ;;  %v4400_v7 = vpop.f32.mrf.mxu0  ;;  %v6450_v42 = vld [vmem:[#allocation10_spill] sm:$0xff] }
 0x32f   :  { %v6092_v55 = vpop.f32.mrf.mxu1  ;;  %v2789_v58 = vadd.f32 %v6040_v0, %v2623_v12  ;;  %v2629_v21 = vadd.f32 %v6002_v62, %v6004_v1  ;;  %v2792_v0 = vadd.f32 %v6048_v61, %v2626_v34  ;;  %v3123_v39 = vadd.f32 %v4377_v45, %v2956_v52  ;;  %v6451_v16 = vld [vmem:[#allocation26_spill] sm:$0xff]  ;;  %v6454_v34 = vld [vmem:[#allocation12_spill] sm:$0xff] }
 0x330   :  { %v3120_v25 = vadd.f32 %v4374_v22, %v2953_v3  ;;  %v3284_v30 = vadd.f32 %v3223_v23, %v3118_v2  ;;  %v3121_v57 = vadd.f32 %v3070_v9, %v2954_v41  ;;  %v2957_v24 = vadd.f32 %v6038_v40, %v2791_v8 }
 0x331   :  { %v6098_v35 = vpop.f32.mrf.mxu1  ;;  %v2955_v36 = vadd.f32 %v6042_v54, %v2789_v58  ;;  %v2627_v62 = vadd.f32 %v6006_v19, %v6008_v48  ;;  %v2630_v1 = vadd.f32 %v6010_v17, %v6012_v50  ;;  %v2633_v40 = vadd.f32 %v6014_v13, %v6016_v31  ;;  %v6447_v48 = vld [vmem:[#allocation8_spill] sm:$0xff]  ;;  %v6448_v17 = vld [vmem:[#allocation11_spill] sm:$0xff] }
 0x332   :  { %v3286_v46 = vadd.f32 %v4392_v43, %v3120_v25  ;;  %v3124_v61 = vadd.f32 %v4378_v10, %v2957_v24  ;;  %v3287_v33 = vadd.f32 %v3236_v53, %v3121_v57  ;;  %v2958_v19 = vadd.f32 %v6446_v32, %v2792_v0  ;;  %v6456_v57 = vld [vmem:[#allocation30_spill] sm:$0xff]  ;;  %v6457_v0 = vld [vmem:[#allocation16_spill] sm:$0xff] }
 0x333   :  { %v6102_v14 = vpop.f32.mrf.mxu1  ;;  %v3122_v54 = vadd.f32 %v6076_v28, %v2955_v36  ;;  %v2795_v37 = vadd.f32 %v6447_v48, %v2629_v21  ;;  %v2793_v50 = vadd.f32 %v6448_v17, %v2627_v62  ;;  %v3289_v13 = vadd.f32 %v6449_v29, %v3123_v39  ;;  %v6458_v39 = vld [vmem:[#allocation14_spill] sm:$0xff]  ;;  %v6462_v17 = vld [vmem:[#allocation28_spill] sm:$0xff] }
 0x334   :  { %v2960_v6 = vadd.f32 %v6451_v16, %v6450_v42  ;;  %v3290_v44 = vadd.f32 %v6090_v51, %v3124_v61  ;;  %v6464_v42 = vld [vmem:[#allocation27_spill] sm:$0xff] }
 0x335   :  { %v6108_v27 = vpop.f32.mrf.mxu1  ;;  %v3288_v8 = vadd.f32 %v6100_v18, %v3122_v54  ;;  %v2959_v52 = vadd.f32 %v6454_v34, %v2793_v50 }
 0x337   :  { %v4409_v20 = vpop.f32.mrf.mxu1 }
 0x338   :  { %v3451_v47 = vadd.f32 %v4409_v20, %v3285_v11  ;;  %v6452_v20 = vld [vmem:[#allocation22_spill] sm:$0xff]  ;;  %v6453_v11 = vld [vmem:[#allocation9_spill] sm:$0xff] }
 0x339   :  { %v3386_v4 = vpop.f32.mrf.mxu1  ;;  %v3125_v12 = vadd.f32 %v6452_v20, %v2958_v19  ;;  %v6460_v19 = vld [vmem:[#allocation13_spill] sm:$0xff] }
 0x33a   :  { %v3449_v60 = vadd.f32 %v3386_v4, %v3283_v15  ;;  %v6146_v43 = vadd.f32 %v6132_v63, %v3451_v47  ;;  %v3255_v15 = vpop.f32.mrf.mxu0  ;;  %v3127_v47 = vadd.f32 %v6456_v57, %v2960_v6 }
 0x33b   :  { %v4410_v38 = vpop.f32.mrf.mxu1  ;;  %v3291_v36 = vadd.f32 %v3252_v5, %v3125_v12 }
 0x33c   :  { %v6136_v49 = vadd.f32 %v6132_v63, %v3449_v60  ;;  %v3452_v9 = vadd.f32 %v4410_v38, %v3286_v46  ;;  %v3491_v4 = vsel %vm1754_vm3, %v6146_v43, 0.0  ;;  %v2961_v60 = vadd.f32 %v6453_v11, %v2795_v37  ;;  %v6455_v38 = vld [vmem:[#allocation29_spill] sm:$0xff]  ;;  %v4403_v62 = vpop.f32.mrf.mxu0  ;;  %v6461_v37 = vld [vmem:[#allocation15_spill] sm:$0xff]  ;;  %v6466_v11 = vld [vmem:[#allocation32_spill] sm:$0xff] }
 0x33d   :  { %v3389_v26 = vpop.f32.mrf.mxu1  ;;  %v2796_v51 = vadd.f32 %v6455_v38, %v2630_v1  ;;  %v3126_v1 = vadd.f32 %v6088_v59, %v2959_v52  ;;  %v2799_v5 = vadd.f32 %v6461_v37, %v2633_v40 }
 0x33e   :  { %v3450_v23 = vadd.f32 %v3389_v26, %v3284_v30  ;;  %v3488_v10 = vsel %vm1754_vm3, %v6136_v49, 0.0  ;;  %v6158_v28 = vadd.f32 %v6132_v63, %v3452_v9  ;;  %v2631_v26 = vadd.f32 %v6458_v39, %v6457_v0  ;;  %v6459_v9 = vld [vmem:[#allocation21_spill] sm:$0xff]  ;;  %v3268_v40 = vpop.f32.mrf.mxu0 }
 0x33f   :  { %v4413_v22 = vpop.f32.mrf.mxu1  ;;  %v2962_v48 = vadd.f32 %v6460_v19, %v2796_v51 }
 0x340   :  { %v6149_v45 = vadd.f32 %v6132_v63, %v3450_v23  ;;  %v3455_v41 = vadd.f32 %v4413_v22, %v3289_v13  ;;  %v3493_v18 = vsel %vm1754_vm3, %v6158_v28, 0.0  ;;  %v3128_v23 = vadd.f32 %v6459_v9, %v2961_v60 }
 0x341   :  { %v3402_v31 = vpop.f32.mrf.mxu1  ;;  %v2797_v50 = vadd.f32 %v6462_v17, %v2631_v26 }
 0x342   :  { %v3489_v53 = vsel %vm1754_vm3, %v6149_v45, 0.0  ;;  %v3453_v3 = vadd.f32 %v3402_v31, %v3287_v33  ;;  %v6183_v33 = vadd.f32 %v6132_v63, %v3455_v41  ;;  %v3293_v31 = vadd.f32 %v6114_v56, %v3127_v47 }
 0x343   :  { %v3490_v25 = vadd.f32 %v3489_v53, %v3488_v10  ;;  %v4414_v2 = vpop.f32.mrf.mxu1  ;;  %v3294_v6 = vadd.f32 %v4400_v7, %v3128_v23  ;;  %v2963_v60 = vadd.f32 %v6466_v11, %v2797_v50 }
 0x344   :  { %v6170_v58 = vadd.f32 %v6132_v63, %v3453_v3  ;;  %v3456_v21 = vadd.f32 %v4414_v2, %v3290_v44  ;;  %v6463_v3 = vld [vmem:[#allocation31_spill] sm:$0xff]  ;;  %v3129_v44 = vadd.f32 %v6098_v35, %v2962_v48  ;;  %v3499_v56 = vsel %vm1754_vm3, %v6183_v33, 0.0 }
 0x345   :  { %v3492_v46 = vadd.f32 %v3491_v4, %v3490_v25  ;;  %v3405_v30 = vpop.f32.mrf.mxu1  ;;  %v2964_v16 = vadd.f32 %v6464_v42, %v6463_v3  ;;  %v3292_v25 = vadd.f32 %v3255_v15, %v3126_v1  ;;  %v6465_v4 = vld [vmem:[#allocation17_spill] sm:$0xff] }
 0x346   :  { %v3454_v24 = vadd.f32 %v3405_v30, %v3288_v8  ;;  %v3495_v54 = vsel %vm1754_vm3, %v6170_v58, 0.0  ;;  %v6195_v59 = vadd.f32 %v6132_v63, %v3456_v21  ;;  %v2965_v41 = vadd.f32 %v6465_v4, %v2799_v5  ;;  %v4404_v30 = vpop.f32.mrf.mxu0 }
 0x347   :  { %v3494_v61 = vadd.f32 %v3493_v18, %v3492_v46  ;;  %v4417_v22 = vpop.f32.mrf.mxu1  ;;  %v3131_v7 = vadd.f32 %v6092_v55, %v2964_v16  ;;  %v3295_v51 = vadd.f32 %v3268_v40, %v3129_v44  ;;  %v3130_v18 = vadd.f32 %v6108_v27, %v2963_v60 }
 0x348   :  { %v6188_v32 = vadd.f32 %v6132_v63, %v3454_v24  ;;  %v3459_v2 = vadd.f32 %v4417_v22, %v3293_v31  ;;  %v3501_v35 = vsel %vm1754_vm3, %v6195_v59, 0.0  ;;  %v3132_v46 = vadd.f32 %v6102_v14, %v2965_v41 }
 0x349   :  { %v3496_v29 = vadd.f32 %v3495_v54, %v3494_v61  ;;  %v3418_v13 = vpop.f32.mrf.mxu1  ;;  %v3297_v26 = vadd.f32 %v4403_v62, %v3131_v7  ;;  %v3271_v61 = vpop.f32.mrf.mxu0 }
 0x34a   :  { %v3497_v10 = vsel %vm1754_vm3, %v6188_v32, 0.0  ;;  %v3457_v53 = vadd.f32 %v3418_v13, %v3291_v36  ;;  %v3482_v21 = vadd.f32 %v6132_v63, %v3459_v2  ;;  %v3298_v23 = vadd.f32 %v4404_v30, %v3132_v46 }
 0x34b   :  { %v3498_v20 = vadd.f32 %v3497_v10, %v3496_v29  ;;  %v4418_v12 = vpop.f32.mrf.mxu1  ;;  %v3296_v27 = vadd.f32 %v3271_v61, %v3130_v18 }
 0x34c   :  { %v6205_v8 = vadd.f32 %v6132_v63, %v3457_v53  ;;  %v3460_v38 = vadd.f32 %v4418_v12, %v3294_v6  ;;  %v3507_v54 = vsel %vm1754_vm3, %v3482_v21, 0.0 }
 0x34d   :  { %v3500_v34 = vadd.f32 %v3499_v56, %v3498_v20  ;;  %v3421_v52 = vpop.f32.mrf.mxu1 }
 0x34e   :  { %v3458_v15 = vadd.f32 %v3421_v52, %v3292_v25  ;;  %v3503_v24 = vsel %vm1754_vm3, %v6205_v8, 0.0  ;;  %v3483_v36 = vadd.f32 %v6132_v63, %v3460_v38 }
 0x34f   :  { %v3502_v57 = vadd.f32 %v3501_v35, %v3500_v34  ;;  %v4421_v47 = vpop.f32.mrf.mxu1 }
 0x350   :  { %v3481_v55 = vadd.f32 %v6132_v63, %v3458_v15  ;;  %v3463_v19 = vadd.f32 %v4421_v47, %v3297_v26  ;;  %v3509_v17 = vsel %vm1754_vm3, %v3483_v36, 0.0 }
 0x351   :  { %v3504_v0 = vadd.f32 %v3503_v24, %v3502_v57  ;;  %v3434_v39 = vpop.f32.mrf.mxu1 }
 0x352   :  { %v3505_v9 = vsel %vm1754_vm3, %v3481_v55, 0.0  ;;  %v3461_v14 = vadd.f32 %v3434_v39, %v3295_v51  ;;  %v3486_v13 = vadd.f32 %v6132_v63, %v3463_v19 }
 0x353   :  { %v3506_v22 = vadd.f32 %v3505_v9, %v3504_v0  ;;  %v4422_v1 = vpop.f32.mrf.mxu1 }
 0x354   :  { %v3484_v48 = vadd.f32 %v6132_v63, %v3461_v14  ;;  %v3464_v62 = vadd.f32 %v4422_v1, %v3298_v23  ;;  %v3515_v6 = vsel %vm1754_vm3, %v3486_v13, 0.0 }
 0x355   :  { %v3508_v37 = vadd.f32 %v3507_v54, %v3506_v22  ;;  %v3437_v5 = vpop.f32.mrf.mxu1 }
 0x356   :  { %v3462_v50 = vadd.f32 %v3437_v5, %v3296_v27  ;;  %v3511_v31 = vsel %vm1754_vm3, %v3484_v48, 0.0  ;;  %v3487_v3 = vadd.f32 %v6132_v63, %v3464_v62 }
 0x357   :  { %v3510_v29 = vadd.f32 %v3509_v17, %v3508_v37 }
 0x358   :  { %v3485_v10 = vadd.f32 %v6132_v63, %v3462_v50  ;;  %v3517_v40 = vsel %vm1754_vm3, %v3487_v3, 0.0 }
 0x359   :  { %v3512_v53 = vadd.f32 %v3511_v31, %v3510_v29 }
 0x35a   :  { %v3513_v42 = vsel %vm1754_vm3, %v3485_v10, 0.0 }
 0x35b   :  { %v3514_v16 = vadd.f32 %v3513_v42, %v3512_v53 }
 0x35d   :  { %v3516_v44 = vadd.f32 %v3515_v6, %v3514_v16 }
 0x35f   :  { %v3518_v20 = vadd.f32 %v3517_v40, %v3516_v44 }
 0x361   :  { %v3519_v12 = vrot.slane %v3518_v20, 4 }
 0x363   :  { %v3520_v25 = vadd.f32 %v3519_v12, %v3518_v20 }
 0x365   :  { %v3521_v56 = vrot.slane %v3520_v25, 2 }
 0x367   :  { %v3522_v2 = vadd.f32 %v3521_v56, %v3520_v25 }
 0x369   :  { %v3523_v4 = vrot.slane %v3522_v2, 1 }
 0x36b   :  { %v3524_v41 = vadd.f32 %v3523_v4, %v3522_v2 }
 0x36d   :  { %v3525_v11 = vmul.f32 0.0078125, %v3524_v41 }
 0x36f   :  { %v6231_v60 = vsub.f32 %v6136_v49, %v3525_v11  ;;  %v6234_v63 = vsub.f32 %v6149_v45, %v3525_v11  ;;  %v6237_v34 = vsub.f32 %v6146_v43, %v3525_v11  ;;  %v6240_v52 = vsub.f32 %v6158_v28, %v3525_v11 }
 0x370   :  { %v6243_v7 = vsub.f32 %v6170_v58, %v3525_v11  ;;  %v6246_v35 = vsub.f32 %v6188_v32, %v3525_v11  ;;  %v6249_v38 = vsub.f32 %v6183_v33, %v3525_v11  ;;  %v6252_v49 = vsub.f32 %v6195_v59, %v3525_v11 }
 0x371   :  { %v6255_v45 = vsub.f32 %v6205_v8, %v3525_v11  ;;  %v6257_v43 = vsub.f32 %v3481_v55, %v3525_v11  ;;  %v6259_v15 = vsub.f32 %v3482_v21, %v3525_v11  ;;  %v6261_v28 = vsub.f32 %v3483_v36, %v3525_v11 }
 0x372   :  { %v6263_v58 = vsub.f32 %v3484_v48, %v3525_v11  ;;  %v6265_v51 = vsub.f32 %v3485_v10, %v3525_v11  ;;  %v6267_v32 = vsub.f32 %v3486_v13, %v3525_v11  ;;  %v6269_v33 = vsub.f32 %v3487_v3, %v3525_v11 }
 0x373   :  { %v3542_v59 = vmul.f32 %v6231_v60, %v6231_v60  ;;  %v3543_v8 = vmul.f32 %v6234_v63, %v6234_v63  ;;  %v3544_v46 = vmul.f32 %v6237_v34, %v6237_v34  ;;  %v3545_v30 = vmul.f32 %v6240_v52, %v6240_v52 }
 0x374   :  { %v3546_v21 = vmul.f32 %v6243_v7, %v6243_v7  ;;  %v3547_v0 = vmul.f32 %v6246_v35, %v6246_v35  ;;  %v3548_v36 = vmul.f32 %v6249_v38, %v6249_v38  ;;  %v3549_v23 = vmul.f32 %v6252_v49, %v6252_v49 }
 0x375   :  { %v3558_v57 = vsel %vm1754_vm3, %v3542_v59, 0.0  ;;  %v3559_v47 = vsel %vm1754_vm3, %v3543_v8, 0.0  ;;  %v3561_v24 = vsel %vm1754_vm3, %v3544_v46, 0.0  ;;  %v3563_v39 = vsel %vm1754_vm3, %v3545_v30, 0.0 }
 0x376   :  { %v3560_v18 = vadd.f32 %v3559_v47, %v3558_v57  ;;  %v3565_v9 = vsel %vm1754_vm3, %v3546_v21, 0.0  ;;  %v3567_v61 = vsel %vm1754_vm3, %v3547_v0, 0.0  ;;  %v3550_v1 = vmul.f32 %v6255_v45, %v6255_v45 }
 0x377   :  { %v3569_v27 = vsel %vm1754_vm3, %v3548_v36, 0.0  ;;  %v3551_v19 = vmul.f32 %v6257_v43, %v6257_v43  ;;  %v3571_v48 = vsel %vm1754_vm3, %v3549_v23, 0.0  ;;  %v3552_v5 = vmul.f32 %v6259_v15, %v6259_v15  ;;  %v3935_v23 = vld [vmem:[%s6367_s7] ss:$0 sm:$0xff] }
 0x378   :  { %v3562_v55 = vadd.f32 %v3561_v24, %v3560_v18  ;;  %v3573_v17 = vsel %vm1754_vm3, %v3550_v1, 0.0  ;;  %v3553_v50 = vmul.f32 %v6261_v28, %v6261_v28  ;;  %v3554_v31 = vmul.f32 %v6263_v58, %v6263_v58 }
 0x379   :  { %v3575_v29 = vsel %vm1754_vm3, %v3551_v19, 0.0  ;;  %v3577_v10 = vsel %vm1754_vm3, %v3552_v5, 0.0  ;;  %v3555_v3 = vmul.f32 %v6265_v51, %v6265_v51  ;;  %v3556_v6 = vmul.f32 %v6267_v32, %v6267_v32 }
 0x37a   :  { %v3564_v26 = vadd.f32 %v3563_v39, %v3562_v55  ;;  %v3579_v42 = vsel %vm1754_vm3, %v3553_v50, 0.0  ;;  %v3581_v44 = vsel %vm1754_vm3, %v3554_v31, 0.0  ;;  %v3557_v20 = vmul.f32 %v6269_v33, %v6269_v33 }
 0x37b   :  { %v3583_v12 = vsel %vm1754_vm3, %v3555_v3, 0.0  ;;  %v3585_v56 = vsel %vm1754_vm3, %v3556_v6, 0.0 }
 0x37c   :  { %v3566_v14 = vadd.f32 %v3565_v9, %v3564_v26  ;;  %v3587_v4 = vsel %vm1754_vm3, %v3557_v20, 0.0 }
 0x37e   :  { %v3568_v22 = vadd.f32 %v3567_v61, %v3566_v14 }
 0x380   :  { %v3570_v54 = vadd.f32 %v3569_v27, %v3568_v22 }
 0x382   :  { %v3572_v37 = vadd.f32 %v3571_v48, %v3570_v54 }
 0x384   :  { %v3574_v62 = vadd.f32 %v3573_v17, %v3572_v37 }
 0x386   :  { %v3576_v13 = vadd.f32 %v3575_v29, %v3574_v62 }
 0x388   :  { %v3578_v53 = vadd.f32 %v3577_v10, %v3576_v13 }
 0x38a   :  { %v3580_v16 = vadd.f32 %v3579_v42, %v3578_v53 }
 0x38c   :  { %v3582_v40 = vadd.f32 %v3581_v44, %v3580_v16 }
 0x38e   :  { %v3584_v25 = vadd.f32 %v3583_v12, %v3582_v40 }
 0x390   :  { %v3586_v2 = vadd.f32 %v3585_v56, %v3584_v25 }
 0x392   :  { %v3588_v41 = vadd.f32 %v3587_v4, %v3586_v2 }
 0x394   :  { %v3589_v11 = vrot.slane %v3588_v41, 4 }
 0x396   :  { %v3590_v59 = vadd.f32 %v3589_v11, %v3588_v41 }
 0x398   :  { %v3591_v8 = vrot.slane %v3590_v59, 2 }
 0x39a   :  { %v3592_v46 = vadd.f32 %v3591_v8, %v3590_v59 }
 0x39c   :  { %v3593_v30 = vrot.slane %v3592_v46, 1 }
 0x39e   :  { %v3594_v57 = vadd.f32 %v3593_v30, %v3592_v46 }
 0x3a0   :  { %v3595_v47 = vmul.f32 0.0078125, %v3594_v57 }
 0x3a2   :  { %v3596_v18 = vadd.f32 1e-05, %v3595_v47 }
 0x3a4   :  { %4447 = vrsqrt.f32 %v3596_v18 }
 0x3b1   :  { %v4448_v21 = vpop.eup %4447 }
 0x3b2   :  { %v3598_v24 = vmul.f32 %v4448_v21, %v6231_v60  ;;  %v3599_v55 = vmul.f32 %v4448_v21, %v6234_v63  ;;  %v3600_v0 = vmul.f32 %v4448_v21, %v6237_v34  ;;  %v3601_v39 = vmul.f32 %v4448_v21, %v6240_v52 }
 0x3b3   :  { %v3602_v26 = vmul.f32 %v4448_v21, %v6243_v7  ;;  %v3603_v36 = vmul.f32 %v4448_v21, %v6246_v35  ;;  %v3604_v9 = vmul.f32 %v4448_v21, %v6249_v38  ;;  %v3605_v14 = vmul.f32 %v4448_v21, %v6252_v49 }
 0x3b4   :  { %v3606_v60 = vmul.f32 %v4448_v21, %v6255_v45  ;;  %v3607_v63 = vmul.f32 %v4448_v21, %v6257_v43  ;;  %v3608_v34 = vmul.f32 %v4448_v21, %v6259_v15  ;;  %v3609_v52 = vmul.f32 %v4448_v21, %v6261_v28  ;;  %v3936_v15 = vld [vmem:[%s6368_s8] ss:$0 sm:$0xff]  ;;  %s4472_s8 = smov [#allocation4]  }
 0x3b5   :  { %v3610_v7 = vmul.f32 %v4448_v21, %v6263_v58  ;;  %v3611_v35 = vmul.f32 %v4448_v21, %v6265_v51  ;;  %v3612_v38 = vmul.f32 %v4448_v21, %v6267_v32  ;;  %v3613_v49 = vmul.f32 %v4448_v21, %v6269_v33  ;;  %s3697_s28 = sshll.u32 %s4472_s8, 4  ;;  %s3698_s28 = int_to_ptr.vmem [resolvable:$true] %s3697_s28 }
 0x3b6   :  { %v3621_v61 = vmul.f32 %v3935_v23, %v3598_v24  ;;  %v3622_v22 = vmul.f32 %v3935_v23, %v3599_v55  ;;  %v3623_v1 = vmul.f32 %v3935_v23, %v3600_v0  ;;  %v3624_v27 = vmul.f32 %v3935_v23, %v3601_v39  ;;  %s4449_s2 = scalar_lea.vmem %s3698_s28, 2048  ;;  %p4454_p1 = scmp.lt.s32.totalorder %s3698_s28, %s3698_s28 }
 0x3b7   :  { %v3625_v54 = vmul.f32 %v3935_v23, %v3602_v26  ;;  %v3626_v45 = vmul.f32 %v3935_v23, %v3603_v36  ;;  %v3627_v19 = vmul.f32 %v3935_v23, %v3604_v9  ;;  %v3628_v43 = vmul.f32 %v3935_v23, %v3605_v14  ;;  %p4450_p0 = scmp.ne.s32.totalorder %s3698_s28, %s4449_s2  ;;  %p4455_p2 = scmp.lt.s32.totalorder %s4449_s2, %s4449_s2 }
 0x3b8   :  { %v3629_v28 = vmul.f32 %v3935_v23, %v3606_v60  ;;  %v3630_v58 = vmul.f32 %v3935_v23, %v3607_v63  ;;  %v3631_v48 = vmul.f32 %v3935_v23, %v3608_v34  ;;  %v3632_v51 = vmul.f32 %v3935_v23, %v3609_v52 }
 0x3b9   :  { %v3633_v37 = vmul.f32 %v3935_v23, %v3610_v7  ;;  %v3634_v32 = vmul.f32 %v3935_v23, %v3611_v35  ;;  %v3635_v5 = vmul.f32 %v3935_v23, %v3612_v38  ;;  %v3636_v33 = vmul.f32 %v3935_v23, %v3613_v49  ;;  %p4456_p3 = por %p4455_p2, %p4454_p1 }
 0x3ba   :  { %v3644_v17 = vadd.f32 %v3936_v15, %v3621_v61  ;;  %v3645_v62 = vadd.f32 %v3936_v15, %v3622_v22  ;;  %v3646_v50 = vadd.f32 %v3936_v15, %v3623_v1  ;;  %v3647_v29 = vadd.f32 %v3936_v15, %v3624_v27 }
 0x3bb   :  { %v3648_v13 = vadd.f32 %v3936_v15, %v3625_v54  ;;  %v3649_v31 = vadd.f32 %v3936_v15, %v3626_v45  ;;  %v3650_v10 = vadd.f32 %v3936_v15, %v3627_v19  ;;  %v3651_v53 = vadd.f32 %v3936_v15, %v3628_v43  ;;  %p4457_p4 = pnand %p4456_p3, %p4450_p0 }
 0x3bc   :  { %v3652_v3 = vadd.f32 %v3936_v15, %v3629_v28  ;;  %v3653_v42 = vadd.f32 %v3936_v15, %v3630_v58  ;;  %v3654_v16 = vadd.f32 %v3936_v15, %v3631_v48  ;;  %v3655_v6 = vadd.f32 %v3936_v15, %v3632_v51 }
 0x3bd   :  { %v3656_v44 = vadd.f32 %v3936_v15, %v3633_v37  ;;  %v3657_v40 = vadd.f32 %v3936_v15, %v3634_v32  ;;  %v3658_v20 = vadd.f32 %v3936_v15, %v3635_v5  ;;  %v3659_v12 = vadd.f32 %v3936_v15, %v3636_v33 }
 0x3be   :  { %v3660_v25 = vmax.f32 %v3644_v17, 0.0  ;;  %v3661_v56 = vmax.f32 %v3645_v62, 0.0  ;;  %v3662_v2 = vmax.f32 %v3646_v50, 0.0  ;;  %v3663_v4 = vmax.f32 %v3647_v29, 0.0 }
 0x3bf   :  { %v3664_v41 = vmax.f32 %v3648_v13, 0.0  ;;  %v3665_v11 = vmax.f32 %v3649_v31, 0.0  ;;  %v3666_v59 = vmax.f32 %v3650_v10, 0.0  ;;  %v3667_v8 = vmax.f32 %v3651_v53, 0.0 }
 0x3c0   :  { %v3668_v46 = vmax.f32 %v3652_v3, 0.0  ;;  %v3669_v30 = vmax.f32 %v3653_v42, 0.0  ;;  %v3670_v57 = vmax.f32 %v3654_v16, 0.0  ;;  %v3671_v47 = vmax.f32 %v3655_v6, 0.0  ;;  %3676 = vst.msk [vmem:[#allocation4] sm:$0xff] %vm1754_vm3, %v3660_v25  ;;  %3677 = vst.msk [vmem:[#allocation4 + $0x8] sm:$0xff] %vm1754_vm3, %v3661_v56 }
 0x3c1   :  { %3678 = vst.msk [vmem:[#allocation4 + $0x10] sm:$0xff] %vm1754_vm3, %v3662_v2  ;;  %3679 = vst.msk [vmem:[#allocation4 + $0x18] sm:$0xff] %vm1754_vm3, %v3663_v4  ;;  %v3672_v18 = vmax.f32 %v3656_v44, 0.0  ;;  %v3673_v21 = vmax.f32 %v3657_v40, 0.0  ;;  %v3674_v24 = vmax.f32 %v3658_v20, 0.0  ;;  %v3675_v55 = vmax.f32 %v3659_v12, 0.0 }
 0x3c2   :  { %3680 = vst.msk [vmem:[#allocation4 + $0x20] sm:$0xff] %vm1754_vm3, %v3664_v41  ;;  %3681 = vst.msk [vmem:[#allocation4 + $0x28] sm:$0xff] %vm1754_vm3, %v3665_v11 }
 0x3c3   :  { %3682 = vst.msk [vmem:[#allocation4 + $0x30] sm:$0xff] %vm1754_vm3, %v3666_v59  ;;  %3683 = vst.msk [vmem:[#allocation4 + $0x38] sm:$0xff] %vm1754_vm3, %v3667_v8 }
 0x3c4   :  { %3684 = vst.msk [vmem:[#allocation4 + $0x40] sm:$0xff] %vm1754_vm3, %v3668_v46  ;;  %3685 = vst.msk [vmem:[#allocation4 + $0x48] sm:$0xff] %vm1754_vm3, %v3669_v30 }
 0x3c5   :  { %3686 = vst.msk [vmem:[#allocation4 + $0x50] sm:$0xff] %vm1754_vm3, %v3670_v57  ;;  %3687 = vst.msk [vmem:[#allocation4 + $0x58] sm:$0xff] %vm1754_vm3, %v3671_v47 }
 0x3c6   :  { %3688 = vst.msk [vmem:[#allocation4 + $0x60] sm:$0xff] %vm1754_vm3, %v3672_v18  ;;  %3689 = vst.msk [vmem:[#allocation4 + $0x68] sm:$0xff] %vm1754_vm3, %v3673_v21 }
 0x3c7   :  { %3690 = vst.msk [vmem:[#allocation4 + $0x70] sm:$0xff] %vm1754_vm3, %v3674_v24  ;;  %3691 = vst.msk [vmem:[#allocation4 + $0x78] sm:$0xff] %vm1754_vm3, %v3675_v55 }
 0x3c8   :  { %4460 = shalt.err (!%p4457_p4)
}
 0x3c9   :  { %s4473_s29 = smov 128   ;;  %s4474_s30 = smov 8  }
 0x3ca   :  { %3703 = dma.vmem_to_hbm [thread:$0]  %s3698_s28, 2048, %s6369_s9, [#allocation5], %s4473_s29, %s4473_s29, %s4474_s30  }
 0x3cb   :  { %4469 = dma.done.wait [#allocation5], 2048  }
 0x3cc   :  { %4470 = vsyncadd [#allocation5], 4294965248 }
 0x3cd   :  { %3707 = vsyncpa [#allocation5], 1 }

</bundles_post_ra>
